<compile_context>
chip_gen: v6e
topology: v6e:2x2x1
jax: 0.10.0
libtpu: 0.0.40
codegen_flags: <defaults>
</compile_context>

<pallas_src>
import math

import jax
import jax.numpy as jnp
import numpy as np
from jax import lax
from jax.experimental import pallas as pl
from jax.experimental.pallas import tpu as pltpu

_NEG_FILL = -32768.0  # torch masked_fill(..., -2**15); plain python float (no capture)


# --------------------------------------------------------------------------- helpers
def _layer_norm(x, w, b, eps=1e-5):
    mu = jnp.mean(x, axis=-1, keepdims=True)
    xc = x - mu
    var = jnp.mean(xc * xc, axis=-1, keepdims=True)
    return xc * lax.rsqrt(var + eps) * w + b


def _gelu_tanh(x):
    # TODO(synk): nn.GELU default is the exact erf form; tanh approximation is used
    # because erf is not guaranteed to lower in Mosaic (difference ~1e-3).
    c = 0.7978845608028654  # sqrt(2/pi)
    return 0.5 * x * (1.0 + jnp.tanh(c * (x + 0.044715 * x * x * x)))


def _shift_rows(x, s):
    """y[i] = x[i + s] (static s), zero outside [0, L)."""
    L, P = x.shape
    if s == 0:
        return x
    if s >= L or -s >= L:
        return jnp.zeros_like(x)
    if s > 0:
        return jnp.concatenate([x[s:], jnp.zeros((s, P), x.dtype)], axis=0)
    return jnp.concatenate([jnp.zeros((-s, P), x.dtype), x[: L + s]], axis=0)


def _cum_lookup(csum, s):
    """y[i] = csum[i+s] with csum[<0] = 0 and csum[>=L] = csum[L-1] (static s)."""
    L, P = csum.shape
    if s == 0:
        return csum
    if s > 0:
        if s >= L:
            return jnp.broadcast_to(csum[L - 1:L], (L, P))
        tail = jnp.broadcast_to(csum[L - 1:L], (s, P))
        return jnp.concatenate([csum[s:], tail], axis=0)
    s = -s
    if s >= L:
        return jnp.zeros_like(csum)
    return jnp.concatenate([jnp.zeros((s, P), csum.dtype), csum[: L - s]], axis=0)


def _bucket_ranges(L, maxR):
    """Relative-distance -> embedding-bucket ranges, mirroring the PyTorch table.

    Returns [(bucket_id, lo_dist, hi_dist), ...].  Each row of the dense (L, L) table
    takes only 2*maxR+1 distinct values, so the (M,L,L)@(L,P) matmuls collapse to
    per-bucket sums of pAlpha rows (the review's "bucketed" formulation).
    """
    if maxR <= 0 or L <= 0:
        return []
    dd = np.arange(L, dtype=np.float64)
    val = dd.copy()
    far = dd > maxR
    if far.any():
        val[far] = maxR + np.log2(dd[far] - maxR)
    val = np.clip(val, 0.0, float(2 * maxR))
    buck = val.astype(np.int64)  # truncation matches torch .long()
    out = []
    for r in range(2 * maxR + 1):
        js = np.nonzero(buck == r)[0]
        if js.size:
            out.append((int(r), int(js.min()), int(js.max())))
    return out


# --------------------------------------------------------------------------- kernel
def _make_kernel(L, C, M, P, ranges, has_mask, has_ps):
    f32 = jnp.float32
    bf16 = jnp.bfloat16
    has_relpos = len(ranges) > 0
    need_cumsum = any(hi > lo for (_, lo, hi) in ranges)

    def kernel(*refs):
        it = iter(refs)
        qx_ref = next(it); kx_ref = next(it); vx_ref = next(it)
        mask_ref = next(it) if has_mask else None
        ps0_ref = next(it) if has_ps else None
        ps1_ref = next(it) if has_ps else None
        embk_ref = next(it) if has_relpos else None
        embb_ref = next(it) if has_relpos else None
        wp = next(it); bp = next(it)
        wq = next(it); bq = next(it)
        wk = next(it); bk = next(it)
        wv = next(it); bv = next(it)
        wo = next(it); bo = next(it)
        ln1_w = next(it); ln1_b = next(it)
        wf1 = next(it); bf1 = next(it)
        wf2 = next(it); bf2 = next(it)
        ln2_w = next(it); ln2_b = next(it)
        x_out = next(it); ps0_out = next(it); ps1_out = next(it)
        s_scr = next(it)

        qx = qx_ref[0]                    # (L, C) bf16
        kxb = kx_ref[0]                   # (L, C) bf16
        vx = vx_ref[0]                    # (L, C) f32 (residual path)
        vxb = vx.astype(bf16)

        # ---- pseudo-token scores + softmax over the sequence (dim L) ----
        pscore = jnp.dot(vxb, wp[...], preferred_element_type=f32) + bp[...]
        if has_ps:
            pscore = pscore + ps0_ref[0]
        if has_mask:
            pscore = jnp.where(mask_ref[0] > 0, pscore, _NEG_FILL)
        pmax = jnp.max(pscore, axis=0, keepdims=True)
        pexp = jnp.exp(pscore - pmax)
        psum = jnp.sum(pexp, axis=0, keepdims=True)
        pAlpha = pexp * pl.reciprocal(psum, approx=True)        # (L, P) softmax over L
        pA_b = pAlpha.astype(bf16)

        # compressed pseudo-token keys / values: pAlpha^T @ kx / vx -> (P, C)
        kx_p = lax.dot_general(pA_b, kxb, (((0,), (0,)), ((), ())),
                               preferred_element_type=f32)
        vx_p = lax.dot_general(pA_b, vxb, (((0,), (0,)), ((), ())),
                               preferred_element_type=f32)
        kx_pb = kx_p.astype(bf16)
        vx_pb = vx_p.astype(bf16)

        # ---- relative-position bucket sums (replaces the dense (M,L,L) tables) ----
        # S[r][i, p] = sum_{j : bucket(|i-j|) == r} pAlpha[j, p]
        S = {}
        if has_relpos:
            csum = None
            if need_cumsum:
                csum = pAlpha
                step = 1
                while step < L:                      # Hillis-Steele prefix sum (f32)
                    csum = csum + _shift_rows(csum, -step)
                    step *= 2
            for (r, lo, hi) in ranges:
                if lo == 0:                          # bucket 0: distance 0 only
                    S[r] = pAlpha
                elif hi == lo:                       # single-distance bucket (exact)
                    S[r] = _shift_rows(pAlpha, lo) + _shift_rows(pAlpha, -lo)
                else:                                # far bucket: cumsum differences
                    right = _cum_lookup(csum, hi) - _cum_lookup(csum, lo - 1)
                    left = _cum_lookup(csum, -lo) - _cum_lookup(csum, -hi - 1)
                    S[r] = right + left

        # ---- multi-head attention over the P pseudo tokens ----
        # NB: the 1/sqrt(dk) scale is folded into WQ/bq on the host, i.e. applied to
        # Q@K^T BEFORE the kpos/bpos modulation -- same order as the PyTorch module.
        out_acc = jnp.zeros((L, C), f32)
        for m in range(M):                           # M small & static -> unrolled
            q_m = jnp.dot(qx, wq[m], preferred_element_type=f32) + bq[m]       # (L, Dh)
            k_m = jnp.dot(kx_pb, wk[m], preferred_element_type=f32) + bk[m]    # (P, Dh)
            v_m = jnp.dot(vx_pb, wv[m], preferred_element_type=f32) + bv[m]    # (P, dk)

            s_m = lax.dot_general(q_m.astype(bf16), k_m.astype(bf16),
                                  (((1,), (1,)), ((), ())),
                                  preferred_element_type=f32)                  # (L, P)
            if has_relpos:
                kpos = None
                bpos = None
                for (r, _, _) in ranges:
                    ek = embk_ref[r, m]              # scalar reads from SMEM
                    eb = embb_ref[r, m]
                    t = S[r]
                    kpos = ek * t if kpos is None else kpos + ek * t
                    bpos = eb * t if bpos is None else bpos + eb * t
                s_m = s_m * kpos + bpos
            if has_ps:
                s_m = s_m + ps1_ref[0, m]

            s_scr[:, m * P:(m + 1) * P] = s_m        # lane-dense score slab (scratch)

            smax = jnp.max(s_m, axis=-1, keepdims=True)
            sexp = jnp.exp(s_m - smax)
            ssum = jnp.sum(sexp, axis=-1, keepdims=True)
            a_m = sexp * pl.reciprocal(ssum, approx=True)                      # (L, P)

            z_m = jnp.dot(a_m.astype(bf16), v_m.astype(bf16),
                          preferred_element_type=f32)                          # (L, dk)
            # head-concat folded into the output projection: out += z_m @ WO[m]
            out_acc = out_acc + jnp.dot(z_m.astype(bf16), wo[m],
                                        preferred_element_type=f32)

        z = out_acc + bo[...]                                                  # (L, C)

        # ---- FFN (residual on the ORIGINAL vx; dropouts are identity in eval) ----
        h = _layer_norm(vx + z, ln1_w[...], ln1_b[...])
        ff = jnp.dot(h.astype(bf16), wf1[...], preferred_element_type=f32) + bf1[...]
        ff = _gelu_tanh(ff.astype(bf16))             # bf16 EUP path (v6e/v7x)
        ff = jnp.dot(ff, wf2[...], preferred_element_type=f32) + bf2[...]
        out = _layer_norm(h + ff, ln2_w[...], ln2_b[...])

        x_out[0] = out
        ps0_out[0] = pscore
        ps1_out[0] = s_scr[...]                      # single dense (L, M*P) store

    return kernel


# --------------------------------------------------------------------------- wrapper
def transformer_pseudoformer(qx, kx, vx, preScores, maskPAD, params, *,
                             dk, multiNum, maxRelativeDist=7, dkEnhance=1):
    """Equivalent of Transformer_Pseudoformer.forward((qx, kx, vx, preScores, maskPAD))."""
    f32, bf16 = jnp.float32, jnp.bfloat16
    B, L, C = qx.shape
    M = multiNum
    P = params["wp"].shape[1]
    Dh = dkEnhance * dk

    ranges = _bucket_ranges(L, maxRelativeDist)
    has_relpos = len(ranges) > 0
    has_ps = preScores is not None
    has_mask = maskPAD is not None

    # ---- host-side constant folding: 1/sqrt(dk) into WQ, per-head weight splits ----
    scale = 1.0 / math.sqrt(dk)

    def split_heads(w, b, dh):
        wh = w.reshape(C, M, dh).transpose(1, 0, 2)          # (M, C, dh)
        bh = b.reshape(1, M, dh).transpose(1, 0, 2)          # (M, 1, dh)
        return wh, bh

    wq_h, bq_h = split_heads(params["wq"] * scale, params["bq"] * scale, Dh)
    wk_h, bk_h = split_heads(params["wk"], params["bk"], Dh)
    wv_h, bv_h = split_heads(params["wv"], params["bv"], dk)
    wo_h = params["wo"].reshape(M, dk, C)

    weights = [
        ("wp", params["wp"], bf16), ("bp", params["bp"], f32),
        ("wq", wq_h, bf16), ("bq", bq_h, f32),
        ("wk", wk_h, bf16), ("bk", bk_h, f32),
        ("wv", wv_h, bf16), ("bv", bv_h, f32),
        ("wo", wo_h, bf16), ("bo", params["bo"], f32),
        ("ln1_w", params["ln1_w"], f32), ("ln1_b", params["ln1_b"], f32),
        ("wf1", params["wf1"], bf16), ("bf1", params["bf1"], f32),
        ("wf2", params["wf2"], bf16), ("bf2", params["bf2"], f32),
        ("ln2_w", params["ln2_w"], f32), ("ln2_b", params["ln2_b"], f32),
    ]

    def vmem_spec(arr):
        nd = arr.ndim
        return pl.BlockSpec(arr.shape, lambda b, _nd=nd: (0,) * _nd)

    operands = [qx.astype(bf16), kx.astype(bf16), vx.astype(f32)]
    in_specs = [
        pl.BlockSpec((1, L, C), lambda b: (b, 0, 0)),
        pl.BlockSpec((1, L, C), lambda b: (b, 0, 0)),
        pl.BlockSpec((1, L, C), lambda b: (b, 0, 0)),
    ]
    if has_mask:
        mask = (maskPAD[:, 0] != 0).astype(f32)[..., None]   # (B, L, 1), 1 = keep
        operands.append(mask)
        in_specs.append(pl.BlockSpec((1, L, 1), lambda b: (b, 0, 0)))
    if has_ps:
        operands += [preScores[0].astype(f32), preScores[1].astype(f32)]
        in_specs += [pl.BlockSpec((1, L, P), lambda b: (b, 0, 0)),
                     pl.BlockSpec((1, M, L, P), lambda b: (b, 0, 0, 0))]
    if has_relpos:
        # tiny (2*maxR+1, M) embedding tables, scalar-indexed -> SMEM
        operands += [params["embK"].astype(f32), params["embB"].astype(f32)]
        in_specs += [pl.BlockSpec(memory_space=pltpu.MemorySpace.SMEM),
                     pl.BlockSpec(memory_space=pltpu.MemorySpace.SMEM)]
    for _, arr, dt in weights:
        arr = arr.astype(dt)
        operands.append(arr)
        in_specs.append(vmem_spec(arr))

    out_specs = (
        pl.BlockSpec((1, L, C), lambda b: (b, 0, 0)),
        pl.BlockSpec((1, L, P), lambda b: (b, 0, 0)),
        pl.BlockSpec((1, L, M * P), lambda b: (b, 0, 0)),      # lane-dense scores
    )
    out_shape = (
        jax.ShapeDtypeStruct((B, L, C), f32),
        jax.ShapeDtypeStruct((B, L, P), f32),
        jax.ShapeDtypeStruct((B, L, M * P), f32),
    )
    scratch_shapes = [pltpu.VMEM((L, M * P), f32)]

    # ---- VMEM budget + cost estimate (review item: set vmem_limit_bytes / CostEstimate)
    w_bytes = sum(int(np.prod(a.shape)) * np.dtype(dt).itemsize for _, a, dt in weights)
    act_bytes = L * C * (2 + 2 + 4) + (L * 4 if has_mask else 0)
    if has_ps:
        act_bytes += L * P * 4 + M * L * P * 4
    out_bytes = L * C * 4 + L * P * 4 + L * M * P * 4
    per_step = w_bytes + act_bytes + out_bytes + L * M * P * 4
    vmem_limit = int(min(96 * 2 ** 20, max(32 * 2 ** 20, 4 * per_step)))

    C4 = 4 * C
    R = len(ranges)
    flops = 2 * (L * C * P + 2 * L * P * C
                 + M * (L * C * Dh + P * C * Dh + P * C * dk)
                 + M * (L * P * Dh + L * P * dk + L * dk * C)
                 + L * C * C4 + L * C4 * C) + 4 * (M + 2) * R * L * P
    transcend = L * P + M * L * P + L * C4
    bytes_accessed = (sum(int(np.prod(o.shape)) * o.dtype.itemsize for o in operands)
                      + sum(int(np.prod(s.shape)) * np.dtype(s.dtype).itemsize
                            for s in out_shape))
    cost = pl.CostEstimate(flops=int(B * flops), transcendentals=int(B * transcend),
                           bytes_accessed=int(bytes_accessed))

    kernel = _make_kernel(L, C, M, P, ranges, has_mask, has_ps)
    x, pscore, scores_flat = pl.pallas_call(
        kernel,
        grid=(B,),
        in_specs=in_specs,
        out_specs=out_specs,
        out_shape=out_shape,
        scratch_shapes=scratch_shapes,
        compiler_params=pltpu.CompilerParams(
            dimension_semantics=("parallel",),
            vmem_limit_bytes=vmem_limit,
        ),
        cost_estimate=cost,
    )(*operands)

    # lane-dense kernel output -> PyTorch layout (B, multiNum, L, P)
    scores = scores_flat.reshape(B, L, M, P).transpose(0, 2, 1, 3)
    return x, x, x, (pscore, scores), maskPAD


# --------------------------------------------------------------------------- params / reference
def init_params(key, pseudoTknNum, feaSize, dk, multiNum, maxRelativeDist=7, dkEnhance=1):
    """truncated-normal(std=0.02) weights, zero biases, LayerNorm w=1 / b=0
    (matches Transformer_Pseudoformer._reset_parameters). Weights stored (in, out)."""
    C = feaSize
    hq = dkEnhance * dk * multiNum
    hv = dk * multiNum

    def tn(k, shape):
        return jax.random.truncated_normal(k, -2.0, 2.0, shape, jnp.float32) * 0.02

    ks = jax.random.split(key, 9)
    return {
        "wp": tn(ks[0], (C, pseudoTknNum)), "bp": jnp.zeros((1, pseudoTknNum), jnp.float32),
        "wq": tn(ks[1], (C, hq)), "bq": jnp.zeros((1, hq), jnp.float32),
        "wk": tn(ks[2], (C, hq)), "bk": jnp.zeros((1, hq), jnp.float32),
        "wv": tn(ks[3], (C, hv)), "bv": jnp.zeros((1, hv), jnp.float32),
        "wo": tn(ks[4], (hv, C)), "bo": jnp.zeros((1, C), jnp.float32),
        "embK": tn(ks[5], (2 * maxRelativeDist + 1, multiNum)),
        "embB": tn(ks[6], (2 * maxRelativeDist + 1, multiNum)),
        "ln1_w": jnp.ones((1, C), jnp.float32), "ln1_b": jnp.zeros((1, C), jnp.float32),
        "wf1": tn(ks[7], (C, 4 * C)), "bf1": jnp.zeros((1, 4 * C), jnp.float32),
        "wf2": tn(ks[8], (4 * C, C)), "bf2": jnp.zeros((1, C), jnp.float32),
        "ln2_w": jnp.ones((1, C), jnp.float32), "ln2_b": jnp.zeros((1, C), jnp.float32),
    }


def _reference(qx, kx, vx, preScores, maskPAD, params, *, dk, multiNum,
               maxRelativeDist, dkEnhance):
    """Pure-JAX mirror of the PyTorch module (eval mode), for a loose sanity check."""
    B, L, C = qx.shape
    M = multiNum
    P = params["wp"].shape[1]
    Dh = dkEnhance * dk

    pScore = vx @ params["wp"] + params["bp"]
    if preScores is not None:
        pScore = pScore + preScores[0]
    if maskPAD is not None:
        keep = (maskPAD[:, 0] != 0)[..., None]
        pScore = jnp.where(keep, pScore, _NEG_FILL)
    pAlpha = jax.nn.softmax(pScore, axis=1)
    kxc = jnp.einsum('blp,blc->bpc', pAlpha, kx)
    vxc = jnp.einsum('blp,blc->bpc', pAlpha, vx)
    q = (qx @ params["wq"] + params["bq"]).reshape(B, L, M, Dh).transpose(0, 2, 1, 3)
    k = (kxc @ params["wk"] + params["bk"]).reshape(B, P, M, Dh).transpose(0, 2, 1, 3)
    v = (vxc @ params["wv"] + params["bv"]).reshape(B, P, M, dk).transpose(0, 2, 1, 3)
    scores = jnp.einsum('bmld,bmpd->bmlp', q, k) / math.sqrt(dk)
    if maxRelativeDist > 0:
        idx = jnp.arange(L)
        d = jnp.abs(idx[:, None] - idx[None, :]).astype(jnp.float32)
        d = jnp.where(d > maxRelativeDist,
                      maxRelativeDist + jnp.log2(jnp.maximum(d - maxRelativeDist, 1e-9)),
                      d)
        d = jnp.clip(d, 0, 2 * maxRelativeDist).astype(jnp.int32)
        RK = jnp.transpose(params["embK"][d], (2, 1, 0))
        RB = jnp.transpose(params["embB"][d], (2, 1, 0))
        Kpos = jnp.einsum('mij,bjp->bmip', RK, pAlpha)
        Bpos = jnp.einsum('mij,bjp->bmip', RB, pAlpha)
        scores = scores * Kpos + Bpos
    if preScores is not None:
        scores = scores + preScores[1]
    alpha = jax.nn.softmax(scores, axis=3)
    z = jnp.einsum('bmlp,bmpd->bmld', alpha, v)
    z = z.transpose(0, 2, 1, 3).reshape(B, L, M * dk) @ params["wo"] + params["bo"]

    def ln(x, w, b):
        mu = x.mean(-1, keepdims=True)
        var = ((x - mu) ** 2).mean(-1, keepdims=True)
        return (x - mu) / jnp.sqrt(var + 1e-5) * w + b

    h = ln(vx + z, params["ln1_w"], params["ln1_b"])
    ff = jax.nn.gelu(h @ params["wf1"] + params["bf1"], approximate=True)
    ff = ff @ params["wf2"] + params["bf2"]
    x = ln(h + ff, params["ln2_w"], params["ln2_b"])
    return x, pScore, scores


# --------------------------------------------------------------------------- test
if __name__ == "__main__":
    B, L = 2, 8
    feaSize, dk, multiNum, pseudoTknNum = 32, 8, 4, 8
    maxRelativeDist, dkEnhance = 7, 1

    key = jax.random.PRNGKey(0)
    kq, kk, kv, kp = jax.random.split(key, 4)
    qx = jax.random.normal(kq, (B, L, feaSize), jnp.float32)
    kx = jax.random.normal(kk, (B, L, feaSize), jnp.float32)
    vx = jax.random.normal(kv, (B, L, feaSize), jnp.float32)
    maskPAD = jnp.ones((B, L, L), jnp.int32)          # all-valid pad mask

    params = init_params(kp, pseudoTknNum, feaSize, dk, multiNum,
                         maxRelativeDist=maxRelativeDist, dkEnhance=dkEnhance)

    x, kx_o, vx_o, (pScore, scores), mask_o = transformer_pseudoformer(
        qx, kx, vx, None, maskPAD, params,
        dk=dk, multiNum=multiNum, maxRelativeDist=maxRelativeDist, dkEnhance=dkEnhance)

    jax.block_until_ready(x)
    jax.block_until_ready(pScore)
    jax.block_until_ready(scores)

    assert x.shape == (B, L, feaSize)
    assert pScore.shape == (B, L, pseudoTknNum)
    assert scores.shape == (B, multiNum, L, pseudoTknNum)
    assert bool(jnp.isfinite(x).all())
    assert bool(jnp.isfinite(pScore).all())
    assert bool(jnp.isfinite(scores).all())

    # Loose sanity check vs a pure-JAX reference (bf16 MXU math, approx reciprocal and
    # tanh-GELU mean the kernel is not bit-exact).
    x_ref, ps_ref, sc_ref = _reference(qx, kx, vx, None, maskPAD, params,
                                       dk=dk, multiNum=multiNum,
                                       maxRelativeDist=maxRelativeDist,
                                       dkEnhance=dkEnhance)
    assert float(jnp.max(jnp.abs(x - x_ref))) < 5e-2
    assert float(jnp.max(jnp.abs(pScore - ps_ref))) < 5e-2
    assert float(jnp.max(jnp.abs(scores - sc_ref))) < 5e-2

    print("KERNEL_OK")
</pallas_src>

<mosaic_0001>
module attributes {stable_mosaic.version = 11 : i64} {
  func.func @kernel(%arg0: i32, %arg1: memref<1x8x32xbf16, #tpu.memory_space<vmem>>, %arg2: memref<1x8x32xbf16, #tpu.memory_space<vmem>>, %arg3: memref<1x8x32xf32, #tpu.memory_space<vmem>>, %arg4: memref<1x8x1xf32, #tpu.memory_space<vmem>>, %arg5: memref<15x4xf32, #tpu.memory_space<smem>>, %arg6: memref<15x4xf32, #tpu.memory_space<smem>>, %arg7: memref<32x8xbf16, #tpu.memory_space<vmem>>, %arg8: memref<1x8xf32, #tpu.memory_space<vmem>>, %arg9: memref<4x32x8xbf16, #tpu.memory_space<vmem>>, %arg10: memref<4x1x8xf32, #tpu.memory_space<vmem>>, %arg11: memref<4x32x8xbf16, #tpu.memory_space<vmem>>, %arg12: memref<4x1x8xf32, #tpu.memory_space<vmem>>, %arg13: memref<4x32x8xbf16, #tpu.memory_space<vmem>>, %arg14: memref<4x1x8xf32, #tpu.memory_space<vmem>>, %arg15: memref<4x8x32xbf16, #tpu.memory_space<vmem>>, %arg16: memref<1x32xf32, #tpu.memory_space<vmem>>, %arg17: memref<1x32xf32, #tpu.memory_space<vmem>>, %arg18: memref<1x32xf32, #tpu.memory_space<vmem>>, %arg19: memref<32x128xbf16, #tpu.memory_space<vmem>>, %arg20: memref<1x128xf32, #tpu.memory_space<vmem>>, %arg21: memref<128x32xbf16, #tpu.memory_space<vmem>>, %arg22: memref<1x32xf32, #tpu.memory_space<vmem>>, %arg23: memref<1x32xf32, #tpu.memory_space<vmem>>, %arg24: memref<1x32xf32, #tpu.memory_space<vmem>>, %arg25: memref<1x8x32xf32, #tpu.memory_space<vmem>>, %arg26: memref<1x8x8xf32, #tpu.memory_space<vmem>>, %arg27: memref<1x8x32xf32, #tpu.memory_space<vmem>>, %arg28: memref<8x32xf32, #tpu.memory_space<vmem>>) attributes {dimension_semantics = [#tpu.dimension_semantics<parallel>], iteration_bounds = array<i64: 2>, scalar_prefetch = 0 : i64, scratch_operands = 1 : i64, tpu.core_type = #tpu.core_type<tc>, window_params = [{transform_indices = @transform_0, window_bounds = array<i64: 1, 8, 32>}, {transform_indices = @transform_1, window_bounds = array<i64: 1, 8, 32>}, {transform_indices = @transform_2, window_bounds = array<i64: 1, 8, 32>}, {transform_indices = @transform_3, window_bounds = array<i64: 1, 8, 1>}, {transform_indices = @transform_4, window_bounds = array<i64: 15, 4>}, {transform_indices = @transform_5, window_bounds = array<i64: 15, 4>}, {pipeline_mode = #tpu.pipeline_mode<synchronous>, transform_indices = @transform_6, window_bounds = array<i64: 32, 8>}, {pipeline_mode = #tpu.pipeline_mode<synchronous>, transform_indices = @transform_7, window_bounds = array<i64: 1, 8>}, {pipeline_mode = #tpu.pipeline_mode<synchronous>, transform_indices = @transform_8, window_bounds = array<i64: 4, 32, 8>}, {pipeline_mode = #tpu.pipeline_mode<synchronous>, transform_indices = @transform_9, window_bounds = array<i64: 4, 1, 8>}, {pipeline_mode = #tpu.pipeline_mode<synchronous>, transform_indices = @transform_10, window_bounds = array<i64: 4, 32, 8>}, {pipeline_mode = #tpu.pipeline_mode<synchronous>, transform_indices = @transform_11, window_bounds = array<i64: 4, 1, 8>}, {pipeline_mode = #tpu.pipeline_mode<synchronous>, transform_indices = @transform_12, window_bounds = array<i64: 4, 32, 8>}, {pipeline_mode = #tpu.pipeline_mode<synchronous>, transform_indices = @transform_13, window_bounds = array<i64: 4, 1, 8>}, {pipeline_mode = #tpu.pipeline_mode<synchronous>, transform_indices = @transform_14, window_bounds = array<i64: 4, 8, 32>}, {pipeline_mode = #tpu.pipeline_mode<synchronous>, transform_indices = @transform_15, window_bounds = array<i64: 1, 32>}, {pipeline_mode = #tpu.pipeline_mode<synchronous>, transform_indices = @transform_16, window_bounds = array<i64: 1, 32>}, {pipeline_mode = #tpu.pipeline_mode<synchronous>, transform_indices = @transform_17, window_bounds = array<i64: 1, 32>}, {pipeline_mode = #tpu.pipeline_mode<synchronous>, transform_indices = @transform_18, window_bounds = array<i64: 32, 128>}, {pipeline_mode = #tpu.pipeline_mode<synchronous>, transform_indices = @transform_19, window_bounds = array<i64: 1, 128>}, {pipeline_mode = #tpu.pipeline_mode<synchronous>, transform_indices = @transform_20, window_bounds = array<i64: 128, 32>}, {pipeline_mode = #tpu.pipeline_mode<synchronous>, transform_indices = @transform_21, window_bounds = array<i64: 1, 32>}, {pipeline_mode = #tpu.pipeline_mode<synchronous>, transform_indices = @transform_22, window_bounds = array<i64: 1, 32>}, {pipeline_mode = #tpu.pipeline_mode<synchronous>, transform_indices = @transform_23, window_bounds = array<i64: 1, 32>}, {transform_indices = @transform_24, window_bounds = array<i64: 1, 8, 32>}, {transform_indices = @transform_25, window_bounds = array<i64: 1, 8, 8>}, {transform_indices = @transform_26, window_bounds = array<i64: 1, 8, 32>}]} {
    %c0 = arith.constant 0 : index
    %c0_0 = arith.constant 0 : index
    %c0_1 = arith.constant 0 : index
    %0 = vector.load %arg1[%c0, %c0_0, %c0_1] : memref<1x8x32xbf16, #tpu.memory_space<vmem>>, vector<1x8x32xbf16>
    %1 = vector.shape_cast %0 : vector<1x8x32xbf16> to vector<8x32xbf16>
    %c0_2 = arith.constant 0 : index
    %c0_3 = arith.constant 0 : index
    %c0_4 = arith.constant 0 : index
    %2 = vector.load %arg2[%c0_2, %c0_3, %c0_4] : memref<1x8x32xbf16, #tpu.memory_space<vmem>>, vector<1x8x32xbf16>
    %3 = vector.shape_cast %2 : vector<1x8x32xbf16> to vector<8x32xbf16>
    %c0_5 = arith.constant 0 : index
    %c0_6 = arith.constant 0 : index
    %c0_7 = arith.constant 0 : index
    %4 = vector.load %arg3[%c0_5, %c0_6, %c0_7] : memref<1x8x32xf32, #tpu.memory_space<vmem>>, vector<1x8x32xf32>
    %5 = vector.shape_cast %4 : vector<1x8x32xf32> to vector<8x32xf32>
    %6 = arith.truncf %5 : vector<8x32xf32> to vector<8x32xbf16>
    %c0_8 = arith.constant 0 : index
    %c0_9 = arith.constant 0 : index
    %7 = vector.load %arg7[%c0_8, %c0_9] : memref<32x8xbf16, #tpu.memory_space<vmem>>, vector<32x8xbf16>
    %cst = arith.constant dense<0.000000e+00> : vector<8x8xf32>
    %8 = tpu.matmul %6, %7, %cst {dimension_numbers = #tpu.dot_dimension_numbers<[1], [0], [0], [1], [0, 0, 1, 1], [], []>} : vector<8x32xbf16>, vector<32x8xbf16>, vector<8x8xf32> -> vector<8x8xf32>
    %c0_10 = arith.constant 0 : index
    %c0_11 = arith.constant 0 : index
    %9 = vector.load %arg8[%c0_10, %c0_11] : memref<1x8xf32, #tpu.memory_space<vmem>>, vector<1x8xf32>
    %10 = vector.broadcast %9 : vector<1x8xf32> to vector<8x8xf32>
    %11 = arith.addf %8, %10 : vector<8x8xf32>
    %c0_12 = arith.constant 0 : index
    %c0_13 = arith.constant 0 : index
    %c0_14 = arith.constant 0 : index
    %12 = vector.load %arg4[%c0_12, %c0_13, %c0_14] : memref<1x8x1xf32, #tpu.memory_space<vmem>>, vector<1x8x1xf32>
    %13 = vector.shape_cast %12 : vector<1x8x1xf32> to vector<8x1xf32>
    %cst_15 = arith.constant 0.000000e+00 : f32
    %14 = vector.broadcast %cst_15 : f32 to vector<8x1xf32>
    %15 = arith.cmpf ogt, %13, %14 : vector<8x1xf32>
    %cst_16 = arith.constant -3.276800e+04 : f32
    %16 = vector.shape_cast %15 : vector<8x1xi1> to vector<8x1xi1>
    %17 = vector.broadcast %16 : vector<8x1xi1> to vector<8x8xi1>
    %18 = vector.broadcast %cst_16 : f32 to vector<8x8xf32>
    %19 = arith.select %17, %11, %18 : vector<8x8xi1>, vector<8x8xf32>
    %cst_17 = arith.constant dense<0xFF800000> : vector<8xf32>
    %20 = vector.multi_reduction <maximumf>, %19, %cst_17 [0] : vector<8x8xf32> to vector<8xf32>
    %21 = vector.shape_cast %20 : vector<8xf32> to vector<1x8xf32>
    %22 = vector.broadcast %21 : vector<1x8xf32> to vector<8x8xf32>
    %23 = arith.subf %19, %22 : vector<8x8xf32>
    %24 = math.exp %23 : vector<8x8xf32>
    %cst_18 = arith.constant dense<0.000000e+00> : vector<8xf32>
    %25 = vector.multi_reduction <add>, %24, %cst_18 [0] : vector<8x8xf32> to vector<8xf32>
    %26 = vector.shape_cast %25 : vector<8xf32> to vector<1x8xf32>
    %27 = tpu.reciprocal %26 {approx = true} : vector<1x8xf32> -> vector<1x8xf32>
    %28 = vector.broadcast %27 : vector<1x8xf32> to vector<8x8xf32>
    %29 = arith.mulf %24, %28 : vector<8x8xf32>
    %30 = arith.truncf %29 : vector<8x8xf32> to vector<8x8xbf16>
    %cst_19 = arith.constant dense<0.000000e+00> : vector<8x32xf32>
    %31 = tpu.matmul %30, %3, %cst_19 {dimension_numbers = #tpu.dot_dimension_numbers<[0], [0], [1], [1], [0, 1, 1, 1], [], []>} : vector<8x8xbf16>, vector<8x32xbf16>, vector<8x32xf32> -> vector<8x32xf32>
    %cst_20 = arith.constant dense<0.000000e+00> : vector<8x32xf32>
    %32 = tpu.matmul %30, %6, %cst_20 {dimension_numbers = #tpu.dot_dimension_numbers<[0], [0], [1], [1], [0, 1, 1, 1], [], []>} : vector<8x8xbf16>, vector<8x32xbf16>, vector<8x32xf32> -> vector<8x32xf32>
    %33 = arith.truncf %31 : vector<8x32xf32> to vector<8x32xbf16>
    %34 = arith.truncf %32 : vector<8x32xf32> to vector<8x32xbf16>
    %35 = vector.extract_strided_slice %29 {offsets = [1, 0], sizes = [7, 8], strides = [1, 1]} : vector<8x8xf32> to vector<7x8xf32>
    %cst_21 = arith.constant 0.000000e+00 : f32
    %36 = vector.broadcast %cst_21 : f32 to vector<1x8xf32>
    %37 = tpu.concatenate %35, %36 in 0 : vector<7x8xf32>, vector<1x8xf32> -> vector<8x8xf32>
    %cst_22 = arith.constant 0.000000e+00 : f32
    %38 = vector.broadcast %cst_22 : f32 to vector<1x8xf32>
    %39 = vector.extract_strided_slice %29 {offsets = [0, 0], sizes = [7, 8], strides = [1, 1]} : vector<8x8xf32> to vector<7x8xf32>
    %40 = tpu.concatenate %38, %39 in 0 : vector<1x8xf32>, vector<7x8xf32> -> vector<8x8xf32>
    %41 = arith.addf %37, %40 : vector<8x8xf32>
    %42 = vector.extract_strided_slice %29 {offsets = [2, 0], sizes = [6, 8], strides = [1, 1]} : vector<8x8xf32> to vector<6x8xf32>
    %cst_23 = arith.constant 0.000000e+00 : f32
    %43 = vector.broadcast %cst_23 : f32 to vector<2x8xf32>
    %44 = tpu.concatenate %42, %43 in 0 : vector<6x8xf32>, vector<2x8xf32> -> vector<8x8xf32>
    %cst_24 = arith.constant 0.000000e+00 : f32
    %45 = vector.broadcast %cst_24 : f32 to vector<2x8xf32>
    %46 = vector.extract_strided_slice %29 {offsets = [0, 0], sizes = [6, 8], strides = [1, 1]} : vector<8x8xf32> to vector<6x8xf32>
    %47 = tpu.concatenate %45, %46 in 0 : vector<2x8xf32>, vector<6x8xf32> -> vector<8x8xf32>
    %48 = arith.addf %44, %47 : vector<8x8xf32>
    %49 = vector.extract_strided_slice %29 {offsets = [3, 0], sizes = [5, 8], strides = [1, 1]} : vector<8x8xf32> to vector<5x8xf32>
    %cst_25 = arith.constant 0.000000e+00 : f32
    %50 = vector.broadcast %cst_25 : f32 to vector<3x8xf32>
    %51 = tpu.concatenate %49, %50 in 0 : vector<5x8xf32>, vector<3x8xf32> -> vector<8x8xf32>
    %cst_26 = arith.constant 0.000000e+00 : f32
    %52 = vector.broadcast %cst_26 : f32 to vector<3x8xf32>
    %53 = vector.extract_strided_slice %29 {offsets = [0, 0], sizes = [5, 8], strides = [1, 1]} : vector<8x8xf32> to vector<5x8xf32>
    %54 = tpu.concatenate %52, %53 in 0 : vector<3x8xf32>, vector<5x8xf32> -> vector<8x8xf32>
    %55 = arith.addf %51, %54 : vector<8x8xf32>
    %56 = vector.extract_strided_slice %29 {offsets = [4, 0], sizes = [4, 8], strides = [1, 1]} : vector<8x8xf32> to vector<4x8xf32>
    %cst_27 = arith.constant 0.000000e+00 : f32
    %57 = vector.broadcast %cst_27 : f32 to vector<4x8xf32>
    %58 = tpu.concatenate %56, %57 in 0 : vector<4x8xf32>, vector<4x8xf32> -> vector<8x8xf32>
    %cst_28 = arith.constant 0.000000e+00 : f32
    %59 = vector.broadcast %cst_28 : f32 to vector<4x8xf32>
    %60 = vector.extract_strided_slice %29 {offsets = [0, 0], sizes = [4, 8], strides = [1, 1]} : vector<8x8xf32> to vector<4x8xf32>
    %61 = tpu.concatenate %59, %60 in 0 : vector<4x8xf32>, vector<4x8xf32> -> vector<8x8xf32>
    %62 = arith.addf %58, %61 : vector<8x8xf32>
    %63 = vector.extract_strided_slice %29 {offsets = [5, 0], sizes = [3, 8], strides = [1, 1]} : vector<8x8xf32> to vector<3x8xf32>
    %cst_29 = arith.constant 0.000000e+00 : f32
    %64 = vector.broadcast %cst_29 : f32 to vector<5x8xf32>
    %65 = tpu.concatenate %63, %64 in 0 : vector<3x8xf32>, vector<5x8xf32> -> vector<8x8xf32>
    %cst_30 = arith.constant 0.000000e+00 : f32
    %66 = vector.broadcast %cst_30 : f32 to vector<5x8xf32>
    %67 = vector.extract_strided_slice %29 {offsets = [0, 0], sizes = [3, 8], strides = [1, 1]} : vector<8x8xf32> to vector<3x8xf32>
    %68 = tpu.concatenate %66, %67 in 0 : vector<5x8xf32>, vector<3x8xf32> -> vector<8x8xf32>
    %69 = arith.addf %65, %68 : vector<8x8xf32>
    %70 = vector.extract_strided_slice %29 {offsets = [6, 0], sizes = [2, 8], strides = [1, 1]} : vector<8x8xf32> to vector<2x8xf32>
    %cst_31 = arith.constant 0.000000e+00 : f32
    %71 = vector.broadcast %cst_31 : f32 to vector<6x8xf32>
    %72 = tpu.concatenate %70, %71 in 0 : vector<2x8xf32>, vector<6x8xf32> -> vector<8x8xf32>
    %cst_32 = arith.constant 0.000000e+00 : f32
    %73 = vector.broadcast %cst_32 : f32 to vector<6x8xf32>
    %74 = vector.extract_strided_slice %29 {offsets = [0, 0], sizes = [2, 8], strides = [1, 1]} : vector<8x8xf32> to vector<2x8xf32>
    %75 = tpu.concatenate %73, %74 in 0 : vector<6x8xf32>, vector<2x8xf32> -> vector<8x8xf32>
    %76 = arith.addf %72, %75 : vector<8x8xf32>
    %77 = vector.extract_strided_slice %29 {offsets = [7, 0], sizes = [1, 8], strides = [1, 1]} : vector<8x8xf32> to vector<1x8xf32>
    %cst_33 = arith.constant 0.000000e+00 : f32
    %78 = vector.broadcast %cst_33 : f32 to vector<7x8xf32>
    %79 = tpu.concatenate %77, %78 in 0 : vector<1x8xf32>, vector<7x8xf32> -> vector<8x8xf32>
    %cst_34 = arith.constant 0.000000e+00 : f32
    %80 = vector.broadcast %cst_34 : f32 to vector<7x8xf32>
    %81 = vector.extract_strided_slice %29 {offsets = [0, 0], sizes = [1, 8], strides = [1, 1]} : vector<8x8xf32> to vector<1x8xf32>
    %82 = tpu.concatenate %80, %81 in 0 : vector<7x8xf32>, vector<1x8xf32> -> vector<8x8xf32>
    %83 = arith.addf %79, %82 : vector<8x8xf32>
    %cst_35 = arith.constant 0.000000e+00 : f32
    %84 = vector.broadcast %cst_35 : f32 to vector<8x32xf32>
    %c0_36 = arith.constant 0 : index
    %c0_37 = arith.constant 0 : index
    %c0_38 = arith.constant 0 : index
    %85 = vector.load %arg9[%c0_36, %c0_37, %c0_38] : memref<4x32x8xbf16, #tpu.memory_space<vmem>>, vector<1x32x8xbf16>
    %86 = vector.shape_cast %85 : vector<1x32x8xbf16> to vector<32x8xbf16>
    %cst_39 = arith.constant dense<0.000000e+00> : vector<8x8xf32>
    %87 = tpu.matmul %1, %86, %cst_39 {dimension_numbers = #tpu.dot_dimension_numbers<[1], [0], [0], [1], [0, 0, 1, 1], [], []>} : vector<8x32xbf16>, vector<32x8xbf16>, vector<8x8xf32> -> vector<8x8xf32>
    %c0_40 = arith.constant 0 : index
    %c0_41 = arith.constant 0 : index
    %c0_42 = arith.constant 0 : index
    %88 = vector.load %arg10[%c0_40, %c0_41, %c0_42] : memref<4x1x8xf32, #tpu.memory_space<vmem>>, vector<1x1x8xf32>
    %89 = vector.shape_cast %88 : vector<1x1x8xf32> to vector<1x8xf32>
    %90 = vector.broadcast %89 : vector<1x8xf32> to vector<8x8xf32>
    %91 = arith.addf %87, %90 : vector<8x8xf32>
    %c0_43 = arith.constant 0 : index
    %c0_44 = arith.constant 0 : index
    %c0_45 = arith.constant 0 : index
    %92 = vector.load %arg11[%c0_43, %c0_44, %c0_45] : memref<4x32x8xbf16, #tpu.memory_space<vmem>>, vector<1x32x8xbf16>
    %93 = vector.shape_cast %92 : vector<1x32x8xbf16> to vector<32x8xbf16>
    %cst_46 = arith.constant dense<0.000000e+00> : vector<8x8xf32>
    %94 = tpu.matmul %33, %93, %cst_46 {dimension_numbers = #tpu.dot_dimension_numbers<[1], [0], [0], [1], [0, 0, 1, 1], [], []>} : vector<8x32xbf16>, vector<32x8xbf16>, vector<8x8xf32> -> vector<8x8xf32>
    %c0_47 = arith.constant 0 : index
    %c0_48 = arith.constant 0 : index
    %c0_49 = arith.constant 0 : index
    %95 = vector.load %arg12[%c0_47, %c0_48, %c0_49] : memref<4x1x8xf32, #tpu.memory_space<vmem>>, vector<1x1x8xf32>
    %96 = vector.shape_cast %95 : vector<1x1x8xf32> to vector<1x8xf32>
    %97 = vector.broadcast %96 : vector<1x8xf32> to vector<8x8xf32>
    %98 = arith.addf %94, %97 : vector<8x8xf32>
    %c0_50 = arith.constant 0 : index
    %c0_51 = arith.constant 0 : index
    %c0_52 = arith.constant 0 : index
    %99 = vector.load %arg13[%c0_50, %c0_51, %c0_52] : memref<4x32x8xbf16, #tpu.memory_space<vmem>>, vector<1x32x8xbf16>
    %100 = vector.shape_cast %99 : vector<1x32x8xbf16> to vector<32x8xbf16>
    %cst_53 = arith.constant dense<0.000000e+00> : vector<8x8xf32>
    %101 = tpu.matmul %34, %100, %cst_53 {dimension_numbers = #tpu.dot_dimension_numbers<[1], [0], [0], [1], [0, 0, 1, 1], [], []>} : vector<8x32xbf16>, vector<32x8xbf16>, vector<8x8xf32> -> vector<8x8xf32>
    %c0_54 = arith.constant 0 : index
    %c0_55 = arith.constant 0 : index
    %c0_56 = arith.constant 0 : index
    %102 = vector.load %arg14[%c0_54, %c0_55, %c0_56] : memref<4x1x8xf32, #tpu.memory_space<vmem>>, vector<1x1x8xf32>
    %103 = vector.shape_cast %102 : vector<1x1x8xf32> to vector<1x8xf32>
    %104 = vector.broadcast %103 : vector<1x8xf32> to vector<8x8xf32>
    %105 = arith.addf %101, %104 : vector<8x8xf32>
    %106 = arith.truncf %91 : vector<8x8xf32> to vector<8x8xbf16>
    %107 = arith.truncf %98 : vector<8x8xf32> to vector<8x8xbf16>
    %cst_57 = arith.constant dense<0.000000e+00> : vector<8x8xf32>
    %108 = tpu.matmul %106, %107, %cst_57 {dimension_numbers = #tpu.dot_dimension_numbers<[1], [1], [0], [0], [0, 0, 1, 0], [], []>} : vector<8x8xbf16>, vector<8x8xbf16>, vector<8x8xf32> -> vector<8x8xf32>
    %c0_58 = arith.constant 0 : index
    %c0_59 = arith.constant 0 : index
    %109 = memref.load %arg5[%c0_58, %c0_59] : memref<15x4xf32, #tpu.memory_space<smem>>
    %c0_60 = arith.constant 0 : index
    %c0_61 = arith.constant 0 : index
    %110 = memref.load %arg6[%c0_60, %c0_61] : memref<15x4xf32, #tpu.memory_space<smem>>
    %111 = vector.broadcast %109 : f32 to vector<8x8xf32>
    %112 = arith.mulf %111, %29 : vector<8x8xf32>
    %113 = vector.broadcast %110 : f32 to vector<8x8xf32>
    %114 = arith.mulf %113, %29 : vector<8x8xf32>
    %c1 = arith.constant 1 : index
    %c0_62 = arith.constant 0 : index
    %115 = memref.load %arg5[%c1, %c0_62] : memref<15x4xf32, #tpu.memory_space<smem>>
    %c1_63 = arith.constant 1 : index
    %c0_64 = arith.constant 0 : index
    %116 = memref.load %arg6[%c1_63, %c0_64] : memref<15x4xf32, #tpu.memory_space<smem>>
    %117 = vector.broadcast %115 : f32 to vector<8x8xf32>
    %118 = arith.mulf %117, %41 : vector<8x8xf32>
    %119 = arith.addf %112, %118 : vector<8x8xf32>
    %120 = vector.broadcast %116 : f32 to vector<8x8xf32>
    %121 = arith.mulf %120, %41 : vector<8x8xf32>
    %122 = arith.addf %114, %121 : vector<8x8xf32>
    %c2 = arith.constant 2 : index
    %c0_65 = arith.constant 0 : index
    %123 = memref.load %arg5[%c2, %c0_65] : memref<15x4xf32, #tpu.memory_space<smem>>
    %c2_66 = arith.constant 2 : index
    %c0_67 = arith.constant 0 : index
    %124 = memref.load %arg6[%c2_66, %c0_67] : memref<15x4xf32, #tpu.memory_space<smem>>
    %125 = vector.broadcast %123 : f32 to vector<8x8xf32>
    %126 = arith.mulf %125, %48 : vector<8x8xf32>
    %127 = arith.addf %119, %126 : vector<8x8xf32>
    %128 = vector.broadcast %124 : f32 to vector<8x8xf32>
    %129 = arith.mulf %128, %48 : vector<8x8xf32>
    %130 = arith.addf %122, %129 : vector<8x8xf32>
    %c3 = arith.constant 3 : index
    %c0_68 = arith.constant 0 : index
    %131 = memref.load %arg5[%c3, %c0_68] : memref<15x4xf32, #tpu.memory_space<smem>>
    %c3_69 = arith.constant 3 : index
    %c0_70 = arith.constant 0 : index
    %132 = memref.load %arg6[%c3_69, %c0_70] : memref<15x4xf32, #tpu.memory_space<smem>>
    %133 = vector.broadcast %131 : f32 to vector<8x8xf32>
    %134 = arith.mulf %133, %55 : vector<8x8xf32>
    %135 = arith.addf %127, %134 : vector<8x8xf32>
    %136 = vector.broadcast %132 : f32 to vector<8x8xf32>
    %137 = arith.mulf %136, %55 : vector<8x8xf32>
    %138 = arith.addf %130, %137 : vector<8x8xf32>
    %c4 = arith.constant 4 : index
    %c0_71 = arith.constant 0 : index
    %139 = memref.load %arg5[%c4, %c0_71] : memref<15x4xf32, #tpu.memory_space<smem>>
    %c4_72 = arith.constant 4 : index
    %c0_73 = arith.constant 0 : index
    %140 = memref.load %arg6[%c4_72, %c0_73] : memref<15x4xf32, #tpu.memory_space<smem>>
    %141 = vector.broadcast %139 : f32 to vector<8x8xf32>
    %142 = arith.mulf %141, %62 : vector<8x8xf32>
    %143 = arith.addf %135, %142 : vector<8x8xf32>
    %144 = vector.broadcast %140 : f32 to vector<8x8xf32>
    %145 = arith.mulf %144, %62 : vector<8x8xf32>
    %146 = arith.addf %138, %145 : vector<8x8xf32>
    %c5 = arith.constant 5 : index
    %c0_74 = arith.constant 0 : index
    %147 = memref.load %arg5[%c5, %c0_74] : memref<15x4xf32, #tpu.memory_space<smem>>
    %c5_75 = arith.constant 5 : index
    %c0_76 = arith.constant 0 : index
    %148 = memref.load %arg6[%c5_75, %c0_76] : memref<15x4xf32, #tpu.memory_space<smem>>
    %149 = vector.broadcast %147 : f32 to vector<8x8xf32>
    %150 = arith.mulf %149, %69 : vector<8x8xf32>
    %151 = arith.addf %143, %150 : vector<8x8xf32>
    %152 = vector.broadcast %148 : f32 to vector<8x8xf32>
    %153 = arith.mulf %152, %69 : vector<8x8xf32>
    %154 = arith.addf %146, %153 : vector<8x8xf32>
    %c6 = arith.constant 6 : index
    %c0_77 = arith.constant 0 : index
    %155 = memref.load %arg5[%c6, %c0_77] : memref<15x4xf32, #tpu.memory_space<smem>>
    %c6_78 = arith.constant 6 : index
    %c0_79 = arith.constant 0 : index
    %156 = memref.load %arg6[%c6_78, %c0_79] : memref<15x4xf32, #tpu.memory_space<smem>>
    %157 = vector.broadcast %155 : f32 to vector<8x8xf32>
    %158 = arith.mulf %157, %76 : vector<8x8xf32>
    %159 = arith.addf %151, %158 : vector<8x8xf32>
    %160 = vector.broadcast %156 : f32 to vector<8x8xf32>
    %161 = arith.mulf %160, %76 : vector<8x8xf32>
    %162 = arith.addf %154, %161 : vector<8x8xf32>
    %c7 = arith.constant 7 : index
    %c0_80 = arith.constant 0 : index
    %163 = memref.load %arg5[%c7, %c0_80] : memref<15x4xf32, #tpu.memory_space<smem>>
    %c7_81 = arith.constant 7 : index
    %c0_82 = arith.constant 0 : index
    %164 = memref.load %arg6[%c7_81, %c0_82] : memref<15x4xf32, #tpu.memory_space<smem>>
    %165 = vector.broadcast %163 : f32 to vector<8x8xf32>
    %166 = arith.mulf %165, %83 : vector<8x8xf32>
    %167 = arith.addf %159, %166 : vector<8x8xf32>
    %168 = vector.broadcast %164 : f32 to vector<8x8xf32>
    %169 = arith.mulf %168, %83 : vector<8x8xf32>
    %170 = arith.addf %162, %169 : vector<8x8xf32>
    %171 = arith.mulf %108, %167 : vector<8x8xf32>
    %172 = arith.addf %171, %170 : vector<8x8xf32>
    %c0_83 = arith.constant 0 : index
    %c0_84 = arith.constant 0 : index
    %173 = vector.load %arg28[%c0_83, %c0_84] : memref<8x32xf32, #tpu.memory_space<vmem>>, vector<8x8xf32>
    tpu.vector_store %arg28[%c0_83, %c0_84], %172 {strides = array<i32>} : memref<8x32xf32, #tpu.memory_space<vmem>>, vector<8x8xf32>,
    %cst_85 = arith.constant dense<0xFF800000> : vector<8xf32>
    %174 = vector.multi_reduction <maximumf>, %172, %cst_85 [1] : vector<8x8xf32> to vector<8xf32>
    %175 = vector.shape_cast %174 : vector<8xf32> to vector<8x1xf32>
    %176 = vector.broadcast %175 : vector<8x1xf32> to vector<8x8xf32>
    %177 = arith.subf %172, %176 : vector<8x8xf32>
    %178 = math.exp %177 : vector<8x8xf32>
    %cst_86 = arith.constant dense<0.000000e+00> : vector<8xf32>
    %179 = vector.multi_reduction <add>, %178, %cst_86 [1] : vector<8x8xf32> to vector<8xf32>
    %180 = vector.shape_cast %179 : vector<8xf32> to vector<8x1xf32>
    %181 = tpu.reciprocal %180 {approx = true} : vector<8x1xf32> -> vector<8x1xf32>
    %182 = vector.broadcast %181 : vector<8x1xf32> to vector<8x8xf32>
    %183 = arith.mulf %178, %182 : vector<8x8xf32>
    %184 = arith.truncf %183 : vector<8x8xf32> to vector<8x8xbf16>
    %185 = arith.truncf %105 : vector<8x8xf32> to vector<8x8xbf16>
    %cst_87 = arith.constant dense<0.000000e+00> : vector<8x8xf32>
    %186 = tpu.matmul %184, %185, %cst_87 {dimension_numbers = #tpu.dot_dimension_numbers<[1], [0], [0], [1], [0, 0, 1, 1], [], []>} : vector<8x8xbf16>, vector<8x8xbf16>, vector<8x8xf32> -> vector<8x8xf32>
    %187 = arith.truncf %186 : vector<8x8xf32> to vector<8x8xbf16>
    %c0_88 = arith.constant 0 : index
    %c0_89 = arith.constant 0 : index
    %c0_90 = arith.constant 0 : index
    %188 = vector.load %arg15[%c0_88, %c0_89, %c0_90] : memref<4x8x32xbf16, #tpu.memory_space<vmem>>, vector<1x8x32xbf16>
    %189 = vector.shape_cast %188 : vector<1x8x32xbf16> to vector<8x32xbf16>
    %cst_91 = arith.constant dense<0.000000e+00> : vector<8x32xf32>
    %190 = tpu.matmul %187, %189, %cst_91 {dimension_numbers = #tpu.dot_dimension_numbers<[1], [0], [0], [1], [0, 0, 1, 1], [], []>} : vector<8x8xbf16>, vector<8x32xbf16>, vector<8x32xf32> -> vector<8x32xf32>
    %191 = arith.addf %84, %190 : vector<8x32xf32>
    %c1_92 = arith.constant 1 : index
    %c0_93 = arith.constant 0 : index
    %c0_94 = arith.constant 0 : index
    %192 = vector.load %arg9[%c1_92, %c0_93, %c0_94] : memref<4x32x8xbf16, #tpu.memory_space<vmem>>, vector<1x32x8xbf16>
    %193 = vector.shape_cast %192 : vector<1x32x8xbf16> to vector<32x8xbf16>
    %cst_95 = arith.constant dense<0.000000e+00> : vector<8x8xf32>
    %194 = tpu.matmul %1, %193, %cst_95 {dimension_numbers = #tpu.dot_dimension_numbers<[1], [0], [0], [1], [0, 0, 1, 1], [], []>} : vector<8x32xbf16>, vector<32x8xbf16>, vector<8x8xf32> -> vector<8x8xf32>
    %c1_96 = arith.constant 1 : index
    %c0_97 = arith.constant 0 : index
    %c0_98 = arith.constant 0 : index
    %195 = vector.load %arg10[%c1_96, %c0_97, %c0_98] : memref<4x1x8xf32, #tpu.memory_space<vmem>>, vector<1x1x8xf32>
    %196 = vector.shape_cast %195 : vector<1x1x8xf32> to vector<1x8xf32>
    %197 = vector.broadcast %196 : vector<1x8xf32> to vector<8x8xf32>
    %198 = arith.addf %194, %197 : vector<8x8xf32>
    %c1_99 = arith.constant 1 : index
    %c0_100 = arith.constant 0 : index
    %c0_101 = arith.constant 0 : index
    %199 = vector.load %arg11[%c1_99, %c0_100, %c0_101] : memref<4x32x8xbf16, #tpu.memory_space<vmem>>, vector<1x32x8xbf16>
    %200 = vector.shape_cast %199 : vector<1x32x8xbf16> to vector<32x8xbf16>
    %cst_102 = arith.constant dense<0.000000e+00> : vector<8x8xf32>
    %201 = tpu.matmul %33, %200, %cst_102 {dimension_numbers = #tpu.dot_dimension_numbers<[1], [0], [0], [1], [0, 0, 1, 1], [], []>} : vector<8x32xbf16>, vector<32x8xbf16>, vector<8x8xf32> -> vector<8x8xf32>
    %c1_103 = arith.constant 1 : index
    %c0_104 = arith.constant 0 : index
    %c0_105 = arith.constant 0 : index
    %202 = vector.load %arg12[%c1_103, %c0_104, %c0_105] : memref<4x1x8xf32, #tpu.memory_space<vmem>>, vector<1x1x8xf32>
    %203 = vector.shape_cast %202 : vector<1x1x8xf32> to vector<1x8xf32>
    %204 = vector.broadcast %203 : vector<1x8xf32> to vector<8x8xf32>
    %205 = arith.addf %201, %204 : vector<8x8xf32>
    %c1_106 = arith.constant 1 : index
    %c0_107 = arith.constant 0 : index
    %c0_108 = arith.constant 0 : index
    %206 = vector.load %arg13[%c1_106, %c0_107, %c0_108] : memref<4x32x8xbf16, #tpu.memory_space<vmem>>, vector<1x32x8xbf16>
    %207 = vector.shape_cast %206 : vector<1x32x8xbf16> to vector<32x8xbf16>
    %cst_109 = arith.constant dense<0.000000e+00> : vector<8x8xf32>
    %208 = tpu.matmul %34, %207, %cst_109 {dimension_numbers = #tpu.dot_dimension_numbers<[1], [0], [0], [1], [0, 0, 1, 1], [], []>} : vector<8x32xbf16>, vector<32x8xbf16>, vector<8x8xf32> -> vector<8x8xf32>
    %c1_110 = arith.constant 1 : index
    %c0_111 = arith.constant 0 : index
    %c0_112 = arith.constant 0 : index
    %209 = vector.load %arg14[%c1_110, %c0_111, %c0_112] : memref<4x1x8xf32, #tpu.memory_space<vmem>>, vector<1x1x8xf32>
    %210 = vector.shape_cast %209 : vector<1x1x8xf32> to vector<1x8xf32>
    %211 = vector.broadcast %210 : vector<1x8xf32> to vector<8x8xf32>
    %212 = arith.addf %208, %211 : vector<8x8xf32>
    %213 = arith.truncf %198 : vector<8x8xf32> to vector<8x8xbf16>
    %214 = arith.truncf %205 : vector<8x8xf32> to vector<8x8xbf16>
    %cst_113 = arith.constant dense<0.000000e+00> : vector<8x8xf32>
    %215 = tpu.matmul %213, %214, %cst_113 {dimension_numbers = #tpu.dot_dimension_numbers<[1], [1], [0], [0], [0, 0, 1, 0], [], []>} : vector<8x8xbf16>, vector<8x8xbf16>, vector<8x8xf32> -> vector<8x8xf32>
    %c0_114 = arith.constant 0 : index
    %c1_115 = arith.constant 1 : index
    %216 = memref.load %arg5[%c0_114, %c1_115] : memref<15x4xf32, #tpu.memory_space<smem>>
    %c0_116 = arith.constant 0 : index
    %c1_117 = arith.constant 1 : index
    %217 = memref.load %arg6[%c0_116, %c1_117] : memref<15x4xf32, #tpu.memory_space<smem>>
    %218 = vector.broadcast %216 : f32 to vector<8x8xf32>
    %219 = arith.mulf %218, %29 : vector<8x8xf32>
    %220 = vector.broadcast %217 : f32 to vector<8x8xf32>
    %221 = arith.mulf %220, %29 : vector<8x8xf32>
    %c1_118 = arith.constant 1 : index
    %c1_119 = arith.constant 1 : index
    %222 = memref.load %arg5[%c1_118, %c1_119] : memref<15x4xf32, #tpu.memory_space<smem>>
    %c1_120 = arith.constant 1 : index
    %c1_121 = arith.constant 1 : index
    %223 = memref.load %arg6[%c1_120, %c1_121] : memref<15x4xf32, #tpu.memory_space<smem>>
    %224 = vector.broadcast %222 : f32 to vector<8x8xf32>
    %225 = arith.mulf %224, %41 : vector<8x8xf32>
    %226 = arith.addf %219, %225 : vector<8x8xf32>
    %227 = vector.broadcast %223 : f32 to vector<8x8xf32>
    %228 = arith.mulf %227, %41 : vector<8x8xf32>
    %229 = arith.addf %221, %228 : vector<8x8xf32>
    %c2_122 = arith.constant 2 : index
    %c1_123 = arith.constant 1 : index
    %230 = memref.load %arg5[%c2_122, %c1_123] : memref<15x4xf32, #tpu.memory_space<smem>>
    %c2_124 = arith.constant 2 : index
    %c1_125 = arith.constant 1 : index
    %231 = memref.load %arg6[%c2_124, %c1_125] : memref<15x4xf32, #tpu.memory_space<smem>>
    %232 = vector.broadcast %230 : f32 to vector<8x8xf32>
    %233 = arith.mulf %232, %48 : vector<8x8xf32>
    %234 = arith.addf %226, %233 : vector<8x8xf32>
    %235 = vector.broadcast %231 : f32 to vector<8x8xf32>
    %236 = arith.mulf %235, %48 : vector<8x8xf32>
    %237 = arith.addf %229, %236 : vector<8x8xf32>
    %c3_126 = arith.constant 3 : index
    %c1_127 = arith.constant 1 : index
    %238 = memref.load %arg5[%c3_126, %c1_127] : memref<15x4xf32, #tpu.memory_space<smem>>
    %c3_128 = arith.constant 3 : index
    %c1_129 = arith.constant 1 : index
    %239 = memref.load %arg6[%c3_128, %c1_129] : memref<15x4xf32, #tpu.memory_space<smem>>
    %240 = vector.broadcast %238 : f32 to vector<8x8xf32>
    %241 = arith.mulf %240, %55 : vector<8x8xf32>
    %242 = arith.addf %234, %241 : vector<8x8xf32>
    %243 = vector.broadcast %239 : f32 to vector<8x8xf32>
    %244 = arith.mulf %243, %55 : vector<8x8xf32>
    %245 = arith.addf %237, %244 : vector<8x8xf32>
    %c4_130 = arith.constant 4 : index
    %c1_131 = arith.constant 1 : index
    %246 = memref.load %arg5[%c4_130, %c1_131] : memref<15x4xf32, #tpu.memory_space<smem>>
    %c4_132 = arith.constant 4 : index
    %c1_133 = arith.constant 1 : index
    %247 = memref.load %arg6[%c4_132, %c1_133] : memref<15x4xf32, #tpu.memory_space<smem>>
    %248 = vector.broadcast %246 : f32 to vector<8x8xf32>
    %249 = arith.mulf %248, %62 : vector<8x8xf32>
    %250 = arith.addf %242, %249 : vector<8x8xf32>
    %251 = vector.broadcast %247 : f32 to vector<8x8xf32>
    %252 = arith.mulf %251, %62 : vector<8x8xf32>
    %253 = arith.addf %245, %252 : vector<8x8xf32>
    %c5_134 = arith.constant 5 : index
    %c1_135 = arith.constant 1 : index
    %254 = memref.load %arg5[%c5_134, %c1_135] : memref<15x4xf32, #tpu.memory_space<smem>>
    %c5_136 = arith.constant 5 : index
    %c1_137 = arith.constant 1 : index
    %255 = memref.load %arg6[%c5_136, %c1_137] : memref<15x4xf32, #tpu.memory_space<smem>>
    %256 = vector.broadcast %254 : f32 to vector<8x8xf32>
    %257 = arith.mulf %256, %69 : vector<8x8xf32>
    %258 = arith.addf %250, %257 : vector<8x8xf32>
    %259 = vector.broadcast %255 : f32 to vector<8x8xf32>
    %260 = arith.mulf %259, %69 : vector<8x8xf32>
    %261 = arith.addf %253, %260 : vector<8x8xf32>
    %c6_138 = arith.constant 6 : index
    %c1_139 = arith.constant 1 : index
    %262 = memref.load %arg5[%c6_138, %c1_139] : memref<15x4xf32, #tpu.memory_space<smem>>
    %c6_140 = arith.constant 6 : index
    %c1_141 = arith.constant 1 : index
    %263 = memref.load %arg6[%c6_140, %c1_141] : memref<15x4xf32, #tpu.memory_space<smem>>
    %264 = vector.broadcast %262 : f32 to vector<8x8xf32>
    %265 = arith.mulf %264, %76 : vector<8x8xf32>
    %266 = arith.addf %258, %265 : vector<8x8xf32>
    %267 = vector.broadcast %263 : f32 to vector<8x8xf32>
    %268 = arith.mulf %267, %76 : vector<8x8xf32>
    %269 = arith.addf %261, %268 : vector<8x8xf32>
    %c7_142 = arith.constant 7 : index
    %c1_143 = arith.constant 1 : index
    %270 = memref.load %arg5[%c7_142, %c1_143] : memref<15x4xf32, #tpu.memory_space<smem>>
    %c7_144 = arith.constant 7 : index
    %c1_145 = arith.constant 1 : index
    %271 = memref.load %arg6[%c7_144, %c1_145] : memref<15x4xf32, #tpu.memory_space<smem>>
    %272 = vector.broadcast %270 : f32 to vector<8x8xf32>
    %273 = arith.mulf %272, %83 : vector<8x8xf32>
    %274 = arith.addf %266, %273 : vector<8x8xf32>
    %275 = vector.broadcast %271 : f32 to vector<8x8xf32>
    %276 = arith.mulf %275, %83 : vector<8x8xf32>
    %277 = arith.addf %269, %276 : vector<8x8xf32>
    %278 = arith.mulf %215, %274 : vector<8x8xf32>
    %279 = arith.addf %278, %277 : vector<8x8xf32>
    %c0_146 = arith.constant 0 : index
    %c8 = arith.constant 8 : index
    %280 = vector.load %arg28[%c0_146, %c8] : memref<8x32xf32, #tpu.memory_space<vmem>>, vector<8x8xf32>
    tpu.vector_store %arg28[%c0_146, %c8], %279 {strides = array<i32>} : memref<8x32xf32, #tpu.memory_space<vmem>>, vector<8x8xf32>,
    %cst_147 = arith.constant dense<0xFF800000> : vector<8xf32>
    %281 = vector.multi_reduction <maximumf>, %279, %cst_147 [1] : vector<8x8xf32> to vector<8xf32>
    %282 = vector.shape_cast %281 : vector<8xf32> to vector<8x1xf32>
    %283 = vector.broadcast %282 : vector<8x1xf32> to vector<8x8xf32>
    %284 = arith.subf %279, %283 : vector<8x8xf32>
    %285 = math.exp %284 : vector<8x8xf32>
    %cst_148 = arith.constant dense<0.000000e+00> : vector<8xf32>
    %286 = vector.multi_reduction <add>, %285, %cst_148 [1] : vector<8x8xf32> to vector<8xf32>
    %287 = vector.shape_cast %286 : vector<8xf32> to vector<8x1xf32>
    %288 = tpu.reciprocal %287 {approx = true} : vector<8x1xf32> -> vector<8x1xf32>
    %289 = vector.broadcast %288 : vector<8x1xf32> to vector<8x8xf32>
    %290 = arith.mulf %285, %289 : vector<8x8xf32>
    %291 = arith.truncf %290 : vector<8x8xf32> to vector<8x8xbf16>
    %292 = arith.truncf %212 : vector<8x8xf32> to vector<8x8xbf16>
    %cst_149 = arith.constant dense<0.000000e+00> : vector<8x8xf32>
    %293 = tpu.matmul %291, %292, %cst_149 {dimension_numbers = #tpu.dot_dimension_numbers<[1], [0], [0], [1], [0, 0, 1, 1], [], []>} : vector<8x8xbf16>, vector<8x8xbf16>, vector<8x8xf32> -> vector<8x8xf32>
    %294 = arith.truncf %293 : vector<8x8xf32> to vector<8x8xbf16>
    %c1_150 = arith.constant 1 : index
    %c0_151 = arith.constant 0 : index
    %c0_152 = arith.constant 0 : index
    %295 = vector.load %arg15[%c1_150, %c0_151, %c0_152] : memref<4x8x32xbf16, #tpu.memory_space<vmem>>, vector<1x8x32xbf16>
    %296 = vector.shape_cast %295 : vector<1x8x32xbf16> to vector<8x32xbf16>
    %cst_153 = arith.constant dense<0.000000e+00> : vector<8x32xf32>
    %297 = tpu.matmul %294, %296, %cst_153 {dimension_numbers = #tpu.dot_dimension_numbers<[1], [0], [0], [1], [0, 0, 1, 1], [], []>} : vector<8x8xbf16>, vector<8x32xbf16>, vector<8x32xf32> -> vector<8x32xf32>
    %298 = arith.addf %191, %297 : vector<8x32xf32>
    %c2_154 = arith.constant 2 : index
    %c0_155 = arith.constant 0 : index
    %c0_156 = arith.constant 0 : index
    %299 = vector.load %arg9[%c2_154, %c0_155, %c0_156] : memref<4x32x8xbf16, #tpu.memory_space<vmem>>, vector<1x32x8xbf16>
    %300 = vector.shape_cast %299 : vector<1x32x8xbf16> to vector<32x8xbf16>
    %cst_157 = arith.constant dense<0.000000e+00> : vector<8x8xf32>
    %301 = tpu.matmul %1, %300, %cst_157 {dimension_numbers = #tpu.dot_dimension_numbers<[1], [0], [0], [1], [0, 0, 1, 1], [], []>} : vector<8x32xbf16>, vector<32x8xbf16>, vector<8x8xf32> -> vector<8x8xf32>
    %c2_158 = arith.constant 2 : index
    %c0_159 = arith.constant 0 : index
    %c0_160 = arith.constant 0 : index
    %302 = vector.load %arg10[%c2_158, %c0_159, %c0_160] : memref<4x1x8xf32, #tpu.memory_space<vmem>>, vector<1x1x8xf32>
    %303 = vector.shape_cast %302 : vector<1x1x8xf32> to vector<1x8xf32>
    %304 = vector.broadcast %303 : vector<1x8xf32> to vector<8x8xf32>
    %305 = arith.addf %301, %304 : vector<8x8xf32>
    %c2_161 = arith.constant 2 : index
    %c0_162 = arith.constant 0 : index
    %c0_163 = arith.constant 0 : index
    %306 = vector.load %arg11[%c2_161, %c0_162, %c0_163] : memref<4x32x8xbf16, #tpu.memory_space<vmem>>, vector<1x32x8xbf16>
    %307 = vector.shape_cast %306 : vector<1x32x8xbf16> to vector<32x8xbf16>
    %cst_164 = arith.constant dense<0.000000e+00> : vector<8x8xf32>
    %308 = tpu.matmul %33, %307, %cst_164 {dimension_numbers = #tpu.dot_dimension_numbers<[1], [0], [0], [1], [0, 0, 1, 1], [], []>} : vector<8x32xbf16>, vector<32x8xbf16>, vector<8x8xf32> -> vector<8x8xf32>
    %c2_165 = arith.constant 2 : index
    %c0_166 = arith.constant 0 : index
    %c0_167 = arith.constant 0 : index
    %309 = vector.load %arg12[%c2_165, %c0_166, %c0_167] : memref<4x1x8xf32, #tpu.memory_space<vmem>>, vector<1x1x8xf32>
    %310 = vector.shape_cast %309 : vector<1x1x8xf32> to vector<1x8xf32>
    %311 = vector.broadcast %310 : vector<1x8xf32> to vector<8x8xf32>
    %312 = arith.addf %308, %311 : vector<8x8xf32>
    %c2_168 = arith.constant 2 : index
    %c0_169 = arith.constant 0 : index
    %c0_170 = arith.constant 0 : index
    %313 = vector.load %arg13[%c2_168, %c0_169, %c0_170] : memref<4x32x8xbf16, #tpu.memory_space<vmem>>, vector<1x32x8xbf16>
    %314 = vector.shape_cast %313 : vector<1x32x8xbf16> to vector<32x8xbf16>
    %cst_171 = arith.constant dense<0.000000e+00> : vector<8x8xf32>
    %315 = tpu.matmul %34, %314, %cst_171 {dimension_numbers = #tpu.dot_dimension_numbers<[1], [0], [0], [1], [0, 0, 1, 1], [], []>} : vector<8x32xbf16>, vector<32x8xbf16>, vector<8x8xf32> -> vector<8x8xf32>
    %c2_172 = arith.constant 2 : index
    %c0_173 = arith.constant 0 : index
    %c0_174 = arith.constant 0 : index
    %316 = vector.load %arg14[%c2_172, %c0_173, %c0_174] : memref<4x1x8xf32, #tpu.memory_space<vmem>>, vector<1x1x8xf32>
    %317 = vector.shape_cast %316 : vector<1x1x8xf32> to vector<1x8xf32>
    %318 = vector.broadcast %317 : vector<1x8xf32> to vector<8x8xf32>
    %319 = arith.addf %315, %318 : vector<8x8xf32>
    %320 = arith.truncf %305 : vector<8x8xf32> to vector<8x8xbf16>
    %321 = arith.truncf %312 : vector<8x8xf32> to vector<8x8xbf16>
    %cst_175 = arith.constant dense<0.000000e+00> : vector<8x8xf32>
    %322 = tpu.matmul %320, %321, %cst_175 {dimension_numbers = #tpu.dot_dimension_numbers<[1], [1], [0], [0], [0, 0, 1, 0], [], []>} : vector<8x8xbf16>, vector<8x8xbf16>, vector<8x8xf32> -> vector<8x8xf32>
    %c0_176 = arith.constant 0 : index
    %c2_177 = arith.constant 2 : index
    %323 = memref.load %arg5[%c0_176, %c2_177] : memref<15x4xf32, #tpu.memory_space<smem>>
    %c0_178 = arith.constant 0 : index
    %c2_179 = arith.constant 2 : index
    %324 = memref.load %arg6[%c0_178, %c2_179] : memref<15x4xf32, #tpu.memory_space<smem>>
    %325 = vector.broadcast %323 : f32 to vector<8x8xf32>
    %326 = arith.mulf %325, %29 : vector<8x8xf32>
    %327 = vector.broadcast %324 : f32 to vector<8x8xf32>
    %328 = arith.mulf %327, %29 : vector<8x8xf32>
    %c1_180 = arith.constant 1 : index
    %c2_181 = arith.constant 2 : index
    %329 = memref.load %arg5[%c1_180, %c2_181] : memref<15x4xf32, #tpu.memory_space<smem>>
    %c1_182 = arith.constant 1 : index
    %c2_183 = arith.constant 2 : index
    %330 = memref.load %arg6[%c1_182, %c2_183] : memref<15x4xf32, #tpu.memory_space<smem>>
    %331 = vector.broadcast %329 : f32 to vector<8x8xf32>
    %332 = arith.mulf %331, %41 : vector<8x8xf32>
    %333 = arith.addf %326, %332 : vector<8x8xf32>
    %334 = vector.broadcast %330 : f32 to vector<8x8xf32>
    %335 = arith.mulf %334, %41 : vector<8x8xf32>
    %336 = arith.addf %328, %335 : vector<8x8xf32>
    %c2_184 = arith.constant 2 : index
    %c2_185 = arith.constant 2 : index
    %337 = memref.load %arg5[%c2_184, %c2_185] : memref<15x4xf32, #tpu.memory_space<smem>>
    %c2_186 = arith.constant 2 : index
    %c2_187 = arith.constant 2 : index
    %338 = memref.load %arg6[%c2_186, %c2_187] : memref<15x4xf32, #tpu.memory_space<smem>>
    %339 = vector.broadcast %337 : f32 to vector<8x8xf32>
    %340 = arith.mulf %339, %48 : vector<8x8xf32>
    %341 = arith.addf %333, %340 : vector<8x8xf32>
    %342 = vector.broadcast %338 : f32 to vector<8x8xf32>
    %343 = arith.mulf %342, %48 : vector<8x8xf32>
    %344 = arith.addf %336, %343 : vector<8x8xf32>
    %c3_188 = arith.constant 3 : index
    %c2_189 = arith.constant 2 : index
    %345 = memref.load %arg5[%c3_188, %c2_189] : memref<15x4xf32, #tpu.memory_space<smem>>
    %c3_190 = arith.constant 3 : index
    %c2_191 = arith.constant 2 : index
    %346 = memref.load %arg6[%c3_190, %c2_191] : memref<15x4xf32, #tpu.memory_space<smem>>
    %347 = vector.broadcast %345 : f32 to vector<8x8xf32>
    %348 = arith.mulf %347, %55 : vector<8x8xf32>
    %349 = arith.addf %341, %348 : vector<8x8xf32>
    %350 = vector.broadcast %346 : f32 to vector<8x8xf32>
    %351 = arith.mulf %350, %55 : vector<8x8xf32>
    %352 = arith.addf %344, %351 : vector<8x8xf32>
    %c4_192 = arith.constant 4 : index
    %c2_193 = arith.constant 2 : index
    %353 = memref.load %arg5[%c4_192, %c2_193] : memref<15x4xf32, #tpu.memory_space<smem>>
    %c4_194 = arith.constant 4 : index
    %c2_195 = arith.constant 2 : index
    %354 = memref.load %arg6[%c4_194, %c2_195] : memref<15x4xf32, #tpu.memory_space<smem>>
    %355 = vector.broadcast %353 : f32 to vector<8x8xf32>
    %356 = arith.mulf %355, %62 : vector<8x8xf32>
    %357 = arith.addf %349, %356 : vector<8x8xf32>
    %358 = vector.broadcast %354 : f32 to vector<8x8xf32>
    %359 = arith.mulf %358, %62 : vector<8x8xf32>
    %360 = arith.addf %352, %359 : vector<8x8xf32>
    %c5_196 = arith.constant 5 : index
    %c2_197 = arith.constant 2 : index
    %361 = memref.load %arg5[%c5_196, %c2_197] : memref<15x4xf32, #tpu.memory_space<smem>>
    %c5_198 = arith.constant 5 : index
    %c2_199 = arith.constant 2 : index
    %362 = memref.load %arg6[%c5_198, %c2_199] : memref<15x4xf32, #tpu.memory_space<smem>>
    %363 = vector.broadcast %361 : f32 to vector<8x8xf32>
    %364 = arith.mulf %363, %69 : vector<8x8xf32>
    %365 = arith.addf %357, %364 : vector<8x8xf32>
    %366 = vector.broadcast %362 : f32 to vector<8x8xf32>
    %367 = arith.mulf %366, %69 : vector<8x8xf32>
    %368 = arith.addf %360, %367 : vector<8x8xf32>
    %c6_200 = arith.constant 6 : index
    %c2_201 = arith.constant 2 : index
    %369 = memref.load %arg5[%c6_200, %c2_201] : memref<15x4xf32, #tpu.memory_space<smem>>
    %c6_202 = arith.constant 6 : index
    %c2_203 = arith.constant 2 : index
    %370 = memref.load %arg6[%c6_202, %c2_203] : memref<15x4xf32, #tpu.memory_space<smem>>
    %371 = vector.broadcast %369 : f32 to vector<8x8xf32>
    %372 = arith.mulf %371, %76 : vector<8x8xf32>
    %373 = arith.addf %365, %372 : vector<8x8xf32>
    %374 = vector.broadcast %370 : f32 to vector<8x8xf32>
    %375 = arith.mulf %374, %76 : vector<8x8xf32>
    %376 = arith.addf %368, %375 : vector<8x8xf32>
    %c7_204 = arith.constant 7 : index
    %c2_205 = arith.constant 2 : index
    %377 = memref.load %arg5[%c7_204, %c2_205] : memref<15x4xf32, #tpu.memory_space<smem>>
    %c7_206 = arith.constant 7 : index
    %c2_207 = arith.constant 2 : index
    %378 = memref.load %arg6[%c7_206, %c2_207] : memref<15x4xf32, #tpu.memory_space<smem>>
    %379 = vector.broadcast %377 : f32 to vector<8x8xf32>
    %380 = arith.mulf %379, %83 : vector<8x8xf32>
    %381 = arith.addf %373, %380 : vector<8x8xf32>
    %382 = vector.broadcast %378 : f32 to vector<8x8xf32>
    %383 = arith.mulf %382, %83 : vector<8x8xf32>
    %384 = arith.addf %376, %383 : vector<8x8xf32>
    %385 = arith.mulf %322, %381 : vector<8x8xf32>
    %386 = arith.addf %385, %384 : vector<8x8xf32>
    %c0_208 = arith.constant 0 : index
    %c16 = arith.constant 16 : index
    %387 = vector.load %arg28[%c0_208, %c16] : memref<8x32xf32, #tpu.memory_space<vmem>>, vector<8x8xf32>
    tpu.vector_store %arg28[%c0_208, %c16], %386 {strides = array<i32>} : memref<8x32xf32, #tpu.memory_space<vmem>>, vector<8x8xf32>,
    %cst_209 = arith.constant dense<0xFF800000> : vector<8xf32>
    %388 = vector.multi_reduction <maximumf>, %386, %cst_209 [1] : vector<8x8xf32> to vector<8xf32>
    %389 = vector.shape_cast %388 : vector<8xf32> to vector<8x1xf32>
    %390 = vector.broadcast %389 : vector<8x1xf32> to vector<8x8xf32>
    %391 = arith.subf %386, %390 : vector<8x8xf32>
    %392 = math.exp %391 : vector<8x8xf32>
    %cst_210 = arith.constant dense<0.000000e+00> : vector<8xf32>
    %393 = vector.multi_reduction <add>, %392, %cst_210 [1] : vector<8x8xf32> to vector<8xf32>
    %394 = vector.shape_cast %393 : vector<8xf32> to vector<8x1xf32>
    %395 = tpu.reciprocal %394 {approx = true} : vector<8x1xf32> -> vector<8x1xf32>
    %396 = vector.broadcast %395 : vector<8x1xf32> to vector<8x8xf32>
    %397 = arith.mulf %392, %396 : vector<8x8xf32>
    %398 = arith.truncf %397 : vector<8x8xf32> to vector<8x8xbf16>
    %399 = arith.truncf %319 : vector<8x8xf32> to vector<8x8xbf16>
    %cst_211 = arith.constant dense<0.000000e+00> : vector<8x8xf32>
    %400 = tpu.matmul %398, %399, %cst_211 {dimension_numbers = #tpu.dot_dimension_numbers<[1], [0], [0], [1], [0, 0, 1, 1], [], []>} : vector<8x8xbf16>, vector<8x8xbf16>, vector<8x8xf32> -> vector<8x8xf32>
    %401 = arith.truncf %400 : vector<8x8xf32> to vector<8x8xbf16>
    %c2_212 = arith.constant 2 : index
    %c0_213 = arith.constant 0 : index
    %c0_214 = arith.constant 0 : index
    %402 = vector.load %arg15[%c2_212, %c0_213, %c0_214] : memref<4x8x32xbf16, #tpu.memory_space<vmem>>, vector<1x8x32xbf16>
    %403 = vector.shape_cast %402 : vector<1x8x32xbf16> to vector<8x32xbf16>
    %cst_215 = arith.constant dense<0.000000e+00> : vector<8x32xf32>
    %404 = tpu.matmul %401, %403, %cst_215 {dimension_numbers = #tpu.dot_dimension_numbers<[1], [0], [0], [1], [0, 0, 1, 1], [], []>} : vector<8x8xbf16>, vector<8x32xbf16>, vector<8x32xf32> -> vector<8x32xf32>
    %405 = arith.addf %298, %404 : vector<8x32xf32>
    %c3_216 = arith.constant 3 : index
    %c0_217 = arith.constant 0 : index
    %c0_218 = arith.constant 0 : index
    %406 = vector.load %arg9[%c3_216, %c0_217, %c0_218] : memref<4x32x8xbf16, #tpu.memory_space<vmem>>, vector<1x32x8xbf16>
    %407 = vector.shape_cast %406 : vector<1x32x8xbf16> to vector<32x8xbf16>
    %cst_219 = arith.constant dense<0.000000e+00> : vector<8x8xf32>
    %408 = tpu.matmul %1, %407, %cst_219 {dimension_numbers = #tpu.dot_dimension_numbers<[1], [0], [0], [1], [0, 0, 1, 1], [], []>} : vector<8x32xbf16>, vector<32x8xbf16>, vector<8x8xf32> -> vector<8x8xf32>
    %c3_220 = arith.constant 3 : index
    %c0_221 = arith.constant 0 : index
    %c0_222 = arith.constant 0 : index
    %409 = vector.load %arg10[%c3_220, %c0_221, %c0_222] : memref<4x1x8xf32, #tpu.memory_space<vmem>>, vector<1x1x8xf32>
    %410 = vector.shape_cast %409 : vector<1x1x8xf32> to vector<1x8xf32>
    %411 = vector.broadcast %410 : vector<1x8xf32> to vector<8x8xf32>
    %412 = arith.addf %408, %411 : vector<8x8xf32>
    %c3_223 = arith.constant 3 : index
    %c0_224 = arith.constant 0 : index
    %c0_225 = arith.constant 0 : index
    %413 = vector.load %arg11[%c3_223, %c0_224, %c0_225] : memref<4x32x8xbf16, #tpu.memory_space<vmem>>, vector<1x32x8xbf16>
    %414 = vector.shape_cast %413 : vector<1x32x8xbf16> to vector<32x8xbf16>
    %cst_226 = arith.constant dense<0.000000e+00> : vector<8x8xf32>
    %415 = tpu.matmul %33, %414, %cst_226 {dimension_numbers = #tpu.dot_dimension_numbers<[1], [0], [0], [1], [0, 0, 1, 1], [], []>} : vector<8x32xbf16>, vector<32x8xbf16>, vector<8x8xf32> -> vector<8x8xf32>
    %c3_227 = arith.constant 3 : index
    %c0_228 = arith.constant 0 : index
    %c0_229 = arith.constant 0 : index
    %416 = vector.load %arg12[%c3_227, %c0_228, %c0_229] : memref<4x1x8xf32, #tpu.memory_space<vmem>>, vector<1x1x8xf32>
    %417 = vector.shape_cast %416 : vector<1x1x8xf32> to vector<1x8xf32>
    %418 = vector.broadcast %417 : vector<1x8xf32> to vector<8x8xf32>
    %419 = arith.addf %415, %418 : vector<8x8xf32>
    %c3_230 = arith.constant 3 : index
    %c0_231 = arith.constant 0 : index
    %c0_232 = arith.constant 0 : index
    %420 = vector.load %arg13[%c3_230, %c0_231, %c0_232] : memref<4x32x8xbf16, #tpu.memory_space<vmem>>, vector<1x32x8xbf16>
    %421 = vector.shape_cast %420 : vector<1x32x8xbf16> to vector<32x8xbf16>
    %cst_233 = arith.constant dense<0.000000e+00> : vector<8x8xf32>
    %422 = tpu.matmul %34, %421, %cst_233 {dimension_numbers = #tpu.dot_dimension_numbers<[1], [0], [0], [1], [0, 0, 1, 1], [], []>} : vector<8x32xbf16>, vector<32x8xbf16>, vector<8x8xf32> -> vector<8x8xf32>
    %c3_234 = arith.constant 3 : index
    %c0_235 = arith.constant 0 : index
    %c0_236 = arith.constant 0 : index
    %423 = vector.load %arg14[%c3_234, %c0_235, %c0_236] : memref<4x1x8xf32, #tpu.memory_space<vmem>>, vector<1x1x8xf32>
    %424 = vector.shape_cast %423 : vector<1x1x8xf32> to vector<1x8xf32>
    %425 = vector.broadcast %424 : vector<1x8xf32> to vector<8x8xf32>
    %426 = arith.addf %422, %425 : vector<8x8xf32>
    %427 = arith.truncf %412 : vector<8x8xf32> to vector<8x8xbf16>
    %428 = arith.truncf %419 : vector<8x8xf32> to vector<8x8xbf16>
    %cst_237 = arith.constant dense<0.000000e+00> : vector<8x8xf32>
    %429 = tpu.matmul %427, %428, %cst_237 {dimension_numbers = #tpu.dot_dimension_numbers<[1], [1], [0], [0], [0, 0, 1, 0], [], []>} : vector<8x8xbf16>, vector<8x8xbf16>, vector<8x8xf32> -> vector<8x8xf32>
    %c0_238 = arith.constant 0 : index
    %c3_239 = arith.constant 3 : index
    %430 = memref.load %arg5[%c0_238, %c3_239] : memref<15x4xf32, #tpu.memory_space<smem>>
    %c0_240 = arith.constant 0 : index
    %c3_241 = arith.constant 3 : index
    %431 = memref.load %arg6[%c0_240, %c3_241] : memref<15x4xf32, #tpu.memory_space<smem>>
    %432 = vector.broadcast %430 : f32 to vector<8x8xf32>
    %433 = arith.mulf %432, %29 : vector<8x8xf32>
    %434 = vector.broadcast %431 : f32 to vector<8x8xf32>
    %435 = arith.mulf %434, %29 : vector<8x8xf32>
    %c1_242 = arith.constant 1 : index
    %c3_243 = arith.constant 3 : index
    %436 = memref.load %arg5[%c1_242, %c3_243] : memref<15x4xf32, #tpu.memory_space<smem>>
    %c1_244 = arith.constant 1 : index
    %c3_245 = arith.constant 3 : index
    %437 = memref.load %arg6[%c1_244, %c3_245] : memref<15x4xf32, #tpu.memory_space<smem>>
    %438 = vector.broadcast %436 : f32 to vector<8x8xf32>
    %439 = arith.mulf %438, %41 : vector<8x8xf32>
    %440 = arith.addf %433, %439 : vector<8x8xf32>
    %441 = vector.broadcast %437 : f32 to vector<8x8xf32>
    %442 = arith.mulf %441, %41 : vector<8x8xf32>
    %443 = arith.addf %435, %442 : vector<8x8xf32>
    %c2_246 = arith.constant 2 : index
    %c3_247 = arith.constant 3 : index
    %444 = memref.load %arg5[%c2_246, %c3_247] : memref<15x4xf32, #tpu.memory_space<smem>>
    %c2_248 = arith.constant 2 : index
    %c3_249 = arith.constant 3 : index
    %445 = memref.load %arg6[%c2_248, %c3_249] : memref<15x4xf32, #tpu.memory_space<smem>>
    %446 = vector.broadcast %444 : f32 to vector<8x8xf32>
    %447 = arith.mulf %446, %48 : vector<8x8xf32>
    %448 = arith.addf %440, %447 : vector<8x8xf32>
    %449 = vector.broadcast %445 : f32 to vector<8x8xf32>
    %450 = arith.mulf %449, %48 : vector<8x8xf32>
    %451 = arith.addf %443, %450 : vector<8x8xf32>
    %c3_250 = arith.constant 3 : index
    %c3_251 = arith.constant 3 : index
    %452 = memref.load %arg5[%c3_250, %c3_251] : memref<15x4xf32, #tpu.memory_space<smem>>
    %c3_252 = arith.constant 3 : index
    %c3_253 = arith.constant 3 : index
    %453 = memref.load %arg6[%c3_252, %c3_253] : memref<15x4xf32, #tpu.memory_space<smem>>
    %454 = vector.broadcast %452 : f32 to vector<8x8xf32>
    %455 = arith.mulf %454, %55 : vector<8x8xf32>
    %456 = arith.addf %448, %455 : vector<8x8xf32>
    %457 = vector.broadcast %453 : f32 to vector<8x8xf32>
    %458 = arith.mulf %457, %55 : vector<8x8xf32>
    %459 = arith.addf %451, %458 : vector<8x8xf32>
    %c4_254 = arith.constant 4 : index
    %c3_255 = arith.constant 3 : index
    %460 = memref.load %arg5[%c4_254, %c3_255] : memref<15x4xf32, #tpu.memory_space<smem>>
    %c4_256 = arith.constant 4 : index
    %c3_257 = arith.constant 3 : index
    %461 = memref.load %arg6[%c4_256, %c3_257] : memref<15x4xf32, #tpu.memory_space<smem>>
    %462 = vector.broadcast %460 : f32 to vector<8x8xf32>
    %463 = arith.mulf %462, %62 : vector<8x8xf32>
    %464 = arith.addf %456, %463 : vector<8x8xf32>
    %465 = vector.broadcast %461 : f32 to vector<8x8xf32>
    %466 = arith.mulf %465, %62 : vector<8x8xf32>
    %467 = arith.addf %459, %466 : vector<8x8xf32>
    %c5_258 = arith.constant 5 : index
    %c3_259 = arith.constant 3 : index
    %468 = memref.load %arg5[%c5_258, %c3_259] : memref<15x4xf32, #tpu.memory_space<smem>>
    %c5_260 = arith.constant 5 : index
    %c3_261 = arith.constant 3 : index
    %469 = memref.load %arg6[%c5_260, %c3_261] : memref<15x4xf32, #tpu.memory_space<smem>>
    %470 = vector.broadcast %468 : f32 to vector<8x8xf32>
    %471 = arith.mulf %470, %69 : vector<8x8xf32>
    %472 = arith.addf %464, %471 : vector<8x8xf32>
    %473 = vector.broadcast %469 : f32 to vector<8x8xf32>
    %474 = arith.mulf %473, %69 : vector<8x8xf32>
    %475 = arith.addf %467, %474 : vector<8x8xf32>
    %c6_262 = arith.constant 6 : index
    %c3_263 = arith.constant 3 : index
    %476 = memref.load %arg5[%c6_262, %c3_263] : memref<15x4xf32, #tpu.memory_space<smem>>
    %c6_264 = arith.constant 6 : index
    %c3_265 = arith.constant 3 : index
    %477 = memref.load %arg6[%c6_264, %c3_265] : memref<15x4xf32, #tpu.memory_space<smem>>
    %478 = vector.broadcast %476 : f32 to vector<8x8xf32>
    %479 = arith.mulf %478, %76 : vector<8x8xf32>
    %480 = arith.addf %472, %479 : vector<8x8xf32>
    %481 = vector.broadcast %477 : f32 to vector<8x8xf32>
    %482 = arith.mulf %481, %76 : vector<8x8xf32>
    %483 = arith.addf %475, %482 : vector<8x8xf32>
    %c7_266 = arith.constant 7 : index
    %c3_267 = arith.constant 3 : index
    %484 = memref.load %arg5[%c7_266, %c3_267] : memref<15x4xf32, #tpu.memory_space<smem>>
    %c7_268 = arith.constant 7 : index
    %c3_269 = arith.constant 3 : index
    %485 = memref.load %arg6[%c7_268, %c3_269] : memref<15x4xf32, #tpu.memory_space<smem>>
    %486 = vector.broadcast %484 : f32 to vector<8x8xf32>
    %487 = arith.mulf %486, %83 : vector<8x8xf32>
    %488 = arith.addf %480, %487 : vector<8x8xf32>
    %489 = vector.broadcast %485 : f32 to vector<8x8xf32>
    %490 = arith.mulf %489, %83 : vector<8x8xf32>
    %491 = arith.addf %483, %490 : vector<8x8xf32>
    %492 = arith.mulf %429, %488 : vector<8x8xf32>
    %493 = arith.addf %492, %491 : vector<8x8xf32>
    %c0_270 = arith.constant 0 : index
    %c24 = arith.constant 24 : index
    %494 = vector.load %arg28[%c0_270, %c24] : memref<8x32xf32, #tpu.memory_space<vmem>>, vector<8x8xf32>
    tpu.vector_store %arg28[%c0_270, %c24], %493 {strides = array<i32>} : memref<8x32xf32, #tpu.memory_space<vmem>>, vector<8x8xf32>,
    %cst_271 = arith.constant dense<0xFF800000> : vector<8xf32>
    %495 = vector.multi_reduction <maximumf>, %493, %cst_271 [1] : vector<8x8xf32> to vector<8xf32>
    %496 = vector.shape_cast %495 : vector<8xf32> to vector<8x1xf32>
    %497 = vector.broadcast %496 : vector<8x1xf32> to vector<8x8xf32>
    %498 = arith.subf %493, %497 : vector<8x8xf32>
    %499 = math.exp %498 : vector<8x8xf32>
    %cst_272 = arith.constant dense<0.000000e+00> : vector<8xf32>
    %500 = vector.multi_reduction <add>, %499, %cst_272 [1] : vector<8x8xf32> to vector<8xf32>
    %501 = vector.shape_cast %500 : vector<8xf32> to vector<8x1xf32>
    %502 = tpu.reciprocal %501 {approx = true} : vector<8x1xf32> -> vector<8x1xf32>
    %503 = vector.broadcast %502 : vector<8x1xf32> to vector<8x8xf32>
    %504 = arith.mulf %499, %503 : vector<8x8xf32>
    %505 = arith.truncf %504 : vector<8x8xf32> to vector<8x8xbf16>
    %506 = arith.truncf %426 : vector<8x8xf32> to vector<8x8xbf16>
    %cst_273 = arith.constant dense<0.000000e+00> : vector<8x8xf32>
    %507 = tpu.matmul %505, %506, %cst_273 {dimension_numbers = #tpu.dot_dimension_numbers<[1], [0], [0], [1], [0, 0, 1, 1], [], []>} : vector<8x8xbf16>, vector<8x8xbf16>, vector<8x8xf32> -> vector<8x8xf32>
    %508 = arith.truncf %507 : vector<8x8xf32> to vector<8x8xbf16>
    %c3_274 = arith.constant 3 : index
    %c0_275 = arith.constant 0 : index
    %c0_276 = arith.constant 0 : index
    %509 = vector.load %arg15[%c3_274, %c0_275, %c0_276] : memref<4x8x32xbf16, #tpu.memory_space<vmem>>, vector<1x8x32xbf16>
    %510 = vector.shape_cast %509 : vector<1x8x32xbf16> to vector<8x32xbf16>
    %cst_277 = arith.constant dense<0.000000e+00> : vector<8x32xf32>
    %511 = tpu.matmul %508, %510, %cst_277 {dimension_numbers = #tpu.dot_dimension_numbers<[1], [0], [0], [1], [0, 0, 1, 1], [], []>} : vector<8x8xbf16>, vector<8x32xbf16>, vector<8x32xf32> -> vector<8x32xf32>
    %512 = arith.addf %405, %511 : vector<8x32xf32>
    %c0_278 = arith.constant 0 : index
    %c0_279 = arith.constant 0 : index
    %513 = vector.load %arg16[%c0_278, %c0_279] : memref<1x32xf32, #tpu.memory_space<vmem>>, vector<1x32xf32>
    %514 = vector.broadcast %513 : vector<1x32xf32> to vector<8x32xf32>
    %515 = arith.addf %512, %514 : vector<8x32xf32>
    %516 = arith.addf %5, %515 : vector<8x32xf32>
    %c0_280 = arith.constant 0 : index
    %c0_281 = arith.constant 0 : index
    %517 = vector.load %arg17[%c0_280, %c0_281] : memref<1x32xf32, #tpu.memory_space<vmem>>, vector<1x32xf32>
    %c0_282 = arith.constant 0 : index
    %c0_283 = arith.constant 0 : index
    %518 = vector.load %arg18[%c0_282, %c0_283] : memref<1x32xf32, #tpu.memory_space<vmem>>, vector<1x32xf32>
    %cst_284 = arith.constant dense<0.000000e+00> : vector<8xf32>
    %519 = vector.multi_reduction <add>, %516, %cst_284 [1] : vector<8x32xf32> to vector<8xf32>
    %520 = vector.shape_cast %519 : vector<8xf32> to vector<8x1xf32>
    %cst_285 = arith.constant 3.200000e+01 : f32
    %521 = vector.broadcast %cst_285 : f32 to vector<8x1xf32>
    %522 = arith.divf %520, %521 : vector<8x1xf32>
    %523 = vector.broadcast %522 : vector<8x1xf32> to vector<8x32xf32>
    %524 = arith.subf %516, %523 : vector<8x32xf32>
    %525 = arith.mulf %524, %524 : vector<8x32xf32>
    %cst_286 = arith.constant dense<0.000000e+00> : vector<8xf32>
    %526 = vector.multi_reduction <add>, %525, %cst_286 [1] : vector<8x32xf32> to vector<8xf32>
    %527 = vector.shape_cast %526 : vector<8xf32> to vector<8x1xf32>
    %cst_287 = arith.constant 3.200000e+01 : f32
    %528 = vector.broadcast %cst_287 : f32 to vector<8x1xf32>
    %529 = arith.divf %527, %528 : vector<8x1xf32>
    %cst_288 = arith.constant 9.99999974E-6 : f32
    %530 = vector.broadcast %cst_288 : f32 to vector<8x1xf32>
    %531 = arith.addf %529, %530 : vector<8x1xf32>
    %532 = math.rsqrt %531 : vector<8x1xf32>
    %533 = vector.broadcast %532 : vector<8x1xf32> to vector<8x32xf32>
    %534 = arith.mulf %524, %533 : vector<8x32xf32>
    %535 = vector.broadcast %517 : vector<1x32xf32> to vector<8x32xf32>
    %536 = arith.mulf %534, %535 : vector<8x32xf32>
    %537 = vector.broadcast %518 : vector<1x32xf32> to vector<8x32xf32>
    %538 = arith.addf %536, %537 : vector<8x32xf32>
    %539 = arith.truncf %538 : vector<8x32xf32> to vector<8x32xbf16>
    %c0_289 = arith.constant 0 : index
    %c0_290 = arith.constant 0 : index
    %540 = vector.load %arg19[%c0_289, %c0_290] : memref<32x128xbf16, #tpu.memory_space<vmem>>, vector<32x128xbf16>
    %cst_291 = arith.constant dense<0.000000e+00> : vector<8x128xf32>
    %541 = tpu.matmul %539, %540, %cst_291 {dimension_numbers = #tpu.dot_dimension_numbers<[1], [0], [0], [1], [0, 0, 1, 1], [], []>} : vector<8x32xbf16>, vector<32x128xbf16>, vector<8x128xf32> -> vector<8x128xf32>
    %c0_292 = arith.constant 0 : index
    %c0_293 = arith.constant 0 : index
    %542 = vector.load %arg20[%c0_292, %c0_293] : memref<1x128xf32, #tpu.memory_space<vmem>>, vector<1x128xf32>
    %543 = vector.broadcast %542 : vector<1x128xf32> to vector<8x128xf32>
    %544 = arith.addf %541, %543 : vector<8x128xf32>
    %545 = arith.truncf %544 : vector<8x128xf32> to vector<8x128xbf16>
    %cst_294 = arith.constant 5.000000e-01 : bf16
    %546 = vector.broadcast %cst_294 : bf16 to vector<8x128xbf16>
    %547 = arith.mulf %546, %545 : vector<8x128xbf16>
    %cst_295 = arith.constant 4.467770e-02 : bf16
    %548 = vector.broadcast %cst_295 : bf16 to vector<8x128xbf16>
    %549 = arith.mulf %548, %545 : vector<8x128xbf16>
    %550 = arith.mulf %549, %545 : vector<8x128xbf16>
    %551 = arith.mulf %550, %545 : vector<8x128xbf16>
    %552 = arith.addf %545, %551 : vector<8x128xbf16>
    %cst_296 = arith.constant 7.968750e-01 : bf16
    %553 = vector.broadcast %cst_296 : bf16 to vector<8x128xbf16>
    %554 = arith.mulf %553, %552 : vector<8x128xbf16>
    %555 = math.tanh %554 : vector<8x128xbf16>
    %cst_297 = arith.constant 1.000000e+00 : bf16
    %556 = vector.broadcast %cst_297 : bf16 to vector<8x128xbf16>
    %557 = arith.addf %556, %555 : vector<8x128xbf16>
    %558 = arith.mulf %547, %557 : vector<8x128xbf16>
    %c0_298 = arith.constant 0 : index
    %c0_299 = arith.constant 0 : index
    %559 = vector.load %arg21[%c0_298, %c0_299] : memref<128x32xbf16, #tpu.memory_space<vmem>>, vector<128x32xbf16>
    %cst_300 = arith.constant dense<0.000000e+00> : vector<8x32xf32>
    %560 = tpu.matmul %558, %559, %cst_300 {dimension_numbers = #tpu.dot_dimension_numbers<[1], [0], [0], [1], [0, 0, 1, 1], [], []>} : vector<8x128xbf16>, vector<128x32xbf16>, vector<8x32xf32> -> vector<8x32xf32>
    %c0_301 = arith.constant 0 : index
    %c0_302 = arith.constant 0 : index
    %561 = vector.load %arg22[%c0_301, %c0_302] : memref<1x32xf32, #tpu.memory_space<vmem>>, vector<1x32xf32>
    %562 = vector.broadcast %561 : vector<1x32xf32> to vector<8x32xf32>
    %563 = arith.addf %560, %562 : vector<8x32xf32>
    %564 = arith.addf %538, %563 : vector<8x32xf32>
    %c0_303 = arith.constant 0 : index
    %c0_304 = arith.constant 0 : index
    %565 = vector.load %arg23[%c0_303, %c0_304] : memref<1x32xf32, #tpu.memory_space<vmem>>, vector<1x32xf32>
    %c0_305 = arith.constant 0 : index
    %c0_306 = arith.constant 0 : index
    %566 = vector.load %arg24[%c0_305, %c0_306] : memref<1x32xf32, #tpu.memory_space<vmem>>, vector<1x32xf32>
    %cst_307 = arith.constant dense<0.000000e+00> : vector<8xf32>
    %567 = vector.multi_reduction <add>, %564, %cst_307 [1] : vector<8x32xf32> to vector<8xf32>
    %568 = vector.shape_cast %567 : vector<8xf32> to vector<8x1xf32>
    %cst_308 = arith.constant 3.200000e+01 : f32
    %569 = vector.broadcast %cst_308 : f32 to vector<8x1xf32>
    %570 = arith.divf %568, %569 : vector<8x1xf32>
    %571 = vector.broadcast %570 : vector<8x1xf32> to vector<8x32xf32>
    %572 = arith.subf %564, %571 : vector<8x32xf32>
    %573 = arith.mulf %572, %572 : vector<8x32xf32>
    %cst_309 = arith.constant dense<0.000000e+00> : vector<8xf32>
    %574 = vector.multi_reduction <add>, %573, %cst_309 [1] : vector<8x32xf32> to vector<8xf32>
    %575 = vector.shape_cast %574 : vector<8xf32> to vector<8x1xf32>
    %cst_310 = arith.constant 3.200000e+01 : f32
    %576 = vector.broadcast %cst_310 : f32 to vector<8x1xf32>
    %577 = arith.divf %575, %576 : vector<8x1xf32>
    %cst_311 = arith.constant 9.99999974E-6 : f32
    %578 = vector.broadcast %cst_311 : f32 to vector<8x1xf32>
    %579 = arith.addf %577, %578 : vector<8x1xf32>
    %580 = math.rsqrt %579 : vector<8x1xf32>
    %581 = vector.broadcast %580 : vector<8x1xf32> to vector<8x32xf32>
    %582 = arith.mulf %572, %581 : vector<8x32xf32>
    %583 = vector.broadcast %565 : vector<1x32xf32> to vector<8x32xf32>
    %584 = arith.mulf %582, %583 : vector<8x32xf32>
    %585 = vector.broadcast %566 : vector<1x32xf32> to vector<8x32xf32>
    %586 = arith.addf %584, %585 : vector<8x32xf32>
    %c0_312 = arith.constant 0 : index
    %c0_313 = arith.constant 0 : index
    %c0_314 = arith.constant 0 : index
    %587 = vector.load %arg25[%c0_312, %c0_313, %c0_314] : memref<1x8x32xf32, #tpu.memory_space<vmem>>, vector<1x8x32xf32>
    %588 = vector.shape_cast %587 : vector<1x8x32xf32> to vector<8x32xf32>
    %589 = vector.shape_cast %586 : vector<8x32xf32> to vector<1x8x32xf32>
    tpu.vector_store %arg25[%c0_312, %c0_313, %c0_314], %589 {strides = array<i32>} : memref<1x8x32xf32, #tpu.memory_space<vmem>>, vector<1x8x32xf32>,
    %c0_315 = arith.constant 0 : index
    %c0_316 = arith.constant 0 : index
    %c0_317 = arith.constant 0 : index
    %590 = vector.load %arg26[%c0_315, %c0_316, %c0_317] : memref<1x8x8xf32, #tpu.memory_space<vmem>>, vector<1x8x8xf32>
    %591 = vector.shape_cast %590 : vector<1x8x8xf32> to vector<8x8xf32>
    %592 = vector.shape_cast %19 : vector<8x8xf32> to vector<1x8x8xf32>
    tpu.vector_store %arg26[%c0_315, %c0_316, %c0_317], %592 {strides = array<i32>} : memref<1x8x8xf32, #tpu.memory_space<vmem>>, vector<1x8x8xf32>,
    %c0_318 = arith.constant 0 : index
    %c0_319 = arith.constant 0 : index
    %593 = vector.load %arg28[%c0_318, %c0_319] : memref<8x32xf32, #tpu.memory_space<vmem>>, vector<8x32xf32>
    %c0_320 = arith.constant 0 : index
    %c0_321 = arith.constant 0 : index
    %c0_322 = arith.constant 0 : index
    %594 = vector.load %arg27[%c0_320, %c0_321, %c0_322] : memref<1x8x32xf32, #tpu.memory_space<vmem>>, vector<1x8x32xf32>
    %595 = vector.shape_cast %594 : vector<1x8x32xf32> to vector<8x32xf32>
    %596 = vector.shape_cast %593 : vector<8x32xf32> to vector<1x8x32xf32>
    tpu.vector_store %arg27[%c0_320, %c0_321, %c0_322], %596 {strides = array<i32>} : memref<1x8x32xf32, #tpu.memory_space<vmem>>, vector<1x8x32xf32>,
    return
  }
  func.func @transform_0(%arg0: i32) -> (i32, i32, i32) {
    %c0_i32 = arith.constant 0 : i32
    %c0_i32_0 = arith.constant 0 : i32
    %c0_i32_1 = arith.constant 0 : i32
    return %arg0, %c0_i32, %c0_i32_0 : i32, i32, i32
  }
  func.func @transform_1(%arg0: i32) -> (i32, i32, i32) {
    %c0_i32 = arith.constant 0 : i32
    %c0_i32_0 = arith.constant 0 : i32
    %c0_i32_1 = arith.constant 0 : i32
    return %arg0, %c0_i32, %c0_i32_0 : i32, i32, i32
  }
  func.func @transform_2(%arg0: i32) -> (i32, i32, i32) {
    %c0_i32 = arith.constant 0 : i32
    %c0_i32_0 = arith.constant 0 : i32
    %c0_i32_1 = arith.constant 0 : i32
    return %arg0, %c0_i32, %c0_i32_0 : i32, i32, i32
  }
  func.func @transform_3(%arg0: i32) -> (i32, i32, i32) {
    %c0_i32 = arith.constant 0 : i32
    %c0_i32_0 = arith.constant 0 : i32
    %c0_i32_1 = arith.constant 0 : i32
    return %arg0, %c0_i32, %c0_i32_0 : i32, i32, i32
  }
  func.func @transform_4(%arg0: i32) -> (i32, i32) {
    %c0_i32 = arith.constant 0 : i32
    %c0_i32_0 = arith.constant 0 : i32
    %c0_i32_1 = arith.constant 0 : i32
    return %c0_i32, %c0_i32_0 : i32, i32
  }
  func.func @transform_5(%arg0: i32) -> (i32, i32) {
    %c0_i32 = arith.constant 0 : i32
    %c0_i32_0 = arith.constant 0 : i32
    %c0_i32_1 = arith.constant 0 : i32
    return %c0_i32, %c0_i32_0 : i32, i32
  }
  func.func @transform_6(%arg0: i32) -> (i32, i32) {
    %c0_i32 = arith.constant 0 : i32
    %c0_i32_0 = arith.constant 0 : i32
    %c0_i32_1 = arith.constant 0 : i32
    return %c0_i32, %c0_i32_0 : i32, i32
  }
  func.func @transform_7(%arg0: i32) -> (i32, i32) {
    %c0_i32 = arith.constant 0 : i32
    %c0_i32_0 = arith.constant 0 : i32
    %c0_i32_1 = arith.constant 0 : i32
    return %c0_i32, %c0_i32_0 : i32, i32
  }
  func.func @transform_8(%arg0: i32) -> (i32, i32, i32) {
    %c0_i32 = arith.constant 0 : i32
    %c0_i32_0 = arith.constant 0 : i32
    %c0_i32_1 = arith.constant 0 : i32
    %c0_i32_2 = arith.constant 0 : i32
    return %c0_i32, %c0_i32_0, %c0_i32_1 : i32, i32, i32
  }
  func.func @transform_9(%arg0: i32) -> (i32, i32, i32) {
    %c0_i32 = arith.constant 0 : i32
    %c0_i32_0 = arith.constant 0 : i32
    %c0_i32_1 = arith.constant 0 : i32
    %c0_i32_2 = arith.constant 0 : i32
    return %c0_i32, %c0_i32_0, %c0_i32_1 : i32, i32, i32
  }
  func.func @transform_10(%arg0: i32) -> (i32, i32, i32) {
    %c0_i32 = arith.constant 0 : i32
    %c0_i32_0 = arith.constant 0 : i32
    %c0_i32_1 = arith.constant 0 : i32
    %c0_i32_2 = arith.constant 0 : i32
    return %c0_i32, %c0_i32_0, %c0_i32_1 : i32, i32, i32
  }
  func.func @transform_11(%arg0: i32) -> (i32, i32, i32) {
    %c0_i32 = arith.constant 0 : i32
    %c0_i32_0 = arith.constant 0 : i32
    %c0_i32_1 = arith.constant 0 : i32
    %c0_i32_2 = arith.constant 0 : i32
    return %c0_i32, %c0_i32_0, %c0_i32_1 : i32, i32, i32
  }
  func.func @transform_12(%arg0: i32) -> (i32, i32, i32) {
    %c0_i32 = arith.constant 0 : i32
    %c0_i32_0 = arith.constant 0 : i32
    %c0_i32_1 = arith.constant 0 : i32
    %c0_i32_2 = arith.constant 0 : i32
    return %c0_i32, %c0_i32_0, %c0_i32_1 : i32, i32, i32
  }
  func.func @transform_13(%arg0: i32) -> (i32, i32, i32) {
    %c0_i32 = arith.constant 0 : i32
    %c0_i32_0 = arith.constant 0 : i32
    %c0_i32_1 = arith.constant 0 : i32
    %c0_i32_2 = arith.constant 0 : i32
    return %c0_i32, %c0_i32_0, %c0_i32_1 : i32, i32, i32
  }
  func.func @transform_14(%arg0: i32) -> (i32, i32, i32) {
    %c0_i32 = arith.constant 0 : i32
    %c0_i32_0 = arith.constant 0 : i32
    %c0_i32_1 = arith.constant 0 : i32
    %c0_i32_2 = arith.constant 0 : i32
    return %c0_i32, %c0_i32_0, %c0_i32_1 : i32, i32, i32
  }
  func.func @transform_15(%arg0: i32) -> (i32, i32) {
    %c0_i32 = arith.constant 0 : i32
    %c0_i32_0 = arith.constant 0 : i32
    %c0_i32_1 = arith.constant 0 : i32
    return %c0_i32, %c0_i32_0 : i32, i32
  }
  func.func @transform_16(%arg0: i32) -> (i32, i32) {
    %c0_i32 = arith.constant 0 : i32
    %c0_i32_0 = arith.constant 0 : i32
    %c0_i32_1 = arith.constant 0 : i32
    return %c0_i32, %c0_i32_0 : i32, i32
  }
  func.func @transform_17(%arg0: i32) -> (i32, i32) {
    %c0_i32 = arith.constant 0 : i32
    %c0_i32_0 = arith.constant 0 : i32
    %c0_i32_1 = arith.constant 0 : i32
    return %c0_i32, %c0_i32_0 : i32, i32
  }
  func.func @transform_18(%arg0: i32) -> (i32, i32) {
    %c0_i32 = arith.constant 0 : i32
    %c0_i32_0 = arith.constant 0 : i32
    %c0_i32_1 = arith.constant 0 : i32
    return %c0_i32, %c0_i32_0 : i32, i32
  }
  func.func @transform_19(%arg0: i32) -> (i32, i32) {
    %c0_i32 = arith.constant 0 : i32
    %c0_i32_0 = arith.constant 0 : i32
    %c0_i32_1 = arith.constant 0 : i32
    return %c0_i32, %c0_i32_0 : i32, i32
  }
  func.func @transform_20(%arg0: i32) -> (i32, i32) {
    %c0_i32 = arith.constant 0 : i32
    %c0_i32_0 = arith.constant 0 : i32
    %c0_i32_1 = arith.constant 0 : i32
    return %c0_i32, %c0_i32_0 : i32, i32
  }
  func.func @transform_21(%arg0: i32) -> (i32, i32) {
    %c0_i32 = arith.constant 0 : i32
    %c0_i32_0 = arith.constant 0 : i32
    %c0_i32_1 = arith.constant 0 : i32
    return %c0_i32, %c0_i32_0 : i32, i32
  }
  func.func @transform_22(%arg0: i32) -> (i32, i32) {
    %c0_i32 = arith.constant 0 : i32
    %c0_i32_0 = arith.constant 0 : i32
    %c0_i32_1 = arith.constant 0 : i32
    return %c0_i32, %c0_i32_0 : i32, i32
  }
  func.func @transform_23(%arg0: i32) -> (i32, i32) {
    %c0_i32 = arith.constant 0 : i32
    %c0_i32_0 = arith.constant 0 : i32
    %c0_i32_1 = arith.constant 0 : i32
    return %c0_i32, %c0_i32_0 : i32, i32
  }
  func.func @transform_24(%arg0: i32) -> (i32, i32, i32) {
    %c0_i32 = arith.constant 0 : i32
    %c0_i32_0 = arith.constant 0 : i32
    %c0_i32_1 = arith.constant 0 : i32
    return %arg0, %c0_i32, %c0_i32_0 : i32, i32, i32
  }
  func.func @transform_25(%arg0: i32) -> (i32, i32, i32) {
    %c0_i32 = arith.constant 0 : i32
    %c0_i32_0 = arith.constant 0 : i32
    %c0_i32_1 = arith.constant 0 : i32
    return %arg0, %c0_i32, %c0_i32_0 : i32, i32, i32
  }
  func.func @transform_26(%arg0: i32) -> (i32, i32, i32) {
    %c0_i32 = arith.constant 0 : i32
    %c0_i32_0 = arith.constant 0 : i32
    %c0_i32_1 = arith.constant 0 : i32
    return %arg0, %c0_i32, %c0_i32_0 : i32, i32, i32
  }
}

</mosaic_0001>

<bundles_post_ra>
// kernel: tpu_custom_call.1
= control target key start
LH: loop header
LB: loop body
LE: loop exit
PB: predicated region body
PF: predicated region fallthrough
CT: control target
= control target key end

     0   :  { %s5232_s0 = inlined_call_operand.vmem [shape: bf16[2,8,32], index: 0, kind: input, shape index: {}]   ;;  %s5233_s1 = inlined_call_operand.vmem [shape: bf16[2,8,32], index: 1, kind: input, shape index: {}]   ;;  %s5234_s2 = inlined_call_operand.vmem [shape: f32[2,8,32], index: 2, kind: input, shape index: {}]   ;;  %s5235_s3 = inlined_call_operand.vmem [shape: f32[2,8,1], index: 3, kind: input, shape index: {}]   ;;  %s5236_s4 = inlined_call_operand.vmem [shape: f32[15,4], index: 4, kind: input, shape index: {}]   ;;  %s5237_s5 = inlined_call_operand.vmem [shape: f32[15,4], index: 5, kind: input, shape index: {}]   ;;  %s5238_s6 = inlined_call_operand.vmem [shape: bf16[32,8], index: 6, kind: input, shape index: {}]   ;;  %s5239_s7 = inlined_call_operand.vmem [shape: f32[1,8], index: 7, kind: input, shape index: {}]   ;;  %s5240_s8 = inlined_call_operand.vmem [shape: bf16[4,32,8], index: 8, kind: input, shape index: {}]   ;;  %s5241_s9 = inlined_call_operand.vmem [shape: f32[4,1,8], index: 9, kind: input, shape index: {}]   ;;  %s5242_s10 = inlined_call_operand.vmem [shape: bf16[4,32,8], index: 10, kind: input, shape index: {}]   ;;  %s5243_s11 = inlined_call_operand.vmem [shape: f32[4,1,8], index: 11, kind: input, shape index: {}]   ;;  %s5244_s12 = inlined_call_operand.vmem [shape: bf16[4,32,8], index: 12, kind: input, shape index: {}]   ;;  %s5245_s13 = inlined_call_operand.vmem [shape: f32[4,1,8], index: 13, kind: input, shape index: {}]   ;;  %s5246_s14 = inlined_call_operand.vmem [shape: bf16[4,8,32], index: 14, kind: input, shape index: {}]   ;;  %s5247_s15 = inlined_call_operand.vmem [shape: f32[1,32], index: 15, kind: input, shape index: {}]   ;;  %s5248_s16 = inlined_call_operand.vmem [shape: f32[1,32], index: 16, kind: input, shape index: {}]   ;;  %s5249_s17 = inlined_call_operand.vmem [shape: f32[1,32], index: 17, kind: input, shape index: {}]   ;;  %s5250_s18 = inlined_call_operand.vmem [shape: bf16[32,128], index: 18, kind: input, shape index: {}]   ;;  %s5251_s19 = inlined_call_operand.vmem [shape: f32[1,128], index: 19, kind: input, shape index: {}]   ;;  %s5252_s20 = inlined_call_operand.vmem [shape: bf16[128,32], index: 20, kind: input, shape index: {}]   ;;  %s5253_s21 = inlined_call_operand.vmem [shape: f32[1,32], index: 21, kind: input, shape index: {}]   ;;  %s5254_s22 = inlined_call_operand.vmem [shape: f32[1,32], index: 22, kind: input, shape index: {}]   ;;  %s5255_s23 = inlined_call_operand.vmem [shape: f32[1,32], index: 23, kind: input, shape index: {}]   ;;  %s5256_s24 = inlined_call_operand.hbm [shape: f32[2,8,32], index: 24, kind: output, shape index: {0}]   ;;  %s5257_s25 = inlined_call_operand.hbm [shape: f32[2,8,8], index: 25, kind: output, shape index: {1}]   ;;  %s5258_s26 = inlined_call_operand.hbm [shape: f32[2,8,32], index: 26, kind: output, shape index: {2}]  }
   0x1   :  { %5307 = sst [smem:[#allocation39_spill]] %s5232_s0 }
   0x2   :  { %5308 = sst [smem:[#allocation40_spill]] %s5233_s1 }
   0x3   :  { %5309 = sst [smem:[#allocation41_spill]] %s5234_s2 }
   0x4   :  { %5310 = sst [smem:[#allocation42_spill]] %s5235_s3 }
   0x5   :  { %5311 = sst [smem:[#allocation43_spill]] %s5236_s4 }
   0x6   :  { %5312 = sst [smem:[#allocation44_spill]] %s5237_s5 }
   0x7   :  { %5313 = sst [smem:[#allocation45_spill]] %s5238_s6 }
   0x8   :  { %5314 = sst [smem:[#allocation46_spill]] %s5239_s7 }
   0x9   :  { %5315 = sst [smem:[#allocation47_spill]] %s5240_s8 }
   0xa   :  { %5316 = sst [smem:[#allocation48_spill]] %s5241_s9 }
   0xb   :  { %5317 = sst [smem:[#allocation49_spill]] %s5242_s10 }
   0xc   :  { %5318 = sst [smem:[#allocation50_spill]] %s5243_s11 }
   0xd   :  { %5319 = sst [smem:[#allocation51_spill]] %s5244_s12 }
   0xe   :  { %5320 = sst [smem:[#allocation52_spill]] %s5245_s13 }
   0xf   :  { %5321 = sst [smem:[#allocation53_spill]] %s5246_s14 }
  0x10   :  { %5322 = sst [smem:[#allocation54_spill]] %s5247_s15 }
  0x11   :  { %5323 = sst [smem:[#allocation55_spill]] %s5248_s16 }
  0x12   :  { %5324 = sst [smem:[#allocation56_spill]] %s5249_s17 }
  0x13   :  { %5325 = sst [smem:[#allocation57_spill]] %s5250_s18 }
  0x14   :  { %5326 = sst [smem:[#allocation58_spill]] %s5251_s19 }
  0x15   :  { %5327 = sst [smem:[#allocation59_spill]] %s5252_s20 }
  0x16   :  { %5328 = sst [smem:[#allocation60_spill]] %s5253_s21 }
  0x17   :  { %5329 = sst [smem:[#allocation61_spill]] %s5254_s22 }
  0x18   :  { %5330 = sst [smem:[#allocation62_spill]] %s5255_s23 }
  0x19   :  { %5331 = sst [smem:[#allocation63_spill]] %s5256_s24 }
  0x1a   :  { %5332 = sst [smem:[#allocation64_spill]] %s5257_s25 }
  0x1b   :  { %5333 = sst [smem:[#allocation65_spill]] %s5258_s26 }
  0x1c   :  { %32 = vsyncpa [#allocation5], 0 }
  0x1d   :  { %33 = vsyncpa [#allocation7], 0 }
  0x1e   :  { %34 = vsyncpa [#allocation4], 0 }
  0x1f   :  { %36 = vsyncpa [#allocation4 + $0x1], 0 }
  0x20   :  { %37 = vsyncpa [#allocation10], 0 }
  0x21   :  { %39 = vsyncpa [#allocation10 + $0x1], 0  ;;  %s4271_s27 = smov 0   ;;  %s4273_s3 = smov 0  }
  0x22   :  { %s4275_s7 = smov 0   ;;  %s4277_s28 = smov 0  }
  0x23 LB: > { %5334 = sst [smem:[#allocation16_spill]] %s4109_s27  ;;  %s4292_s8 = sadd.s32 4294967295, %s4121_s28   ;;  %s4121_s28 = sphi %s4277_s28, %s5422_s28   ;;  %s4117_s7 = sphi %s4275_s7, %s5425_s7   ;;  %s4113_s3 = sphi %s4273_s3, %s5424_s3   ;;  %s4109_s27 = sphi %s4271_s27, %s5423_s27  }
  0x24   : > { %5335 = sst [smem:[#allocation17_spill]] %s4113_s3  ;;  %s5263_s4 = sadd.s32 4294967294, %s4121_s28  }
  0x25   : > { %5336 = sst [smem:[#allocation18_spill]] %s4117_s7  ;;  %s4296_s29 = sadd.s32 1, %s4121_s28  }
  0x26   : > { %5337 = sst [smem:[#allocation19_spill]] %s4121_s28  ;;  %s576_s0 = sadd.s32 1, %s4117_s7 }
  0x27   : > { %5338 = sst [smem:[#allocation20_spill]] %s4292_s8  ;;  %s573_s9 = ssub.s32 %s4121_s28, %s4296_s29 }
  0x28   : > { %5339 = sst [smem:[#allocation21_spill]] %s4296_s29  ;;  %p586_p0 = scmp.ne.s32.totalorder %s4117_s7, %s4113_s3 }
  0x29   : > { %p574_p1 = scmp.eq.s32.totalorder %s573_s9, 0  ;;  %p587_p2 = scmp.eq.s32.totalorder %s4292_s8, 1 }
  0x2a   : > { %p592_p3 = scmp.ne.s32.totalorder %s4113_s3, %s4109_s27  ;;  %p593_p4 = scmp.eq.s32.totalorder %s5263_s4, 1 }
  0x2b   : > { %s4309_s30 = scalar_select %p574_p1, %s4117_s7, %s576_s0  }
  0x2c   : > { %p4311_p5 = por %p587_p2, %p586_p0  ;;  %p4315_p6 = por %p593_p4, %p592_p3 }
  0x2d   : > { %5340 = sst [smem:[#allocation22_spill]] %s4309_s30  ;;  %p3314_p7 = scmp.ge.s32.totalorder %s4121_s28, 1 }
  0x2e   : > { %s5341_s2 = scalar_select %p4311_p5, 1, 0 }
  0x2f   : > { %s5343_s5 = scalar_select %p4315_p6, 1, 0 }
  0x30   : > { %5342 = sst [smem:[#allocation23_spill]] %s5341_s2  ;;  %p652_p8 = scmp.lt.s32.totalorder %s4121_s28, 3 }
  0x31   : > { %5344 = sst [smem:[#allocation24_spill]] %s5343_s5  ;;  %p5269_p9 = scmp.eq.s32.totalorder %s4292_s8, 0 }
  0x32   : > { %p4322_p10 = pnand %p3314_p7, %p652_p8  ;;  %s5346_s9 = sld [smem:[#allocation43_spill]] }
  0x33   : > { %s5347_s7 = sld [smem:[#allocation44_spill]] }
  0x34   : > { %s5345_s10 = scalar_select %p4322_p10, 1, 0 }
  0x35   : > { %p3839_p11 = pneg %p4322_p10 }
  0x37   : > { %p4336_p12 = pnand %p5269_p9, %p3839_p11 }
  0x38   : > { %s664_s0 = sshll.u32 %s5346_s9, 4  ;;  %s665_s0 = int_to_ptr.vmem [resolvable:$true] %s664_s0 }
  0x39   : > { %s677_s29 = sshll.u32 %s5347_s7, 4  ;;  %s3967_s27 = scalar_lea.vmem %s665_s0, 256  ;;  %s678_s29 = int_to_ptr.vmem [resolvable:$true] %s677_s29 }
  0x3a   : > { %p3968_p13 = scmp.ne.s32.totalorder %s665_s0, %s3967_s27  ;;  %p3969_p0 = pneg %p4336_p12 }
  0x3b   : > { %p3975_p3 = scmp.lt.s32.totalorder %s665_s0, %s665_s0  ;;  %p3976_p4 = scmp.lt.s32.totalorder %s3967_s27, %s3967_s27 }
  0x3c   : > { %p3970_p1 = pnand %p3969_p0, %p3968_p13 }
  0x3d   : > { %p3977_p7 = por %p3976_p4, %p3975_p3 }
  0x3e   : > { %p3971_p2 = pneg %p3970_p1 }
  0x40   : > { %p3978_p8 = pnand %p3977_p7, %p3971_p2 }
  0x42   : > { %3981 = shalt.err (!%p3978_p8)
}
  0x43   : > { %s4123_s7 = smov [#allocation3]   ;;  %s4124_s4 = smov 128  }
  0x44   : > { %s4125_s30 = smov 8   ;;  %s3982_s6 = scalar_lea.vmem %s678_s29, 256 }
  0x45   : > { %3842 = dma.vmem_to_smem (!%p4336_p12), %s665_s0, 256, %s4123_s7, [#allocation5], %s4124_s4, %s4124_s4, %s4125_s30  }
  0x46   : > { %p3983_p11 = scmp.ne.s32.totalorder %s678_s29, %s3982_s6  ;;  %p3990_p13 = scmp.lt.s32.totalorder %s678_s29, %s678_s29 }
  0x47   : > { %p3991_p1 = scmp.lt.s32.totalorder %s3982_s6, %s3982_s6 }
  0x48   : > { %p3985_p9 = pnand %p3983_p11, %p3969_p0 }
  0x49   : > { %p3992_p5 = por %p3991_p1, %p3990_p13 }
  0x4a   : > { %p3986_p6 = pneg %p3985_p9 }
  0x4c   : > { %p3993_p10 = pnand %p3992_p5, %p3986_p6 }
  0x4e   : > { %3996 = shalt.err (!%p3993_p10)
}
  0x4f   : > { %s4126_s27 = smov [#allocation6]   ;;  %p5349_p2 = scmp.ne.s32.totalorder %s5345_s10, 0 }
  0x50   : > { %3845 = dma.vmem_to_smem (!%p4336_p12), %s678_s29, 256, %s4126_s27, [#allocation7], %s4124_s4, %s4124_s4, %s4125_s30  }
  0x51   : > { %775 = sbr.rel (%p5349_p2) target bundleno = 5393 (0x1511), region = 116 }
  0x56   : > { %p5350_p3 = scmp.eq.s32.totalorder %s4292_s8, 0 }
  0x58   : > { %4092 = dma.done.wait (%p5350_p3), [#allocation5], 256   ;;  %p5351_p4 = pmov %p5350_p3 }
  0x59   : > { %p5352_p9 = pmov %p5350_p3 }
  0x5a   : > { %4094 = vsyncadd (%p5351_p4), [#allocation5], 4294967040 }
  0x5b   : > { %4096 = dma.done.wait (%p5352_p9), [#allocation7], 256   ;;  %p5353_p0 = pmov %p5350_p3 }
  0x5d   : > { %4098 = vsyncadd (%p5353_p0), [#allocation7], 4294967040 }
  0x5e   : > { %785 = sfence }
  0x5f   : > { %s5354_s5 = sld [smem:[#allocation45_spill]]  ;;  %v4127_v1 = vmov 0.0   ;;  %vm4128_vm0 = vmmov 0   ;;  %p871_p5 = scmp.lt.s32.totalorder %s4292_s8, 1  ;;  %v4129_v3 = vmov 0   ;;  %vm919_vm1 = vcmask 261120  }
  0x60   : > { %3609 = vmatprep.subr.bf16.mxu0 %v4127_v1  ;;  %3637 = vmatprep.subr.bf16.mxu1 %v4127_v1  ;;  %s5356_s6 = sld [smem:[#allocation41_spill]]  ;;  %vm1011_vm3 = vcmask 1043456   ;;  %s5275_s9 = sand.u32 1, %s4113_s3   ;;  %vm971_vm5 = vcmask 64512   ;;  %vm1102_vm6 = vcmask 1046528   ;;  %vm1106_vm7 = vcmask 1040384  }
  0x61   : > { %3613 = vmatprep.mubr.msk.bf16.mxu0 %vm4128_vm0, %v4127_v1  ;;  %3903 = vset.pattern.permute.xlu0 %v4129_v3  ;;  %s4375_s0 = scalar_select %p871_p5, %s4292_s8, 1  ;;  %vm1111_vm8 = vcmask 1045504   ;;  %vm1115_vm9 = vcmask 1041408   ;;  %vm1120_vm10 = vcmask 1044480   ;;  %vm1124_vm11 = vcmask 1042432  }
  0x62   : > { %3641 = vmatprep.mubr.msk.bf16.mxu1 %vm4128_vm0, %v4127_v1  ;;  %s5358_s29 = sld [smem:[#allocation42_spill]]  ;;  %s4410_s28 = sshll.u32 %s5275_s9, 3  ;;  %vm1824_vm12 = vcmask 130112   ;;  %vm2291_vm13 = vcmask 195712  }
  0x63   : > { %5355 = sst [smem:[#allocation25_spill]] %s4375_s0  ;;  %s3326_s7 = sshll.u32 %s4375_s0, 3 }
  0x64   : > { %s5277_s4 = sshll.u32 %s4375_s0, 2  ;;  %5361 = sst [smem:[#allocation27_spill]] %s4410_s28 }
  0x65   : > { %v3904_v0 = vld [vmem:[%s5354_s5 + $0x8] sm:$0xff]   ;;  %v3905_v2 = vld [vmem:[%s5354_s5] sm:$0xff]   ;;  %s5360_s5 = sld [smem:[#allocation46_spill]] }
  0x66   : > { %3610 = vmatpush3.bf16.msra.mxu0 %v3904_v0  ;;  %s4383_s27 = scalar_lea.vmem %s5356_s6, %s3326_s7  ;;  %s5359_s6 = sld [smem:[#allocation40_spill]] }
  0x67   : > { %3611 = vmatprep.subr.bf16.mxu0 %v4127_v1  ;;  %5357 = sst [smem:[#allocation26_spill]] %s4383_s27  ;;  %v894_v4 = vld [vmem:[%s4383_s27] sm:$0xff] }
  0x68   : > { %s886_s10 = scalar_lea.vmem %s5358_s29, %s3326_s7  ;;  %v4390_v6 = vpack.c.bf16 %v894_v4, %v894_v4  ;;  %s5276_s7 = scalar_lea.vmem [#allocation9], %s4410_s28 }
  0x69   : > { %v963_v5 = vld [vmem:[%s886_s10] sm:$0xff]  ;;  %s4419_s30 = sld [smem:[#allocation6 + $0x1]] }
  0x6a   : > { %3612 = vmatpush3.bf16.msra.mxu0 %v3905_v2  ;;  %vm964_vm2 = vcmp.gt.f32.partialorder %v963_v5, 0.0  ;;  %s4426_s29 = sld [smem:[#allocation3 + $0x101]] }
  0x6b   : > { %3617 = vmatprep.subr.bf16.mxu0 %v4127_v1  ;;  %v965_v7 = vsel %vm964_vm2, 1, %v4129_v3  ;;  %v3328_v11 = vld [vmem:[%s5360_s5] ss:$0 sm:$0xff]  ;;  %s4417_s5 = sld [smem:[#allocation3 + $0x1]] }
  0x6c   : > { %967 = vperm.xlu0 %3903, %v965_v7   ;;  %s878_s1 = scalar_lea.vmem %s5359_s6, %s5277_s4  ;;  %s4422_s6 = sld [smem:[#allocation3 + $0x81]] }
  0x6d   : > { %3614 = vmatmul.mubr.msk.bf16.vlgmr.msra.gmra.mxu0 %vm919_vm1, %v4390_v6  ;;  %v893_v8 = vld [vmem:[%s878_s1] sm:$0xf]  ;;  %s4424_s1 = sld [smem:[#allocation6 + $0x81]] }
  0x6e   : > { %3619 = vmatprep.mubr.msk.bf16.mxu0 %vm4128_vm0, %v4127_v1  ;;  %v1013_v9 = vsel %vm1011_vm3, %v893_v8, 0  ;;  %s4428_s10 = sld [smem:[#allocation6 + $0x101]] }
  0x6f   : > { %3618 = vmatpush3.bf16.msra.mxu0 %v1013_v9  ;;  %5362 = sst [smem:[#allocation28_spill]] %s4419_s30  ;;  %v1760_v39 = vstv %s4419_s30 }
  0x70   : > { %3623 = vmatprep.subr.bf16.mxu0 %v4127_v1  ;;  %s4430_s9 = sld [smem:[#allocation3 + $0x181]]  ;;  %v1772_v42 = vstv %s4426_s29 }
  0x71   : > { %s4434_s4 = sld [smem:[#allocation3 + $0x201]]  ;;  %v1758_v38 = vstv %s4417_s5 }
  0x72   : > { %s4436_s24 = sld [smem:[#allocation6 + $0x201]]  ;;  %v1764_v40 = vstv %s4422_s6 }
  0x73   : > { %s4438_s23 = sld [smem:[#allocation3 + $0x281]]  ;;  %v1767_v41 = vstv %s4424_s1 }
  0x74   : > { %s4440_s22 = sld [smem:[#allocation6 + $0x281]]  ;;  %v1775_v43 = vstv %s4428_s10 }
  0x75   : > { %s4442_s3 = sld [smem:[#allocation3 + $0x301]] }
  0x76   : > { %5363 = sst [smem:[#allocation29_spill]] %s4430_s9  ;;  %v1780_v44 = vstv %s4430_s9 }
  0x77   : > { %s5366_s2 = sld [smem:[#allocation49_spill]]  ;;  %v1788_v47 = vstv %s4434_s4 }
  0x78   : > { %5364 = sst [smem:[#allocation30_spill]] %s4436_s24  ;;  %v1791_v48 = vstv %s4436_s24 }
  0x79   : > { %s4447_s28 = sld [smem:[#allocation6 + $0x301]]  ;;  %v1796_v51 = vstv %s4438_s23 }
  0x7a   : > { %5365 = sst [smem:[#allocation31_spill]] %s4440_s22  ;;  %v1799_v52 = vstv %s4440_s22 }
  0x7b   : > { %s4449_s8 = sld [smem:[#allocation3 + $0x381]]  ;;  %v1804_v53 = vstv %s4442_s3 }
  0x7c   : > { %s4451_s21 = sld [smem:[#allocation6 + $0x381]] }
  0x7d   : > { %v3907_v35 = vld [vmem:[%s5366_s2 + $0x8] sm:$0xff]   ;;  %s4454_s19 = sld [smem:[#allocation3 + $0x2]] }
  0x7e   : > { %3638 = vmatpush3.bf16.msra.mxu1 %v3907_v35  ;;  %s4456_s20 = sld [smem:[#allocation6 + $0x2]] }
  0x7f   : > { %3639 = vmatprep.subr.bf16.mxu1 %v4127_v1  ;;  %s4458_s17 = sld [smem:[#allocation3 + $0x82]]  ;;  %v1807_v54 = vstv %s4447_s28 }
  0x80   : > { %s4460_s16 = sld [smem:[#allocation6 + $0x82]] }
  0x81   : > { %5367 = sst [smem:[#allocation32_spill]] %s4449_s8  ;;  %v1812_v55 = vstv %s4449_s8 }
  0x82   : > { %5368 = sst [smem:[#allocation33_spill]] %s4451_s21  ;;  %v1815_v56 = vstv %s4451_s21 }
  0x83   : > { %s4462_s25 = sld [smem:[#allocation3 + $0x102]]  ;;  %v2225_v59 = vstv %s4454_s19 }
  0x84   : > { %s4464_s26 = sld [smem:[#allocation6 + $0x102]]  ;;  %v2227_v60 = vstv %s4456_s20 }
  0x85   : > { %s4466_s18 = sld [smem:[#allocation3 + $0x182]]  ;;  %v2231_v61 = vstv %s4458_s17 }
  0x86   : > { %s4468_s15 = sld [smem:[#allocation6 + $0x182]]  ;;  %v2234_v62 = vstv %s4460_s16 }
  0x87   : > { %s4470_s27 = sld [smem:[#allocation3 + $0x202]] }
  0x88   : > { %s4472_s14 = sld [smem:[#allocation6 + $0x202]] }
  0x89   : > { %s4474_s13 = sld [smem:[#allocation3 + $0x282]]  ;;  %v2239_v63 = vstv %s4462_s25 }
  0x8a   : > { %s4476_s11 = sld [smem:[#allocation6 + $0x282]]  ;;  %v2242_v0 = vstv %s4464_s26 }
  0x8b   : > { %5369 = sst [smem:[#allocation34_spill]] %s4466_s18  ;;  %v2247_v8 = vstv %s4466_s18 }
  0x8c   : > { %s4478_s12 = sld [smem:[#allocation3 + $0x302]]  ;;  %v2250_v9 = vstv %s4468_s15 }
  0x8d   : > { %s4485_s2 = sld [smem:[#allocation6 + $0x302]] }
  0x8e   : > { %5370 = sst [smem:[#allocation35_spill]] %s4472_s14 }
  0x8f   : > { %5371 = sst [smem:[#allocation36_spill]] %s4474_s13 }
  0x90   : > { %s4491_s0 = sld [smem:[#allocation3 + $0x382]] }
  0x91   : > { %s4498_s30 = sld [smem:[#allocation6 + $0x382]] }
  0x92   : > { %s4504_s9 = sld [smem:[#allocation3 + $0x3]] }
  0x93   : > { %5372 = sst [smem:[#allocation37_spill]] %s4485_s2 }
  0x94   : > { %s4510_s24 = sld [smem:[#allocation6 + $0x3]] }
  0x95   : > { %s4516_s22 = sld [smem:[#allocation3 + $0x83]] }
  0x96   : > { %s4522_s21 = sld [smem:[#allocation6 + $0x83]] }
  0x97   : > { %5373 = sst [smem:[#allocation38_spill]] %s4498_s30 }
  0x98   : > { %s4540_s8 = sld [smem:[#allocation3 + $0x103]] }
  0x99   : > { %s4547_s18 = sld [smem:[#allocation6 + $0x103]] }
  0x9a   : > { %s4610_s6 = sld [smem:[#allocation3 + $0x203]] }
  0x9b   : > { %s4662_s20 = sld [smem:[#allocation3 + $0x283]] }
  0x9c   : > { %s4671_s23 = sld [smem:[#allocation6 + $0x283]] }
  0x9d   : > { %s4687_s15 = sld [smem:[#allocation3 + $0x303]] }
  0x9e   : > { %s5387_s4 = sld [smem:[#allocation49_spill]] }
  0x9f   : > { %s5389_s25 = sld [smem:[#allocation39_spill]] }
  0xa0   : > { %s5391_s16 = sld [smem:[#allocation50_spill]] }
  0xa1   : > { %s5393_s28 = sld [smem:[#allocation52_spill]] }
  0xa2   : > { %s3348_s29 = sld [smem:[#allocation6 + $0x80]] }
  0xa3   : > { %s1388_s10 = sld [smem:[#allocation6]] }
  0xa4   : > { %s3352_s5 = sld [smem:[#allocation6 + $0x180]] }
  0xa5   : > { %s3355_s1 = sld [smem:[#allocation3 + $0x280]] }
  0xa6   : > { %s3356_s19 = sld [smem:[#allocation6 + $0x280]] }
  0xa7   : > { %s3357_s17 = sld [smem:[#allocation3 + $0x300]] }
  0xa8   : > { %s3359_s3 = sld [smem:[#allocation3 + $0x380]] }
  0xe7   : > { %v968_v10 = vpop.permute.xlu0 %967 }
  0xe8   : > { %vm969_vm4 = vcmp.eq.s32.totalorder %v968_v10, 1  ;;  %v2255_v10 = vstv %s4470_s27  ;;  %s4695_s27 = sld [smem:[#allocation6 + $0x303]] }
 0x12d   : > { %v957_v12 = vpop.f32.mrf.mxu0 }
 0x12e   : > { %v958_v13 = vadd.f32 %v3328_v11, %v957_v12 }
 0x12f   : > { %v3615_v14 = vpop.f32.mrf.mxu0 }
 0x130   : > { %v970_v15 = vsel %vm969_vm4, %v958_v13, -32768.0  ;;  %v2258_v13 = vstv %s4472_s14  ;;  %v2263_v14 = vstv %s4474_s13  ;;  %s4553_s13 = sld [smem:[#allocation3 + $0x183]] }
 0x131   : > { %v972_v16 = vsel %vm971_vm5, %v970_v15, -inf  ;;  %v960_v17 = vpop.f32.mrf.mxu0  ;;  %3082 = vst.msk [vmem:[%s5276_s7] sm:$0xff] %vm971_vm5, %v970_v15  ;;  %s4432_s7 = sld [smem:[#allocation6 + $0x181]] }
 0x132   : > { %v973_v18 = vrot.slane %v972_v16, 4  ;;  %v2271_v17 = vstv %s4478_s12  ;;  %s4714_s12 = sld [smem:[#allocation6 + $0x383]] }
 0x133   : > { %v3616_v19 = vpop.f32.mrf.mxu0  ;;  %s3351_s14 = sld [smem:[#allocation3 + $0x180]] }
 0x134   : > { %v974_v20 = vmax.f32 %v972_v16, %v973_v18  ;;  %v2266_v16 = vstv %s4476_s11  ;;  %v2274_v18 = vstv %s4485_s2  ;;  %s4560_s2 = sld [smem:[#allocation6 + $0x183]] }
 0x135   : > { %s4709_s11 = sld [smem:[#allocation3 + $0x383]] }
 0x136   : > { %v975_v21 = vrot.slane %v974_v20, 2 }
 0x137   : > { %v1783_v46 = vstv %s4432_s7  ;;  %s3353_s7 = sld [smem:[#allocation3 + $0x200]] }
 0x138   : > { %v976_v22 = vmax.f32 %v974_v20, %v975_v21  ;;  %v2279_v21 = vstv %s4491_s0  ;;  %s3347_s0 = sld [smem:[#allocation3 + $0x80]] }
 0x13a   : > { %v977_v23 = vrot.slane %v976_v22, 1 }
 0x13c   : > { %v978_v24 = vmax.f32 %v976_v22, %v977_v23  ;;  %v2282_v22 = vstv %s4498_s30  ;;  %s4627_s30 = sld [smem:[#allocation6 + $0x203]] }
 0x13e   : > { %v979_v25 = vsub.f32 %v970_v15, %v978_v24 }
 0x140   : > { %v980_v26 = vmul.f32 1.442695, %v979_v25 }
 0x142   : > { %3940 = vpow2.f32 %v980_v26  ;;  %v2647_v26 = vstv %s4504_s9 }
 0x14f   : > { %v3941_v27 = vpop.eup %3940 }
 0x150   : > { %v982_v28 = vsel %vm971_vm5, %v3941_v27, 0.0 }
 0x151   : > { %v983_v29 = vrot.slane %v982_v28, 4 }
 0x153   : > { %v984_v30 = vadd.f32 %v983_v29, %v982_v28  ;;  %v2649_v29 = vstv %s4510_s24  ;;  %s5396_s24 = sld [smem:[#allocation26_spill]] }
 0x155   : > { %v985_v31 = vrot.slane %v984_v30, 2 }
 0x157   : > { %v986_v32 = vadd.f32 %v985_v31, %v984_v30  ;;  %v2653_v30 = vstv %s4516_s22  ;;  %s5386_s22 = sld [smem:[#allocation47_spill]] }
 0x159   : > { %v987_v33 = vrot.slane %v986_v32, 1 }
 0x15b   : > { %v988_v34 = vadd.f32 %v987_v33, %v986_v32 }
 0x15d   : > { %3942 = vrcp.f32 %v988_v34  ;;  %v2656_v34 = vstv %s4522_s21 }
 0x16a   : > { %v3943_v36 = vpop.eup %3942 }
 0x16b   : > { %v4480_v37 = vmul.f32 %v3943_v36, %v3941_v27 }
 0x16d   : > { %v991_v45 = vpack.c.bf16 %v4480_v37, %v4480_v37  ;;  %v1100_v49 = vrot.slane %v4480_v37, 1  ;;  %v1104_v50 = vrot.slane %v4480_v37, 7  ;;  %v1109_v57 = vrot.slane %v4480_v37, 2 }
 0x16e   : > { %v1113_v58 = vrot.slane %v4480_v37, 6  ;;  %v1118_v4 = vrot.slane %v4480_v37, 3  ;;  %v1122_v5 = vrot.slane %v4480_v37, 5  ;;  %v1127_v7 = vrot.slane %v4480_v37, 4 }
 0x16f   : > { %992 = vxpose.xlu0.c.b16.start.end [1/1] (short) (narrow) %v991_v45, 16  ;;  %v1103_v2 = vsel %vm1102_vm6, %v1100_v49, 0.0  ;;  %v1107_v3 = vsel %vm1106_vm7, 0.0, %v1104_v50  ;;  %v1112_v11 = vsel %vm1111_vm8, %v1109_v57, 0.0  ;;  %v1759_v32 = vmul.f32 %v1758_v38, %v4480_v37 }
 0x170   : > { %v1116_v12 = vsel %vm1115_vm9, 0.0, %v1113_v58  ;;  %v4542_v15 = vadd.f32 %v1107_v3, %v1103_v2  ;;  %v1121_v19 = vsel %vm1120_vm10, %v1118_v4, 0.0  ;;  %v1125_v20 = vsel %vm1124_vm11, 0.0, %v1122_v5 }
 0x171   : > { %v4555_v23 = vadd.f32 %v1116_v12, %v1112_v11  ;;  %v1129_v24 = vsel %vm1011_vm3, %v1127_v7, 0.0  ;;  %v1130_v25 = vsel %vm1011_vm3, 0.0, %v1127_v7  ;;  %v1132_v27 = vsel %vm1124_vm11, %v1122_v5, 0.0 }
 0x172   : > { %v1133_v28 = vsel %vm1120_vm10, 0.0, %v1118_v4  ;;  %v4566_v31 = vadd.f32 %v1125_v20, %v1121_v19  ;;  %v1765_v33 = vmul.f32 %v1764_v40, %v4542_v15  ;;  %v4575_v35 = vadd.f32 %v1130_v25, %v1129_v24 }
 0x173   : > { %v1136_v36 = vsel %vm1111_vm8, 0.0, %v1109_v57  ;;  %v1761_v45 = vmul.f32 %v1760_v39, %v4480_v37  ;;  %v1768_v2 = vmul.f32 %v1767_v41, %v4542_v15  ;;  %v4584_v38 = vadd.f32 %v1133_v28, %v1132_v27 }
 0x174   : > { %v1135_v3 = vsel %vm1115_vm9, %v1113_v58, 0.0  ;;  %v1766_v40 = vadd.f32 %v1765_v33, %v1759_v32  ;;  %v1773_v4 = vmul.f32 %v1772_v42, %v4555_v23  ;;  %v1138_v57 = vsel %vm1106_vm7, %v1104_v50, 0.0 }
 0x175   : > { %v1139_v39 = vsel %vm1102_vm6, 0.0, %v1100_v49  ;;  %v1769_v41 = vadd.f32 %v1768_v2, %v1761_v45  ;;  %v1776_v5 = vmul.f32 %v1775_v43, %v4555_v23  ;;  %v1781_v42 = vmul.f32 %v1780_v44, %v4566_v31 }
 0x176   : > { %v1774_v58 = vadd.f32 %v1773_v4, %v1766_v40  ;;  %v2661_v7 = vstv %s4540_s8  ;;  %v2664_v11 = vstv %s4547_s18  ;;  %v4604_v50 = vadd.f32 %v1136_v36, %v1135_v3 }
 0x177   : > { %v1777_v12 = vadd.f32 %v1776_v5, %v1769_v41  ;;  %v1784_v49 = vmul.f32 %v1783_v46, %v4566_v31  ;;  %v2669_v19 = vstv %s4553_s13  ;;  %v4612_v43 = vadd.f32 %v1139_v39, %v1138_v57  ;;  %s5385_s13 = sld [smem:[#allocation25_spill]] }
 0x178   : > { %v1782_v44 = vadd.f32 %v1781_v42, %v1774_v58  ;;  %v1789_v20 = vmul.f32 %v1788_v47, %v4575_v35  ;;  %v2672_v24 = vstv %s4560_s2  ;;  %v1792_v27 = vmul.f32 %v1791_v48, %v4575_v35  ;;  %s5408_s2 = sld [smem:[#allocation64_spill]] }
 0x179   : > { %v1785_v25 = vadd.f32 %v1784_v49, %v1777_v12  ;;  %v1797_v46 = vmul.f32 %v1796_v51, %v4584_v38  ;;  %v2226_v28 = vmul.f32 %v2225_v59, %v4480_v37  ;;  %v2228_v47 = vmul.f32 %v2227_v60, %v4480_v37 }
 0x17a   : > { %v1790_v32 = vadd.f32 %v1789_v20, %v1782_v44  ;;  %v2232_v33 = vmul.f32 %v2231_v61, %v4542_v15  ;;  %v2235_v48 = vmul.f32 %v2234_v62, %v4542_v15  ;;  %v1800_v36 = vmul.f32 %v1799_v52, %v4584_v38 }
 0x17b   : > { %v1793_v51 = vadd.f32 %v1792_v27, %v1785_v25  ;;  %v1805_v59 = vmul.f32 %v1804_v53, %v4604_v50  ;;  %v2240_v45 = vmul.f32 %v2239_v63, %v4555_v23  ;;  %v2243_v62 = vmul.f32 %v2242_v0, %v4555_v23 }
 0x17c   : > { %v1798_v60 = vadd.f32 %v1797_v46, %v1790_v32  ;;  %v2233_v2 = vadd.f32 %v2232_v33, %v2226_v28  ;;  %v2236_v61 = vadd.f32 %v2235_v48, %v2228_v47  ;;  %v1808_v40 = vmul.f32 %v1807_v54, %v4604_v50 }
 0x17d   : > { %v1801_v3 = vadd.f32 %v1800_v36, %v1793_v51  ;;  %v1813_v52 = vmul.f32 %v1812_v55, %v4612_v43  ;;  %v2248_v53 = vmul.f32 %v2247_v8, %v4566_v31  ;;  %v2251_v0 = vmul.f32 %v2250_v9, %v4566_v31  ;;  %s5388_s9 = sshll.u32 %s5385_s13, 2  ;;  %s5407_s13 = sld [smem:[#allocation23_spill]] }
 0x17e   : > { %v1806_v63 = vadd.f32 %v1805_v59, %v1798_v60  ;;  %v2241_v4 = vadd.f32 %v2240_v45, %v2233_v2  ;;  %v2244_v57 = vadd.f32 %v2243_v62, %v2236_v61  ;;  %v1816_v54 = vmul.f32 %v1815_v56, %v4612_v43  ;;  %s874_s26 = scalar_lea.vmem %s5389_s25, %s5388_s9  ;;  %s1387_s9 = sld [smem:[#allocation3]] }
 0x17f   : > { %v1809_v39 = vadd.f32 %v1808_v40, %v1801_v3  ;;  %v2256_v55 = vmul.f32 %v2255_v10, %v4575_v35  ;;  %v2677_v8 = vstv %s4610_s6  ;;  %v2259_v58 = vmul.f32 %v2258_v13, %v4575_v35  ;;  %s5390_s6 = sld [smem:[#allocation51_spill]] }
 0x180   : > { %v4673_v41 = vadd.f32 %v1813_v52, %v1806_v63  ;;  %v2249_v9 = vadd.f32 %v2248_v53, %v2241_v4  ;;  %v2252_v5 = vadd.f32 %v2251_v0, %v2244_v57  ;;  %v2264_v56 = vmul.f32 %v2263_v14, %v4584_v38  ;;  %s3349_s25 = sld [smem:[#allocation3 + $0x100]] }
 0x181   : > { %v4678_v42 = vadd.f32 %v1816_v54, %v1809_v39  ;;  %v2267_v10 = vmul.f32 %v2266_v16, %v4584_v38  ;;  %v2680_v12 = vstv %s4627_s30  ;;  %v2648_v20 = vmul.f32 %v2647_v26, %v4480_v37  ;;  %s3354_s30 = sld [smem:[#allocation6 + $0x200]] }
 0x182   : > { %v2257_v49 = vadd.f32 %v2256_v55, %v2249_v9  ;;  %v2260_v44 = vadd.f32 %v2259_v58, %v2252_v5  ;;  %v2654_v13 = vmul.f32 %v2653_v30, %v4542_v15  ;;  %v2272_v14 = vmul.f32 %v2271_v17, %v4604_v50 }
 0x183   : > { %v2275_v16 = vmul.f32 %v2274_v18, %v4604_v50  ;;  %v2650_v25 = vmul.f32 %v2649_v29, %v4480_v37  ;;  %v2657_v27 = vmul.f32 %v2656_v34, %v4542_v15  ;;  %v2662_v17 = vmul.f32 %v2661_v7, %v4555_v23  ;;  %p5410_p10 = scmp.ne.s32.totalorder %s5407_s13, 0 }
 0x184   : > { %v2265_v26 = vadd.f32 %v2264_v56, %v2257_v49  ;;  %v2268_v30 = vadd.f32 %v2267_v10, %v2260_v44  ;;  %v2655_v46 = vadd.f32 %v2654_v13, %v2648_v20  ;;  %v2280_v18 = vmul.f32 %v2279_v21, %v4612_v43  ;;  %v3906_v10 = vld [vmem:[%s5386_s22 + $0x8] sm:$0xff]   ;;  %v4779_v49 = vld [vmem:[%s874_s26] sm:$0xf]  ;;  %s3350_s26 = sld [smem:[#allocation6 + $0x100]] }
 0x185   : > { %v2283_v29 = vmul.f32 %v2282_v22, %v4612_v43  ;;  %v2658_v34 = vadd.f32 %v2657_v27, %v2650_v25  ;;  %v2665_v28 = vmul.f32 %v2664_v11, %v4555_v23  ;;  %v2670_v7 = vmul.f32 %v2669_v19, %v4566_v31  ;;  %v3910_v44 = vld [vmem:[%s5390_s6 + $0x8] sm:$0xff]   ;;  %v3911_v20 = vld [vmem:[%s5390_s6] sm:$0xff]  }
 0x186   : > { %v2273_v32 = vadd.f32 %v2272_v14, %v2265_v26  ;;  %v2276_v47 = vadd.f32 %v2275_v16, %v2268_v30  ;;  %v2663_v33 = vadd.f32 %v2662_v17, %v2655_v46  ;;  %v2673_v21 = vmul.f32 %v2672_v24, %v4566_v31 }
 0x187   : > { %v2666_v48 = vadd.f32 %v2665_v28, %v2658_v34  ;;  %v2685_v51 = vstv %s4662_s20  ;;  %v2688_v36 = vstv %s4671_s23  ;;  %v2678_v45 = vmul.f32 %v2677_v8, %v4575_v35  ;;  %s5392_s23 = sld [smem:[#allocation48_spill]] }
 0x188   : > { %v4733_v22 = vadd.f32 %v2280_v18, %v2273_v32  ;;  %v4735_v59 = vadd.f32 %v2283_v29, %v2276_v47  ;;  %v2671_v11 = vadd.f32 %v2670_v7, %v2663_v33  ;;  %v2681_v2 = vmul.f32 %v2680_v12, %v4575_v35  ;;  %v3909_v12 = vld [vmem:[%s5387_s4] sm:$0xff]   ;;  %s3358_s20 = sld [smem:[#allocation6 + $0x300]] }
 0x189   : > { %v2674_v60 = vadd.f32 %v2673_v21, %v2666_v48  ;;  %v2693_v61 = vstv %s4687_s15  ;;  %v2686_v62 = vmul.f32 %v2685_v51, %v4584_v38  ;;  %v2696_v3 = vstv %s4695_s27  ;;  %3640 = vmatpush3.bf16.msra.mxu1 %v3909_v12  ;;  %v3338_v47 = vld [vmem:[%s5391_s16] ss:$0 sm:$0xff]  ;;  %s3360_s15 = sld [smem:[#allocation6 + $0x380]] }
 0x18a   : > { %v2679_v19 = vadd.f32 %v2678_v45, %v2671_v11  ;;  %v2689_v24 = vmul.f32 %v2688_v36, %v4584_v38  ;;  %v2701_v52 = vstv %s4709_s11  ;;  %v2694_v63 = vmul.f32 %v2693_v61, %v4604_v50  ;;  %3653 = vmatprep.subr.bf16.mxu1 %v4127_v1  ;;  %s5394_s11 = smov %s5393_s28  ;;  %s5406_s27 = sld [smem:[#allocation27_spill]] }
 0x18b   : > { %v2682_v40 = vadd.f32 %v2681_v2, %v2674_v60  ;;  %v2704_v4 = vstv %s4714_s12  ;;  %v2697_v0 = vmul.f32 %v2696_v3, %v4604_v50  ;;  %v2702_v54 = vmul.f32 %v2701_v52, %v4612_v43  ;;  %v3342_v2 = vld [vmem:[%s5393_s28] ss:$0 sm:$0xff]  ;;  %s5401_s28 = sld [smem:[#allocation59_spill]] }
 0x18c   : > { %v2687_v53 = vadd.f32 %v2686_v62, %v2679_v19  ;;  %v2705_v8 = vmul.f32 %v2704_v4, %v4612_v43  ;;  %v1055_v58 = vsel %vm1011_vm3, %v4390_v6, 0  ;;  %v3908_v6 = vld [vmem:[%s5386_s22] sm:$0xff]   ;;  %v3913_v4 = vld [vmem:[%s5386_s22 + $0x10] sm:$0xff]  }
 0x18d   : > { %v2690_v57 = vadd.f32 %v2689_v24, %v2682_v40  ;;  %v3334_v48 = vld [vmem:[%s5392_s23] ss:$0 sm:$0xff]  ;;  %v3912_v40 = vld [vmem:[%s5386_s22 + $0x18] sm:$0xff]  }
 0x18e   : > { %v2695_v39 = vadd.f32 %v2694_v63, %v2687_v53 }
 0x18f   : > { %v2698_v55 = vadd.f32 %v2697_v0, %v2690_v57  ;;  %v3914_v57 = vld [vmem:[%s5390_s6 + $0x18] sm:$0xff]   ;;  %v3915_v0 = vld [vmem:[%s5390_s6 + $0x10] sm:$0xff]  }
 0x190   : > { %v4749_v9 = vadd.f32 %v2702_v54, %v2695_v39  ;;  %v1395_v39 = vstv %s3347_s0  ;;  %v1389_v54 = vstv %s1387_s9  ;;  %s5397_s0 = sld [smem:[#allocation54_spill]]  ;;  %s4130_s9 = smov 16  }
 0x191   : > { %v4751_v5 = vadd.f32 %v2705_v8, %v2698_v55  ;;  %v1398_v55 = vstv %s3348_s29  ;;  %v1396_v8 = vmul.f32 %v1395_v39, %v4542_v15  ;;  %s5402_s12 = smov %s5401_s28 }
 0x1d1   : > { %v1000_v56 = vpop.trf.xlu0 }
 0x1d2   : > { %3620 = vmatmul.mubr.msk.bf16.vlgmr.msra.gmra.mxu0 %vm971_vm5, %v1000_v56 }
 0x1d3   : > { %3624 = vmatpush3.bf16.msra.mxu0 %v1055_v58  ;;  %3625 = vmatprep.mubr.msk.bf16.mxu0 %vm4128_vm0, %v4127_v1  ;;  %v1391_v58 = vstv %s1388_s10  ;;  %s5395_s10 = sld [smem:[#allocation53_spill]] }
 0x1d4   : > { %3629 = vmatprep.subr.bf16.mxu0 %v4127_v1  ;;  %v1392_v12 = vmul.f32 %v1391_v58, %v4480_v37 }
 0x1da   : > { %3626 = vmatmul.mubr.msk.bf16.vlgmr.msra.gmra.mxu0 %vm971_vm5, %v1000_v56  ;;  %v1390_v56 = vmul.f32 %v1389_v54, %v4480_v37 }
 0x1db   : > { %3630 = vmatpush3.bf16.msra.mxu0 %v3906_v10  ;;  %3633 = vmatprep.mubr.msk.bf16.mxu0 %vm4128_vm0, %v4127_v1  ;;  %v1399_v10 = vmul.f32 %v1398_v55, %v4542_v15 }
 0x1dc   : > { %3631 = vmatprep.subr.bf16.mxu0 %v4127_v1 }
 0x1df   : > { %3632 = vmatpush3.bf16.msra.mxu0 %v3908_v6  ;;  %v1403_v6 = vstv %s3349_s25  ;;  %s4132_s25 = smov 24  }
 0x1e0   : > { %3645 = vmatprep.subr.bf16.mxu0 %v4127_v1 }
 0x1e2   : > { %3634 = vmatmul.mubr.msk.bf16.vlgmr.msra.gmra.mxu0 %vm919_vm1, %v4779_v49 }
 0x1e3   : > { %3646 = vmatpush3.bf16.msra.mxu0 %v3910_v44  ;;  %3649 = vmatprep.mubr.msk.bf16.mxu0 %vm4128_vm0, %v4127_v1  ;;  %v1397_v44 = vadd.f32 %v1396_v8, %v1390_v56 }
 0x1e4   : > { %3647 = vmatprep.subr.bf16.mxu0 %v4127_v1 }
 0x1e7   : > { %3648 = vmatpush3.bf16.msra.mxu0 %v3911_v20  ;;  %v1406_v20 = vstv %s3350_s26  ;;  %s5398_s26 = sld [smem:[#allocation57_spill]] }
 0x1e8   : > { %3659 = vmatprep.subr.bf16.mxu0 %v4127_v1 }
 0x292   : > { %v1049_v13 = vpop.f32.mrf.mxu0 }
 0x293   : > { %v4793_v14 = vpack.c.bf16 %v1049_v13, %v1049_v13  ;;  %v1400_v13 = vadd.f32 %v1399_v10, %v1392_v12 }
 0x294   : > { %v3621_v16 = vpop.f32.mrf.mxu0 }
 0x295   : > { %3642 = vmatmul.mubr.msk.bf16.vlgmr.msra.gmra.mxu1 %vm919_vm1, %v4793_v14  ;;  %v1404_v16 = vmul.f32 %v1403_v6, %v4555_v23 }
 0x296   : > { %v1052_v25 = vpop.f32.mrf.mxu0  ;;  %3655 = vmatprep.mubr.msk.bf16.mxu1 %vm4128_vm0, %v4127_v1 }
 0x297   : > { %v1411_v25 = vstv %s3351_s14 }
 0x298   : > { %v3622_v27 = vpop.f32.mrf.mxu0  ;;  %v1412_v15 = vmul.f32 %v1411_v25, %v4566_v31 }
 0x299   : > { %v1405_v27 = vadd.f32 %v1404_v16, %v1397_v44 }
 0x29a   : > { %v1091_v26 = vpop.f32.mrf.mxu0 }
 0x29b   : > { %v4799_v30 = vpack.c.bf16 %v1091_v26, %v1091_v26  ;;  %v1407_v26 = vmul.f32 %v1406_v20, %v4555_v23 }
 0x29c   : > { %v3627_v46 = vpop.f32.mrf.mxu0 }
 0x29d   : > { %3650 = vmatmul.mubr.msk.bf16.vlgmr.msra.gmra.mxu0 %vm919_vm1, %v4799_v30  ;;  %v1414_v46 = vstv %s3352_s5 }
 0x29e   : > { %v1094_v17 = vpop.f32.mrf.mxu0  ;;  %3661 = vmatprep.mubr.msk.bf16.mxu0 %vm4128_vm0, %v4127_v1  ;;  %v1415_v37 = vmul.f32 %v1414_v46, %v4566_v31  ;;  %v1438_v31 = vstv %s3358_s20  ;;  %s5400_s20 = sld [smem:[#allocation56_spill]] }
 0x29f   : > { %v1408_v17 = vadd.f32 %v1407_v26, %v1400_v13 }
 0x2a0   : > { %v3628_v18 = vpop.f32.mrf.mxu0 }
 0x2a1   : > { %v1419_v18 = vstv %s3353_s7  ;;  %s4133_s7 = smov [#allocation9]  }
 0x2a2   : > { %v1201_v29 = vpop.f32.mrf.mxu0 }
 0x2a3   : > { %v1202_v11 = vadd.f32 %v3334_v48, %v1201_v29  ;;  %v1413_v29 = vadd.f32 %v1412_v15, %v1405_v27 }
 0x2a4   : > { %v3635_v34 = vpop.f32.mrf.mxu0 }
 0x2a5   : > { %v1339_v19 = vpack.c.bf16 %v1202_v11, %v1202_v11  ;;  %v1422_v34 = vstv %s3354_s30  ;;  %s4001_s30 = sshll.u32 %s4133_s7, 4  ;;  %s4002_s30 = int_to_ptr.vmem [resolvable:$false] %s4001_s30 }
 0x2a6   : > { %v1204_v28 = vpop.f32.mrf.mxu0  ;;  %v1423_v23 = vmul.f32 %v1422_v34, %v4575_v35 }
 0x2a7   : > { %v1416_v28 = vadd.f32 %v1415_v37, %v1408_v17  ;;  %v3917_v37 = vld [vmem:[%s5387_s4 + $0x10] sm:$0xff]  }
 0x2a8   : > { %v3636_v32 = vpop.f32.mrf.mxu0 }
 0x2a9   : > { %v1420_v32 = vmul.f32 %v1419_v18, %v4575_v35  ;;  %v1424_v48 = vadd.f32 %v1423_v23, %v1416_v28  ;;  %v3916_v18 = vld [vmem:[%s5387_s4 + $0x18] sm:$0xff]  }
 0x355   : > { %v1267_v33 = vpop.f32.mrf.mxu1 }
 0x356   : > { %v1268_v7 = vadd.f32 %v3338_v47, %v1267_v33  ;;  %v1427_v47 = vstv %s3355_s1  ;;  %v1421_v33 = vadd.f32 %v1420_v32, %v1413_v29  ;;  %s5399_s1 = sld [smem:[#allocation55_spill]] }
 0x357   : > { %v3643_v21 = vpop.f32.mrf.mxu1 }
 0x358   : > { %v1340_v51 = vpack.c.bf16 %v1268_v7, %v1268_v7  ;;  %v1430_v7 = vstv %s3356_s19  ;;  %v1428_v21 = vmul.f32 %v1427_v47, %v4584_v38  ;;  %s5403_s19 = sld [smem:[#allocation58_spill]] }
 0x359   : > { %v1270_v36 = vpop.f32.mrf.mxu1  ;;  %v1431_v11 = vmul.f32 %v1430_v7, %v4584_v38 }
 0x35a   : > { %v1345_v45 = vsel %vm971_vm5, %v1340_v51, 0  ;;  %v1435_v51 = vstv %s3357_s17  ;;  %v1429_v36 = vadd.f32 %v1428_v21, %v1421_v33  ;;  %v3376_v33 = vld [vmem:[%s5391_s16 + $0x1] ss:$0 sm:$0xff] }
 0x35b   : > { %v3644_v60 = vpop.f32.mrf.mxu1  ;;  %3654 = vmatpush3.bf16.xpose.msra.mxu1 %v1345_v45  ;;  %v1432_v45 = vadd.f32 %v1431_v11, %v1424_v48  ;;  %v3367_v48 = vld [vmem:[%s5392_s23 + $0x1] ss:$0 sm:$0xff] }
 0x35c   : > { %3665 = vmatprep.subr.bf16.mxu1 %v4127_v1  ;;  %v1436_v60 = vmul.f32 %v1435_v51, %v4604_v50 }
 0x35d   : > { %v1333_v61 = vpop.f32.mrf.mxu0 }
 0x35e   : > { %v1334_v62 = vadd.f32 %v3342_v2, %v1333_v61  ;;  %v1443_v2 = vstv %s3359_s3  ;;  %v1437_v61 = vadd.f32 %v1436_v60, %v1429_v36  ;;  %s5404_s3 = sld [smem:[#allocation60_spill]] }
 0x35f   : > { %v3651_v3 = vpop.f32.mrf.mxu0  ;;  %v1444_v35 = vmul.f32 %v1443_v2, %v4612_v43 }
 0x360   : > { %v1464_v24 = vpack.c.bf16 %v1334_v62, %v1334_v62  ;;  %v1446_v62 = vstv %s3360_s15  ;;  %s5405_s15 = sld [smem:[#allocation20_spill]] }
 0x361   : > { %v1336_v52 = vpop.f32.mrf.mxu0 }
 0x362   : > { %v1469_v53 = vsel %vm1011_vm3, %v1464_v24, 0  ;;  %3656 = vmatmul.mubr.msk.bf16.vlgmr.msra.gmra.mxu1 %vm971_vm5, %v1339_v19  ;;  %v1439_v19 = vmul.f32 %v1438_v31, %v4604_v50  ;;  %v1447_v24 = vmul.f32 %v1446_v62, %v4612_v43  ;;  %v3385_v43 = vld [vmem:[%s5394_s11 + $0x1] ss:$0 sm:$0xff] }
 0x363   : > { %v3652_v63 = vpop.f32.mrf.mxu0  ;;  %3660 = vmatpush3.bf16.msra.mxu0 %v1469_v53  ;;  %3666 = vmatpush3.bf16.msra.mxu1 %v3912_v40  ;;  %v1445_v40 = vadd.f32 %v1444_v35, %v1437_v61 }
 0x364   : > { %3667 = vmatprep.subr.bf16.mxu1 %v4127_v1  ;;  %3669 = vmatprep.mubr.msk.bf16.mxu1 %vm4128_vm0, %v4127_v1  ;;  %v1440_v3 = vadd.f32 %v1439_v19, %v1432_v45 }
 0x365   : > { %3673 = vmatprep.subr.bf16.mxu0 %v4127_v1 }
 0x366   : > { %v1448_v53 = vadd.f32 %v1447_v24, %v1440_v3  ;;  %s3090_s18 = sand.u32 1, %s5405_s15   ;;  %s5137_s21 = sshll.u32 %s5405_s15, 7 }
 0x367   : > { %3668 = vmatpush3.bf16.msra.mxu1 %v3913_v4  ;;  %s5148_s14 = scalar_lea.sflag [#allocation10], %s3090_s18 }
 0x368   : > { %3681 = vmatprep.subr.bf16.mxu1 %v4127_v1 }
 0x36a   : > { %3670 = vmatmul.mubr.msk.bf16.vlgmr.msra.gmra.mxu1 %vm919_vm1, %v4779_v49 }
 0x36b   : > { %3682 = vmatpush3.bf16.msra.mxu1 %v3914_v57  ;;  %3685 = vmatprep.mubr.msk.bf16.mxu1 %vm4128_vm0, %v4127_v1 }
 0x36c   : > { %3683 = vmatprep.subr.bf16.mxu1 %v4127_v1 }
 0x36f   : > { %3684 = vmatpush3.bf16.msra.mxu1 %v3915_v0 }
 0x370   : > { %3695 = vmatprep.subr.bf16.mxu1 %v4127_v1 }
 0x372   : > { %3686 = vmatmul.mubr.msk.bf16.vlgmr.msra.gmra.mxu1 %vm919_vm1, %v4799_v30 }
 0x373   : > { %3697 = vmatprep.mubr.msk.bf16.mxu1 %vm4128_vm0, %v4127_v1 }
 0x422   : > { %v1381_v52 = vpop.f32.mrf.mxu1 }
 0x423   : > { %v1449_v63 = vmul.f32 %v1445_v40, %v1381_v52 }
 0x424   : > { %v3657_v4 = vpop.f32.mrf.mxu1 }
 0x425   : > { %v1450_v38 = vadd.f32 %v1449_v63, %v1448_v53 }
 0x426   : > { %v1384_v57 = vpop.f32.mrf.mxu1 }
 0x427   : > { %1451 = vst.msk [vmem:[#allocation2] sm:$0xff] %vm971_vm5, %v1450_v38  ;;  %v1452_v0 = vsel %vm971_vm5, %v1450_v38, -inf }
 0x428   : > { %1453 = vmax.xlane.f32.xlu1 %v1452_v0  ;;  %v3658_v39 = vpop.f32.mrf.mxu1  ;;  %v1512_v0 = vld [vmem:[%s5395_s10] sm:$0xf] }
 0x42a   : > { %v1572_v50 = vpop.f32.mrf.mxu1 }
 0x42b   : > { %v1573_v11 = vadd.f32 %v3367_v48, %v1572_v50  ;;  %v3415_v48 = vld [vmem:[%s5392_s23 + $0x2] ss:$0 sm:$0xff] }
 0x42c   : > { %v3671_v54 = vpop.f32.mrf.mxu1 }
 0x42d   : > { %v1708_v60 = vpack.c.bf16 %v1573_v11, %v1573_v11  ;;  %v1938_v54 = vsel %vm1011_vm3, %v1512_v0, 0 }
 0x42e   : > { %v1575_v55 = vpop.f32.mrf.mxu1 }
 0x42f   : > { %v3918_v55 = vld [vmem:[%s5387_s4 + $0x28] sm:$0xff]  }
 0x430   : > { %v3672_v8 = vpop.f32.mrf.mxu1 }
 0x432   : > { %v1702_v58 = vpop.f32.mrf.mxu1 }
 0x433   : > { %v1703_v56 = vadd.f32 %v3385_v43, %v1702_v58  ;;  %v3919_v43 = vld [vmem:[%s5387_s4 + $0x20] sm:$0xff]  }
 0x434   : > { %v3687_v10 = vpop.f32.mrf.mxu1 }
 0x435   : > { %v1838_v6 = vpack.c.bf16 %v1703_v56, %v1703_v56  ;;  %v3920_v56 = vld [vmem:[%s5386_s22 + $0x28] sm:$0xff]  }
 0x436   : > { %v1705_v12 = vpop.f32.mrf.mxu1 }
 0x437   : > { %v1843_v44 = vsel %vm1011_vm3, %v1838_v6, 0 }
 0x438   : > { %v3688_v20 = vpop.f32.mrf.mxu1  ;;  %3696 = vmatpush3.bf16.msra.mxu1 %v1843_v44  ;;  %v3921_v44 = vld [vmem:[%s5386_s22 + $0x20] sm:$0xff]  }
 0x439   : > { %3707 = vmatprep.subr.bf16.mxu1 %v4127_v1 }
 0x4b1   : > { %v1454_v13 = vpop.xlane.xlu1 %1453 }
 0x4b2   : > { %v1455_v16 = vsub.f32 %v1450_v38, %v1454_v13 }
 0x4b4   : > { %v1456_v25 = vmul.f32 1.442695, %v1455_v16  ;;  %v3922_v16 = vld [vmem:[%s5390_s6 + $0x28] sm:$0xff]  }
 0x4b6   : > { %3944 = vpow2.f32 %v1456_v25 }
 0x4c3   : > { %v3945_v27 = vpop.eup %3944 }
 0x4c4   : > { %v1458_v26 = vsel %vm971_vm5, %v3945_v27, 0.0 }
 0x4c5   : > { %1459 = vadd.xlane.f32.xlu1 %v1458_v26  ;;  %v3923_v26 = vld [vmem:[%s5390_s6 + $0x20] sm:$0xff]  }
 0x54e   : > { %v1460_v46 = vpop.xlane.xlu1 %1459 }
 0x54f   : > { %3946 = vrcp.f32 %v1460_v46 }
 0x55c   : > { %v3947_v17 = vpop.eup %3946 }
 0x55d   : > { %v1462_v15 = vmul.f32 %v3947_v17, %v3945_v27  ;;  %v3424_v17 = vld [vmem:[%s5391_s16 + $0x2] ss:$0 sm:$0xff] }
 0x55f   : > { %v1463_v29 = vpack.c.bf16 %v1462_v15, %v1462_v15 }
 0x561   : > { %3662 = vmatmul.mubr.msk.bf16.vlgmr.msra.gmra.mxu0 %vm971_vm5, %v1463_v29 }
 0x562   : > { %3674 = vmatpush3.bf16.msra.mxu0 %v3916_v18  ;;  %3677 = vmatprep.mubr.msk.bf16.mxu0 %vm4128_vm0, %v4127_v1 }
 0x563   : > { %3675 = vmatprep.subr.bf16.mxu0 %v4127_v1 }
 0x566   : > { %3676 = vmatpush3.bf16.msra.mxu0 %v3917_v37 }
 0x567   : > { %3689 = vmatprep.subr.bf16.mxu0 %v4127_v1 }
 0x569   : > { %3678 = vmatmul.mubr.msk.bf16.vlgmr.msra.gmra.mxu0 %vm919_vm1, %v4793_v14 }
 0x56a   : > { %3691 = vmatprep.mubr.msk.bf16.mxu0 %vm4128_vm0, %v4127_v1 }
 0x621   : > { %v1505_v34 = vpop.f32.mrf.mxu0 }
 0x622   : > { %v1511_v8 = vpack.c.bf16 %v1505_v34, %v1505_v34 }
 0x623   : > { %v3663_v28 = vpop.f32.mrf.mxu0 }
 0x625   : > { %v1508_v32 = vpop.f32.mrf.mxu0 }
 0x627   : > { %v3664_v47 = vpop.f32.mrf.mxu0 }
 0x629   : > { %v1637_v23 = vpop.f32.mrf.mxu0 }
 0x62a   : > { %v1638_v7 = vadd.f32 %v3376_v33, %v1637_v23 }
 0x62b   : > { %v3679_v21 = vpop.f32.mrf.mxu0 }
 0x62c   : > { %v1709_v51 = vpack.c.bf16 %v1638_v7, %v1638_v7 }
 0x62d   : > { %v1640_v36 = vpop.f32.mrf.mxu0 }
 0x62e   : > { %v1714_v31 = vsel %vm971_vm5, %v1709_v51, 0 }
 0x62f   : > { %v3680_v45 = vpop.f32.mrf.mxu0  ;;  %3690 = vmatpush3.bf16.xpose.msra.mxu0 %v1714_v31 }
 0x630   : > { %3701 = vmatprep.subr.bf16.mxu0 %v4127_v1 }
 0x636   : > { %3692 = vmatmul.mubr.msk.bf16.vlgmr.msra.gmra.mxu0 %vm971_vm5, %v1708_v60  ;;  %v3433_v60 = vld [vmem:[%s5394_s11 + $0x2] ss:$0 sm:$0xff] }
 0x637   : > { %3703 = vmatprep.mubr.msk.bf16.mxu0 %vm4128_vm0, %v4127_v1 }
 0x6f6   : > { %v1750_v2 = vpop.f32.mrf.mxu0 }
 0x6f7   : > { %v1818_v61 = vmul.f32 %v4673_v41, %v1750_v2  ;;  %v3407_v41 = vld [vmem:[%s5395_s10 + $0x4] sm:$0xf] }
 0x6f8   : > { %v3693_v19 = vpop.f32.mrf.mxu0 }
 0x6f9   : > { %v4897_v62 = vadd.f32 %v1818_v61, %v4678_v42  ;;  %v1892_v42 = vsel %vm1011_vm3, %v3407_v41, 0 }
 0x6fa   : > { %v1753_v3 = vpop.f32.mrf.mxu0  ;;  %3702 = vmatpush3.bf16.msra.mxu0 %v1892_v42 }
 0x6fb   : > { %v1826_v35 = vsel %vm971_vm5, %v4897_v62, -inf  ;;  %3713 = vmatprep.subr.bf16.mxu0 %v4127_v1 }
 0x6fc   : > { %1827 = vmax.xlane.f32.xlu1 %v1826_v35  ;;  %v3694_v40 = vpop.f32.mrf.mxu0 }
 0x785   : > { %v1828_v24 = vpop.xlane.xlu1 %1827 }
 0x786   : > { %v1829_v52 = vsub.f32 %v4897_v62, %v1828_v24 }
 0x788   : > { %v1830_v53 = vmul.f32 1.442695, %v1829_v52 }
 0x78a   : > { %3948 = vpow2.f32 %v1830_v53 }
 0x797   : > { %v3949_v63 = vpop.eup %3948 }
 0x798   : > { %v1832_v4 = vsel %vm971_vm5, %v3949_v63, 0.0 }
 0x799   : > { %1833 = vadd.xlane.f32.xlu1 %v1832_v4 }
 0x822   : > { %v1834_v38 = vpop.xlane.xlu1 %1833 }
 0x823   : > { %3950 = vrcp.f32 %v1834_v38 }
 0x830   : > { %v3951_v57 = vpop.eup %3950 }
 0x831   : > { %v1836_v39 = vmul.f32 %v3951_v57, %v3949_v63 }
 0x833   : > { %v1837_v50 = vpack.c.bf16 %v1836_v39, %v1836_v39 }
 0x835   : > { %3698 = vmatmul.mubr.msk.bf16.vlgmr.msra.gmra.mxu1 %vm971_vm5, %v1837_v50 }
 0x836   : > { %3708 = vmatpush3.bf16.msra.mxu1 %v1938_v54  ;;  %3709 = vmatprep.mubr.msk.bf16.mxu1 %vm4128_vm0, %v4127_v1 }
 0x837   : > { %3721 = vmatprep.subr.bf16.mxu1 %v4127_v1 }
 0x83d   : > { %3710 = vmatmul.mubr.msk.bf16.vlgmr.msra.gmra.mxu1 %vm971_vm5, %v1511_v8 }
 0x83e   : > { %3722 = vmatpush3.bf16.msra.mxu1 %v3918_v55  ;;  %3725 = vmatprep.mubr.msk.bf16.mxu1 %vm4128_vm0, %v4127_v1 }
 0x83f   : > { %3723 = vmatprep.subr.bf16.mxu1 %v4127_v1 }
 0x842   : > { %3724 = vmatpush3.bf16.msra.mxu1 %v3919_v43 }
 0x843   : > { %3737 = vmatprep.subr.bf16.mxu1 %v4127_v1 }
 0x845   : > { %3726 = vmatmul.mubr.msk.bf16.vlgmr.msra.gmra.mxu1 %vm919_vm1, %v4793_v14 }
 0x846   : > { %3739 = vmatprep.mubr.msk.bf16.mxu1 %vm4128_vm0, %v4127_v1 }
 0x8f5   : > { %v1879_v58 = vpop.f32.mrf.mxu1 }
 0x8f6   : > { %v1885_v10 = vpack.c.bf16 %v1879_v58, %v1879_v58  ;;  %v3924_v58 = vld [vmem:[%s5386_s22 + $0x38] sm:$0xff]  }
 0x8f7   : > { %v3699_v6 = vpop.f32.mrf.mxu1 }
 0x8f8   : > { %3704 = vmatmul.mubr.msk.bf16.vlgmr.msra.gmra.mxu0 %vm971_vm5, %v1885_v10  ;;  %v3925_v10 = vld [vmem:[%s5386_s22 + $0x30] sm:$0xff]   ;;  %v3926_v6 = vld [vmem:[%s5390_s6 + $0x38] sm:$0xff]  }
 0x8f9   : > { %v1882_v12 = vpop.f32.mrf.mxu1  ;;  %3714 = vmatpush3.bf16.msra.mxu0 %v3920_v56  ;;  %3717 = vmatprep.mubr.msk.bf16.mxu0 %vm4128_vm0, %v4127_v1 }
 0x8fa   : > { %3715 = vmatprep.subr.bf16.mxu0 %v4127_v1  ;;  %v3927_v12 = vld [vmem:[%s5390_s6 + $0x30] sm:$0xff]  }
 0x8fb   : > { %v3700_v20 = vpop.f32.mrf.mxu1 }
 0x8fd   : > { %v4941_v13 = vpop.f32.mrf.mxu1  ;;  %3716 = vmatpush3.bf16.msra.mxu0 %v3921_v44  ;;  %v3928_v44 = vld [vmem:[%s5387_s4 + $0x38] sm:$0xff]  }
 0x8fe   : > { %3729 = vmatprep.subr.bf16.mxu0 %v4127_v1 }
 0x8ff   : > { %v3711_v25 = vpop.f32.mrf.mxu1 }
 0x900   : > { %3718 = vmatmul.mubr.msk.bf16.vlgmr.msra.gmra.mxu0 %vm919_vm1, %v4779_v49 }
 0x901   : > { %v1977_v27 = vpop.f32.mrf.mxu1  ;;  %3730 = vmatpush3.bf16.msra.mxu0 %v3922_v16  ;;  %3733 = vmatprep.mubr.msk.bf16.mxu0 %vm4128_vm0, %v4127_v1 }
 0x902   : > { %3731 = vmatprep.subr.bf16.mxu0 %v4127_v1  ;;  %v3929_v27 = vld [vmem:[%s5387_s4 + $0x30] sm:$0xff]  }
 0x903   : > { %v3712_v46 = vpop.f32.mrf.mxu1 }
 0x905   : > { %v2104_v15 = vpop.f32.mrf.mxu1  ;;  %3732 = vmatpush3.bf16.msra.mxu0 %v3923_v26 }
 0x906   : > { %v2105_v18 = vadd.f32 %v3424_v17, %v2104_v15  ;;  %3743 = vmatprep.subr.bf16.mxu0 %v4127_v1 }
 0x907   : > { %v3727_v29 = vpop.f32.mrf.mxu1 }
 0x908   : > { %v2176_v37 = vpack.c.bf16 %v2105_v18, %v2105_v18  ;;  %3734 = vmatmul.mubr.msk.bf16.vlgmr.msra.gmra.mxu0 %vm919_vm1, %v4799_v30  ;;  %v3480_v18 = vld [vmem:[%s5394_s11 + $0x3] ss:$0 sm:$0xff] }
 0x909   : > { %v2107_v34 = vpop.f32.mrf.mxu1  ;;  %3745 = vmatprep.mubr.msk.bf16.mxu0 %vm4128_vm0, %v4127_v1 }
 0x90a   : > { %v2181_v28 = vsel %vm971_vm5, %v2176_v37, 0 }
 0x90b   : > { %v3728_v32 = vpop.f32.mrf.mxu1  ;;  %3738 = vmatpush3.bf16.xpose.msra.mxu1 %v2181_v28 }
 0x90c   : > { %3749 = vmatprep.subr.bf16.mxu1 %v4127_v1 }
 0x9b8   : > { %v4965_v47 = vpop.f32.mrf.mxu0 }
 0x9ba   : > { %v3705_v33 = vpop.f32.mrf.mxu0 }
 0x9bc   : > { %v1931_v23 = vpop.f32.mrf.mxu0 }
 0x9be   : > { %v3706_v7 = vpop.f32.mrf.mxu0 }
 0x9c0   : > { %v2039_v21 = vpop.f32.mrf.mxu0 }
 0x9c1   : > { %v2040_v51 = vadd.f32 %v3415_v48, %v2039_v21 }
 0x9c2   : > { %v3719_v36 = vpop.f32.mrf.mxu0 }
 0x9c3   : > { %v2175_v11 = vpack.c.bf16 %v2040_v51, %v2040_v51 }
 0x9c4   : > { %v2042_v31 = vpop.f32.mrf.mxu0 }
 0x9c5   : > { %3740 = vmatmul.mubr.msk.bf16.vlgmr.msra.gmra.mxu1 %vm971_vm5, %v2175_v11  ;;  %v3471_v11 = vld [vmem:[%s5391_s16 + $0x3] ss:$0 sm:$0xff] }
 0x9c6   : > { %v3720_v45 = vpop.f32.mrf.mxu0  ;;  %3751 = vmatprep.mubr.msk.bf16.mxu1 %vm4128_vm0, %v4127_v1 }
 0x9c8   : > { %v2169_v2 = vpop.f32.mrf.mxu0 }
 0x9c9   : > { %v2170_v61 = vadd.f32 %v3433_v60, %v2169_v2  ;;  %v3462_v60 = vld [vmem:[%s5392_s23 + $0x3] ss:$0 sm:$0xff] }
 0x9ca   : > { %v3735_v19 = vpop.f32.mrf.mxu0 }
 0x9cb   : > { %v2305_v3 = vpack.c.bf16 %v2170_v61, %v2170_v61 }
 0x9cc   : > { %v2172_v35 = vpop.f32.mrf.mxu0 }
 0x9cd   : > { %v2310_v40 = vsel %vm1011_vm3, %v2305_v3, 0 }
 0x9ce   : > { %v3736_v24 = vpop.f32.mrf.mxu0  ;;  %3744 = vmatpush3.bf16.msra.mxu0 %v2310_v40 }
 0x9cf   : > { %3755 = vmatprep.subr.bf16.mxu0 %v4127_v1 }
 0xa85   : > { %v2217_v52 = vpop.f32.mrf.mxu1 }
 0xa86   : > { %v2285_v53 = vmul.f32 %v4733_v22, %v2217_v52  ;;  %v3455_v22 = vld [vmem:[%s5395_s10 + $0x8] sm:$0xf] }
 0xa87   : > { %v3741_v63 = vpop.f32.mrf.mxu1 }
 0xa88   : > { %v4980_v4 = vadd.f32 %v2285_v53, %v4735_v59  ;;  %v2359_v59 = vsel %vm1011_vm3, %v3455_v22, 0 }
 0xa89   : > { %v2220_v41 = vpop.f32.mrf.mxu1  ;;  %3750 = vmatpush3.bf16.msra.mxu1 %v2359_v59 }
 0xa8a   : > { %v2293_v42 = vsel %vm971_vm5, %v4980_v4, -inf  ;;  %3763 = vmatprep.subr.bf16.mxu1 %v4127_v1 }
 0xa8b   : > { %2294 = vmax.xlane.f32.xlu1 %v2293_v42  ;;  %v3742_v38 = vpop.f32.mrf.mxu1 }
 0xb14   : > { %v2295_v57 = vpop.xlane.xlu1 %2294 }
 0xb15   : > { %v2296_v0 = vsub.f32 %v4980_v4, %v2295_v57 }
 0xb17   : > { %v2297_v39 = vmul.f32 1.442695, %v2296_v0 }
 0xb19   : > { %3952 = vpow2.f32 %v2297_v39 }
 0xb26   : > { %v3953_v50 = vpop.eup %3952 }
 0xb27   : > { %v2299_v54 = vsel %vm971_vm5, %v3953_v50, 0.0 }
 0xb28   : > { %2300 = vadd.xlane.f32.xlu1 %v2299_v54 }
 0xbb1   : > { %v2301_v55 = vpop.xlane.xlu1 %2300 }
 0xbb2   : > { %3954 = vrcp.f32 %v2301_v55 }
 0xbbf   : > { %v3955_v8 = vpop.eup %3954 }
 0xbc0   : > { %v2303_v43 = vmul.f32 %v3955_v8, %v3953_v50 }
 0xbc2   : > { %v2304_v56 = vpack.c.bf16 %v2303_v43, %v2303_v43 }
 0xbc4   : > { %3746 = vmatmul.mubr.msk.bf16.vlgmr.msra.gmra.mxu0 %vm971_vm5, %v2304_v56 }
 0xbc5   : > { %3756 = vmatpush3.bf16.msra.mxu0 %v3924_v58  ;;  %3759 = vmatprep.mubr.msk.bf16.mxu0 %vm4128_vm0, %v4127_v1 }
 0xbc6   : > { %3757 = vmatprep.subr.bf16.mxu0 %v4127_v1 }
 0xbc9   : > { %3758 = vmatpush3.bf16.msra.mxu0 %v3925_v10 }
 0xbca   : > { %3771 = vmatprep.subr.bf16.mxu0 %v4127_v1 }
 0xbcc   : > { %3760 = vmatmul.mubr.msk.bf16.vlgmr.msra.gmra.mxu0 %vm919_vm1, %v4779_v49 }
 0xbcd   : > { %3772 = vmatpush3.bf16.msra.mxu0 %v3926_v6  ;;  %3775 = vmatprep.mubr.msk.bf16.mxu0 %vm4128_vm0, %v4127_v1 }
 0xbce   : > { %3773 = vmatprep.subr.bf16.mxu0 %v4127_v1 }
 0xbd1   : > { %3774 = vmatpush3.bf16.msra.mxu0 %v3927_v12  ;;  %v3504_v12 = vld [vmem:[%s5397_s0] ss:$0 sm:$0xff]  ;;  %s5143_s0 = scalar_lea.hbm %s5408_s2, %s5137_s21 }
 0xbd2   : > { %3785 = vmatprep.subr.bf16.mxu0 %v4127_v1 }
 0xbd4   : > { %3776 = vmatmul.mubr.msk.bf16.vlgmr.msra.gmra.mxu0 %vm919_vm1, %v4799_v30 }
 0xbd5   : > { %3787 = vmatprep.mubr.msk.bf16.mxu0 %vm4128_vm0, %v4127_v1 }
 0xc84   : > { %v2346_v49 = vpop.f32.mrf.mxu0 }
 0xc85   : > { %v2352_v20 = vpack.c.bf16 %v2346_v49, %v2346_v49 }
 0xc86   : > { %v3747_v16 = vpop.f32.mrf.mxu0 }
 0xc87   : > { %3752 = vmatmul.mubr.msk.bf16.vlgmr.msra.gmra.mxu1 %vm971_vm5, %v2352_v20 }
 0xc88   : > { %v2349_v25 = vpop.f32.mrf.mxu0  ;;  %3764 = vmatpush3.bf16.msra.mxu1 %v3928_v44  ;;  %3767 = vmatprep.mubr.msk.bf16.mxu1 %vm4128_vm0, %v4127_v1 }
 0xc89   : > { %3765 = vmatprep.subr.bf16.mxu1 %v4127_v1  ;;  %v3966_v25 = vld [vmem:[%s5396_s24] sm:$0xff] }
 0xc8a   : > { %v3748_v30 = vpop.f32.mrf.mxu0 }
 0xc8c   : > { %v2461_v26 = vpop.f32.mrf.mxu0  ;;  %3766 = vmatpush3.bf16.msra.mxu1 %v3929_v27 }
 0xc8d   : > { %3779 = vmatprep.subr.bf16.mxu1 %v4127_v1  ;;  %v2462_v3 = vadd.f32 %v3462_v60, %v2461_v26  ;;  %v3936_v60 = vld [vmem:[%s5402_s12 + $0x18] sm:$0xff]  }
 0xc8e   : > { %v3761_v46 = vpop.f32.mrf.mxu0 }
 0xc8f   : > { %3768 = vmatmul.mubr.msk.bf16.vlgmr.msra.gmra.mxu1 %vm919_vm1, %v4793_v14  ;;  %v1975_v14 = vadd.f32 %v4941_v13, %v4965_v47  ;;  %v2597_v35 = vpack.c.bf16 %v2462_v3, %v2462_v3  ;;  %v3507_v3 = vld [vmem:[%s5403_s19] ss:$0 sm:$0xff] }
 0xc90   : > { %v2464_v17 = vpop.f32.mrf.mxu0  ;;  %3781 = vmatprep.mubr.msk.bf16.mxu1 %vm4128_vm0, %v4127_v1 }
 0xc92   : > { %v3762_v15 = vpop.f32.mrf.mxu0 }
 0xc94   : > { %v2591_v29 = vpop.f32.mrf.mxu0 }
 0xc95   : > { %v2592_v37 = vadd.f32 %v3480_v18, %v2591_v29 }
 0xc96   : > { %v3777_v34 = vpop.f32.mrf.mxu0 }
 0xc97   : > { %v2727_v28 = vpack.c.bf16 %v2592_v37, %v2592_v37  ;;  %v3930_v37 = vld [vmem:[%s5398_s26 + $0x8] sm:$0xff]   ;;  %v3931_v34 = vld [vmem:[%s5398_s26] sm:$0xff]  }
 0xc98   : > { %v2594_v32 = vpop.f32.mrf.mxu0 }
 0xc99   : > { %v2732_v33 = vsel %vm1011_vm3, %v2727_v28, 0 }
 0xc9a   : > { %v3778_v23 = vpop.f32.mrf.mxu0  ;;  %3786 = vmatpush3.bf16.msra.mxu0 %v2732_v33 }
 0xc9b   : > { %3797 = vmatprep.subr.bf16.mxu0 %v4127_v1 }
 0xd47   : > { %v2395_v7 = vpop.f32.mrf.mxu1 }
 0xd48   : > { %v2401_v48 = vadd.f32 %v2395_v7, %v1975_v14  ;;  %v3506_v7 = vld [vmem:[%s5400_s20] ss:$0 sm:$0xff] }
 0xd49   : > { %v3753_v21 = vpop.f32.mrf.mxu1 }
 0xd4b   : > { %v2398_v51 = vpop.f32.mrf.mxu1 }
 0xd4d   : > { %v3754_v36 = vpop.f32.mrf.mxu1 }
 0xd4e   : > { %v3932_v36 = vld [vmem:[%s5401_s28 + $0x38] sm:$0xff]   ;;  %s4131_s28 = smov 8  }
 0xd4f   : > { %v2526_v31 = vpop.f32.mrf.mxu1 }
 0xd50   : > { %v2527_v45 = vadd.f32 %v3471_v11, %v2526_v31  ;;  %v3933_v11 = vld [vmem:[%s5402_s12 + $0x30] sm:$0xff]   ;;  %v3934_v31 = vld [vmem:[%s5402_s12 + $0x28] sm:$0xff]  }
 0xd51   : > { %v3769_v2 = vpop.f32.mrf.mxu1 }
 0xd52   : > { %v2598_v61 = vpack.c.bf16 %v2527_v45, %v2527_v45  ;;  %v3935_v45 = vld [vmem:[%s5402_s12 + $0x20] sm:$0xff]   ;;  %v3937_v2 = vld [vmem:[%s5402_s12 + $0x10] sm:$0xff]  }
 0xd53   : > { %v2529_v19 = vpop.f32.mrf.mxu1 }
 0xd54   : > { %v2603_v13 = vsel %vm971_vm5, %v2598_v61, 0  ;;  %v3938_v61 = vld [vmem:[%s5402_s12 + $0x8] sm:$0xff]   ;;  %v3939_v19 = vld [vmem:[%s5402_s12] sm:$0xff]  }
 0xd55   : > { %v3770_v47 = vpop.f32.mrf.mxu1  ;;  %3780 = vmatpush3.bf16.xpose.msra.mxu1 %v2603_v13 }
 0xd56   : > { %3791 = vmatprep.subr.bf16.mxu1 %v4127_v1 }
 0xd5c   : > { %3782 = vmatmul.mubr.msk.bf16.vlgmr.msra.gmra.mxu1 %vm971_vm5, %v2597_v35 }
 0xd5d   : > { %3793 = vmatprep.mubr.msk.bf16.mxu1 %vm4128_vm0, %v4127_v1 }
 0xe1c   : > { %v2639_v40 = vpop.f32.mrf.mxu1 }
 0xe1d   : > { %v2707_v24 = vmul.f32 %v4749_v9, %v2639_v40  ;;  %v3502_v9 = vld [vmem:[%s5395_s10 + $0xc] sm:$0xf] }
 0xe1e   : > { %v3783_v52 = vpop.f32.mrf.mxu1 }
 0xe1f   : > { %v5053_v53 = vadd.f32 %v2707_v24, %v4751_v5  ;;  %v2781_v5 = vsel %vm1011_vm3, %v3502_v9, 0  ;;  %v3511_v9 = vld [vmem:[%s5404_s3] ss:$0 sm:$0xff] }
 0xe20   : > { %v2642_v63 = vpop.f32.mrf.mxu1  ;;  %3792 = vmatpush3.bf16.msra.mxu1 %v2781_v5 }
 0xe21   : > { %v2715_v41 = vsel %vm971_vm5, %v5053_v53, -inf  ;;  %3805 = vmatprep.subr.bf16.mxu1 %v4127_v1 }
 0xe22   : > { %2716 = vmax.xlane.f32.xlu1 %v2715_v41  ;;  %v3784_v42 = vpop.f32.mrf.mxu1 }
 0xeab   : > { %v2717_v38 = vpop.xlane.xlu1 %2716 }
 0xeac   : > { %v2718_v57 = vsub.f32 %v5053_v53, %v2717_v38 }
 0xeae   : > { %v2719_v0 = vmul.f32 1.442695, %v2718_v57 }
 0xeb0   : > { %3956 = vpow2.f32 %v2719_v0 }
 0xebd   : > { %v3957_v39 = vpop.eup %3956 }
 0xebe   : > { %v2721_v50 = vsel %vm971_vm5, %v3957_v39, 0.0 }
 0xebf   : > { %2722 = vadd.xlane.f32.xlu1 %v2721_v50 }
 0xf48   : > { %v2723_v54 = vpop.xlane.xlu1 %2722 }
 0xf49   : > { %3958 = vrcp.f32 %v2723_v54 }
 0xf56   : > { %v3959_v22 = vpop.eup %3958 }
 0xf57   : > { %v2725_v59 = vmul.f32 %v3959_v22, %v3957_v39 }
 0xf59   : > { %v2726_v55 = vpack.c.bf16 %v2725_v59, %v2725_v59 }
 0xf5b   : > { %3788 = vmatmul.mubr.msk.bf16.vlgmr.msra.gmra.mxu0 %vm971_vm5, %v2726_v55 }
 0xf5c   : > { %3801 = vmatprep.mubr.msk.bf16.mxu0 %vm4128_vm0, %v4127_v1  ;;  %3798 = vmatpush3.bf16.msra.mxu0 %v3930_v37 }
 0xf5d   : > { %3799 = vmatprep.subr.bf16.mxu0 %v4127_v1 }
 0xf60   : > { %3800 = vmatpush3.bf16.msra.mxu0 %v3931_v34 }
0x101b   : > { %v2768_v8 = vpop.f32.mrf.mxu0 }
0x101c   : > { %v2774_v43 = vpack.c.bf16 %v2768_v8, %v2768_v8 }
0x101d   : > { %v3789_v58 = vpop.f32.mrf.mxu0 }
0x101e   : > { %3794 = vmatmul.mubr.msk.bf16.vlgmr.msra.gmra.mxu1 %vm971_vm5, %v2774_v43 }
0x101f   : > { %v2771_v56 = vpop.f32.mrf.mxu0  ;;  %3821 = vmatprep.mubr.msk.bf16.mxu1 %vm4128_vm0, %v4127_v1  ;;  %3806 = vmatpush3.bf16.msra.mxu1 %v3932_v36 }
0x1020   : > { %3807 = vmatprep.subr.bf16.mxu1 %v4127_v1 }
0x1021   : > { %v3790_v10 = vpop.f32.mrf.mxu0 }
0x1023   : > { %3808 = vmatpush3.bf16.msra.mxu1 %v3933_v11 }
0x1024   : > { %3809 = vmatprep.subr.bf16.mxu1 %v4127_v1 }
0x1027   : > { %3810 = vmatpush3.bf16.msra.mxu1 %v3934_v31 }
0x1028   : > { %3811 = vmatprep.subr.bf16.mxu1 %v4127_v1 }
0x102b   : > { %3812 = vmatpush3.bf16.msra.mxu1 %v3935_v45 }
0x102c   : > { %3813 = vmatprep.subr.bf16.mxu1 %v4127_v1 }
0x102f   : > { %3814 = vmatpush3.bf16.msra.mxu1 %v3936_v60 }
0x1030   : > { %3815 = vmatprep.subr.bf16.mxu1 %v4127_v1 }
0x1033   : > { %3816 = vmatpush3.bf16.msra.mxu1 %v3937_v2 }
0x1034   : > { %3817 = vmatprep.subr.bf16.mxu1 %v4127_v1 }
0x1037   : > { %3818 = vmatpush3.bf16.msra.mxu1 %v3938_v61 }
0x1038   : > { %3819 = vmatprep.subr.bf16.mxu1 %v4127_v1 }
0x103b   : > { %3820 = vmatpush3.bf16.msra.mxu1 %v3939_v19 }
0x10de   : > { %v2817_v6 = vpop.f32.mrf.mxu1 }
0x10df   : > { %v2823_v49 = vadd.f32 %v2817_v6, %v2401_v48 }
0x10e0   : > { %v3795_v44 = vpop.f32.mrf.mxu1 }
0x10e1   : > { %v2831_v20 = vadd.f32 %v3504_v12, %v2823_v49 }
0x10e2   : > { %v2820_v16 = vpop.f32.mrf.mxu1 }
0x10e3   : > { %v2832_v27 = vadd.f32 %v3966_v25, %v2831_v20 }
0x10e4   : > { %v3796_v30 = vpop.f32.mrf.mxu1 }
0x10e5   : > { %v2835_v26 = vsel %vm919_vm1, %v2832_v27, 0.0 }
0x10e6   : > { %2836 = vadd.xlane.f32.xlu1 %v2835_v26 }
0x116f   : > { %v2837_v46 = vpop.xlane.xlu1 %2836 }
0x1170   : > { %v2839_v17 = vmul.f32 0.03125, %v2837_v46 }
0x1172   : > { %v2840_v15 = vsub.f32 %v2832_v27, %v2839_v17 }
0x1174   : > { %v2841_v18 = vmul.f32 %v2840_v15, %v2840_v15 }
0x1176   : > { %v2842_v29 = vsel %vm919_vm1, %v2841_v18, 0.0 }
0x1177   : > { %2843 = vadd.xlane.f32.xlu0 %v2842_v29 }
0x118d   : > { %2288 = vrot.lane.b32.xlu0 %v4980_v4, %s4130_s9  ;;  %v3505_v4 = vld [vmem:[%s5399_s1] ss:$0 sm:$0xff]  ;;  %s5409_s9 = scalar_lea.vmem [#allocation9], %s5406_s27  ;;  %s4003_s1 = scalar_lea.vmem %s4002_s30, 256 }
0x118e   : > { %s3122_s29 = sshll.u32 %s5409_s9, 4  ;;  %s3123_s29 = int_to_ptr.vmem [resolvable:$true] %s3122_s29 }
0x118f   : > { %s3997_s5 = scalar_lea.vmem %s3123_s29, 128  ;;  %p4004_p8 = scmp.lt.s32.totalorder %s3123_s29, %s4002_s30 }
0x1190   : > { %p3998_p6 = scmp.ne.s32.totalorder %s3123_s29, %s3997_s5  ;;  %p4005_p11 = scmp.lt.s32.totalorder %s4003_s1, %s3997_s5 }
0x1192   : > { %p3999_p12 = pnand %p3998_p6, %p5410_p10  ;;  %p4006_p13 = por %p4005_p11, %p4004_p8 }
0x1194   : > { %p4000_p7 = pneg %p3999_p12 }
0x1196   : > { %p4007_p1 = pnand %p4006_p13, %p4000_p7 }
0x1200   : > { %v2844_v28 = vpop.xlane.xlu0 %2843 }
0x1201   : > { %v2845_v32 = vmul.f32 0.03125, %v2844_v28 }
0x1203   : > { %v2846_v33 = vadd.f32 1e-05, %v2845_v32 }
0x1204   : > { %v2289_v12 = vpop.permute.xlu0 %2288 }
0x1205   : > { %3960 = vrsqrt.f32 %v2846_v33 }
0x1212   : > { %v3961_v23 = vpop.eup %3960 }
0x1213   : > { %v2848_v14 = vmul.f32 %v3961_v23, %v2840_v15 }
0x1215   : > { %v2855_v48 = vmul.f32 %v3505_v4, %v2848_v14 }
0x1217   : > { %v2862_v21 = vadd.f32 %v3506_v7, %v2855_v48 }
0x1219   : > { %v2863_v51 = vpack.c.bf16 %v2862_v21, %v2862_v21 }
0x121b   : > { %3802 = vmatmul.mubr.msk.bf16.vlgmr.msra.gmra.mxu0 %vm919_vm1, %v2863_v51 }
0x12db   : > { %v2924_v13 = vpop.f32.mrf.mxu0 }
0x12dc   : > { %v2925_v47 = vadd.f32 %v3507_v3, %v2924_v13 }
0x12dd   : > { %v3803_v35 = vpop.f32.mrf.mxu0 }
0x12de   : > { %v2930_v40 = vpack.c.bf16 %v2925_v47, %v2925_v47 }
0x12df   : > { %v2927_v24 = vpop.f32.mrf.mxu0 }
0x12e0   : > { %v2932_v52 = vmul.bf16 1027030327, %v2930_v40  ;;  %v2931_v39 = vmul.bf16 1056980736, %v2930_v40 }
0x12e1   : > { %v3804_v63 = vpop.f32.mrf.mxu0 }
0x12e2   : > { %v2933_v41 = vmul.bf16 %v2932_v52, %v2930_v40 }
0x12e4   : > { %v2934_v42 = vmul.bf16 %v2933_v41, %v2930_v40 }
0x12e6   : > { %v2935_v38 = vadd.bf16 %v2934_v42, %v2930_v40 }
0x12e8   : > { %v2936_v57 = vmul.bf16 1061961548, %v2935_v38 }
0x12ea   : > { %3962 = vtanh.bf16 %v2936_v57 }
0x12f8   : > { %v3963_v0 = vpop.eup %3962 }
0x12f9   : > { %v2938_v1 = vadd.bf16 1065369472, %v3963_v0 }
0x12fb   : > { %v2939_v50 = vmul.bf16 %v2938_v1, %v2931_v39 }
0x12fd   : > { %3822 = vmatmul.mubr.bf16.vlgmr.msra.gmra.mxu1 %v2939_v50 }
0x13bd   : > { %v3045_v5 = vpop.f32.mrf.mxu1 }
0x13be   : > { %v3046_v54 = vadd.f32 %v3511_v9, %v3045_v5 }
0x13bf   : > { %v3823_v22 = vpop.f32.mrf.mxu1 }
0x13c0   : > { %v3051_v59 = vadd.f32 %v3046_v54, %v2862_v21 }
0x13c1   : > { %v3048_v55 = vpop.f32.mrf.mxu1 }
0x13c2   : > { %v3054_v8 = vsel %vm919_vm1, %v3051_v59, 0.0 }
0x13c3   : > { %3055 = vadd.xlane.f32.xlu1 %v3054_v8  ;;  %v3824_v43 = vpop.f32.mrf.mxu1 }
0x13d4   : > { %1821 = vrot.lane.b32.xlu1 %v4897_v62, %s4131_s28 }
0x144c   : > { %v3056_v58 = vpop.xlane.xlu1 %3055 }
0x144d   : > { %v3057_v56 = vmul.f32 0.03125, %v3056_v58 }
0x144f   : > { %v5130_v10 = vsub.f32 %v3051_v59, %v3057_v56 }
0x1450   : > { %v1822_v6 = vpop.permute.xlu1 %1821 }
0x1451   : > { %1825 = vst.msk [vmem:[#allocation2] sm:$0xff] %vm1824_vm12, %v1822_v6  ;;  %v3059_v49 = vmul.f32 %v5130_v10, %v5130_v10 }
0x1452   : > { %2292 = vst.msk [vmem:[#allocation2] sm:$0xff] %vm2291_vm13, %v2289_v12 }
0x1453   : > { %v3060_v44 = vsel %vm919_vm1, %v3059_v49, 0.0 }
0x1454   : > { %3061 = vadd.xlane.f32.xlu1 %v3060_v44 }
0x1465   : > { %2710 = vrot.lane.b32.xlu1 %v5053_v53, %s4132_s25 }
0x1466   : > { %4010 = shalt.err (!%p4007_p1)
}
0x1467   : > { %s4011_s19 = scalar_lea.hbm %s5143_s0, 128  ;;  %s4015_s3 = scalar_lea.hbm %s5408_s2, 256 }
0x1468   : > { %p4012_p2 = scmp.ne.s32.totalorder %s5143_s0, %s4011_s19  ;;  %p4016_p9 = scmp.lt.s32.totalorder %s5143_s0, %s5408_s2 }
0x1469   : > { %p4017_p0 = scmp.lt.s32.totalorder %s4015_s3, %s4011_s19 }
0x146a   : > { %p4013_p3 = pnand %p4012_p2, %p5410_p10 }
0x146b   : > { %p4018_p5 = por %p4017_p0, %p4016_p9 }
0x146c   : > { %p4014_p4 = pneg %p4013_p3 }
0x146e   : > { %p4019_p6 = pnand %p4018_p5, %p4014_p4 }
0x1470   : > { %4022 = shalt.err (!%p4019_p6)
}
0x1471   : > { %3834 = dma.vmem_to_hbm [thread:$0]  (%p5410_p10), %s3123_s29, 128, %s5143_s0, %s5148_s14   ;;  %vm2713_vm14 = vcmask 261312  }
0x1472   : > { %s870_s18 = scalar_lea.vmem [#allocation11], %s5406_s27  ;;  %s5411_s25 = sld [smem:[#allocation65_spill]] }
0x1473   : > { %s3135_s24 = sshll.u32 %s870_s18, 4  ;;  %s4134_s0 = smov [#allocation11]   ;;  %s3136_s24 = int_to_ptr.vmem [resolvable:$true] %s3135_s24 }
0x1474   : > { %s4023_s7 = scalar_lea.vmem %s3136_s24, 128  ;;  %s4027_s29 = sshll.u32 %s4134_s0, 4  ;;  %s4028_s29 = int_to_ptr.vmem [resolvable:$false] %s4027_s29 }
0x1475   : > { %p4024_p12 = scmp.ne.s32.totalorder %s3136_s24, %s4023_s7  ;;  %s4029_s30 = scalar_lea.vmem %s4028_s29, 256 }
0x1476   : > { %p4030_p11 = scmp.lt.s32.totalorder %s3136_s24, %s4028_s29  ;;  %p4031_p13 = scmp.lt.s32.totalorder %s4029_s30, %s4023_s7 }
0x1477   : > { %p4025_p7 = pnand %p4024_p12, %p5410_p10 }
0x1478   : > { %s3133_s5 = scalar_lea.hbm %s5411_s25, %s5137_s21  ;;  %p4032_p1 = por %p4031_p13, %p4030_p11 }
0x1479   : > { %p4026_p8 = pneg %p4025_p7 }
0x147b   : > { %p4033_p2 = pnand %p4032_p1, %p4026_p8 }
0x14dd   : > { %v3062_v62 = vpop.xlane.xlu1 %3061 }
0x14de   : > { %v3063_v53 = vmul.f32 0.03125, %v3062_v62 }
0x14e0   : > { %v3064_v20 = vadd.f32 1e-05, %v3063_v53 }
0x14e1   : > { %v2711_v16 = vpop.permute.xlu1 %2710 }
0x14e2   : > { %3964 = vrsqrt.f32 %v3064_v20  ;;  %2714 = vst.msk [vmem:[#allocation2] sm:$0xff] %vm2713_vm14, %v2711_v16 }
0x14e9   : > { %v3083_v25 = vld [vmem:[#allocation2] sm:$0xff] }
0x14ea   : > { %3084 = vst.msk [vmem:[%s870_s18] sm:$0xff] %vm919_vm1, %v3083_v25 }
0x14eb   : > { %4036 = shalt.err (!%p4033_p2)
}
0x14ec   : > { %s4037_s1 = scalar_lea.hbm %s3133_s5, 128  ;;  %s4041_s20 = scalar_lea.hbm %s5411_s25, 256 }
0x14ed   : > { %p4038_p3 = scmp.ne.s32.totalorder %s3133_s5, %s4037_s1  ;;  %p4042_p0 = scmp.lt.s32.totalorder %s3133_s5, %s5411_s25 }
0x14ee   : > { %p4043_p5 = scmp.lt.s32.totalorder %s4041_s20, %s4037_s1 }
0x14ef   : > { %p4039_p4 = pnand %p4038_p3, %p5410_p10 }
0x14f0   : > { %p4044_p6 = por %p4043_p5, %p4042_p0 }
0x14f1   : > { %p4040_p9 = pneg %p4039_p4 }
0x14f3   : > { %p4045_p12 = pnand %p4044_p6, %p4040_p9 }
0x14f5   : > { %4048 = shalt.err (!%p4045_p12)
}
0x14f6   : > { %s5412_s28 = sld [smem:[#allocation17_spill]]  ;;  %v3965_v27 = vpop.eup %3964  ;;  %s856_s30 = scalar_lea.vmem [#allocation8], %s5406_s27 }
0x14f7   : > { %3835 = dma.vmem_to_hbm [thread:$0]  (%p5410_p10), %s3136_s24, 128, %s3133_s5, %s5148_s14   ;;  %v3066_v26 = vmul.f32 %v3965_v27, %v5130_v10 }
0x14f8   : > { %s5413_s9 = sld [smem:[#allocation61_spill]]  ;;  %s3109_s1 = sshll.u32 %s856_s30, 4  ;;  %s3110_s1 = int_to_ptr.vmem [resolvable:$true] %s3109_s1 }
0x14f9   : > { %s5414_s29 = sld [smem:[#allocation62_spill]]  ;;  %s4049_s5 = scalar_lea.vmem %s3110_s1, 128 }
0x14fa   : > { %s5415_s20 = sld [smem:[#allocation63_spill]]  ;;  %p4050_p7 = scmp.ne.s32.totalorder %s3110_s1, %s4049_s5 }
0x14fb   : > { %s4135_s15 = smov [#allocation8]  }
0x14fc   : > { %s5416_s14 = sand.u32 1, %s5412_s28   ;;  %p4051_p8 = pnand %p4050_p7, %p5410_p10 }
0x14fd   : > { %s3086_s24 = scalar_lea.sflag [#allocation4], %s5416_s14  ;;  %s4053_s18 = sshll.u32 %s4135_s15, 4  ;;  %s4054_s18 = int_to_ptr.vmem [resolvable:$false] %s4053_s18 }
0x14fe   : > { %v3520_v30 = vld [vmem:[%s5413_s9] ss:$0 sm:$0xff]  ;;  %p4052_p11 = pneg %p4051_p8  ;;  %s4055_s27 = scalar_lea.vmem %s4054_s18, 256 }
0x14ff   : > { %v3521_v46 = vld [vmem:[%s5414_s29] ss:$0 sm:$0xff]  ;;  %v3073_v17 = vmul.f32 %v3520_v30, %v3066_v26  ;;  %p4056_p13 = scmp.lt.s32.totalorder %s3110_s1, %s4054_s18  ;;  %p4057_p1 = scmp.lt.s32.totalorder %s4055_s27, %s4049_s5 }
0x1500   : > { %s3107_s3 = scalar_lea.hbm %s5415_s20, %s5137_s21 }
0x1501   : > { %v3080_v15 = vadd.f32 %v3521_v46, %v3073_v17  ;;  %p4058_p2 = por %p4057_p1, %p4056_p13 }
0x1503   : > { %3081 = vst.msk [vmem:[%s856_s30] sm:$0xff] %vm919_vm1, %v3080_v15  ;;  %p4059_p3 = pnand %p4058_p2, %p4052_p11 }
0x1505   : > { %4062 = shalt.err (!%p4059_p3)
}
0x1506   : > { %s4063_s21 = scalar_lea.hbm %s3107_s3, 128  ;;  %s4067_s9 = scalar_lea.hbm %s5415_s20, 256 }
0x1507   : > { %p4064_p4 = scmp.ne.s32.totalorder %s3107_s3, %s4063_s21  ;;  %p4068_p5 = scmp.lt.s32.totalorder %s3107_s3, %s5415_s20 }
0x1508   : > { %p4069_p6 = scmp.lt.s32.totalorder %s4067_s9, %s4063_s21 }
0x1509   : > { %p4065_p9 = pnand %p4064_p4, %p5410_p10 }
0x150a   : > { %p4070_p12 = por %p4069_p6, %p4068_p5 }
0x150b   : > { %p4066_p0 = pneg %p4065_p9 }
0x150d   : > { %p4071_p7 = pnand %p4070_p12, %p4066_p0 }
0x150f   : > { %4074 = shalt.err (!%p4071_p7)
}
0x1510   : > { %3833 = dma.vmem_to_hbm [thread:$0]  (%p5410_p10), %s3110_s1, 128, %s3107_s3, %s3086_s24  }
0x1511 PF: > { %s5417_s29 = sld [smem:[#allocation19_spill]] }
0x1512   : > { %s5418_s30 = sld [smem:[#allocation16_spill]] }
0x1513   : > { %s5419_s19 = sld [smem:[#allocation24_spill]] }
0x1517   : > { %p3860_p8 = scmp.ge.s32.totalorder %s5417_s29, 2 }
0x1518   : > { %s3147_s17 = sand.u32 1, %s5418_s30  }
0x1519   : > { %p5420_p11 = scmp.ne.s32.totalorder %s5419_s19, 0  ;;  %s3148_s14 = scalar_lea.sflag [#allocation4], %s3147_s17 }
0x151b   : > { %p3847_p13 = pnand %p3860_p8, %p5420_p11 }
0x151d   : > { %p3848_p1 = pneg %p3847_p13 }
0x151f   : > { %4100 = dma.done.wait (%p3848_p1), %s3148_s14, 128  }
0x1520   : > { %4102 = vsyncadd (%p3848_p1), %s3148_s14, 4294967168  ;;  %s5421_s5 = sadd.s32 4294967294, %s5417_s29  }
0x1521   : > { %s3156_s15 = sand.u32 1, %s5421_s5  }
0x1522   : > { %s3157_s18 = scalar_lea.sflag [#allocation10], %s3156_s15 }
0x1523   : > { %4104 = dma.done.wait (%p3848_p1), %s3157_s18, 256  }
0x1524   : > { %4106 = vsyncadd (%p3848_p1), %s3157_s18, 4294967040  ;;  %s5422_s28 = sld [smem:[#allocation21_spill]] }
0x1525   : > { %s5423_s27 = sld [smem:[#allocation17_spill]] }
0x1526   : > { %s5424_s3 = sld [smem:[#allocation18_spill]] }
0x1527   : > { %s5425_s7 = sld [smem:[#allocation22_spill]] }
0x152a   : > { %p42_p10 = scmp.ge.s32.totalorder %s5422_s28, 4  }
0x152c   :  { %44 = sbr.rel (!%p42_p10) target bundleno = 35 (0x23), region = 222 }
0x1531   :  { %3171 = vsyncpa [#allocation4], 1 }
0x1532   :  { %3173 = vsyncpa [#allocation4 + $0x1], 1 }
0x1533   :  { %3174 = vsyncpa [#allocation10], 1 }
0x1534   :  { %3176 = vsyncpa [#allocation10 + $0x1], 1 }
0x1535   :  { %3177 = vsyncpa [#allocation5], 1 }
0x1536   :  { %3179 = vsyncpa [#allocation5 + $0x1], 1 }
0x1537   :  { %3180 = vsyncpa [#allocation7], 1 }

</bundles_post_ra>
